<compile_context>
chip_gen: v6e
topology: v6e:2x2x1
jax: 0.10.0
libtpu: 0.0.40
codegen_flags: <defaults>
</compile_context>

<pallas_src>
import functools
import math

import jax
import jax.numpy as jnp
from jax.experimental import pallas as pl
from jax.experimental.pallas import tpu as pltpu


# ----------------------------------------------------------------------------
# Padded-flat layout helpers (plain-JAX layout glue at kernel boundaries)
# ----------------------------------------------------------------------------
def to_padded_flat(img):
    """(N, C, H, W) -> (N, C, (H+2)*(W+2)) with a one-pixel zero border."""
    n, c, h, w = img.shape
    p = jnp.pad(img, ((0, 0), (0, 0), (1, 1), (1, 1)))
    return p.reshape(n, c, (h + 2) * (w + 2))


def from_padded_flat(x, h, w):
    """(N, C, (H+2)*(W+2)) -> (N, C, H, W), stripping the zero border."""
    n, c, _ = x.shape
    return x.reshape(n, c, h + 2, w + 2)[:, :, 1:1 + h, 1:1 + w]


def pixel_shuffle_padded_flat(x, h, w, r):
    """PixelShuffle(r) (PyTorch channel order) between padded-flat tensors."""
    n, cr2, _ = x.shape
    c = cr2 // (r * r)
    img = from_padded_flat(x, h, w)                      # (N, c*r*r, H, W)
    img = img.reshape(n, c, r, r, h, w)
    img = jnp.transpose(img, (0, 1, 4, 2, 5, 3))         # N, c, H, r, W, r
    img = img.reshape(n, c, h * r, w * r)
    return to_padded_flat(img)


# ----------------------------------------------------------------------------
# In-kernel conv on a padded-flat image value: taps folded into the MXU K dim.
# ----------------------------------------------------------------------------
def _valid_mask(h, w_img):
    wp = w_img + 2
    l = (h - 1) * wp + w_img
    lane = jax.lax.broadcasted_iota(jnp.int32, (1, l), 1)
    return (lane % wp) < w_img


def _conv_on_padded_flat(xv, w, b, *, k, act, scale, h, w_img, valid,
                         leaky_slope, out_dtype):
    """One KxK 'same' conv as a single MXU matmul on a padded-flat image.

    xv : (Cin, (H+2)*(W+2)) value, zero border (bf16).
    w  : (Cout, K*K*Cin) value, row ordering [(kh*K + kw)*Cin + ci] (bf16).
    b  : (Cout, 1) f32 value.
    Returns (Cout, (H+2)*(W+2)) in out_dtype with the zero border restored.
    """
    wp = w_img + 2
    hpwp = (h + 2) * wp
    l = (h - 1) * wp + w_img
    shift = 1 - k // 2                     # layout always carries pad = 1
    taps = []
    for kh in range(k):
        for kw in range(k):
            off = (kh + shift) * wp + (kw + shift)
            taps.append(xv[:, off:off + l])
    xcol = taps[0] if len(taps) == 1 else jnp.concatenate(taps, axis=0)

    acc = jnp.dot(w, xcol, preferred_element_type=jnp.float32)   # (Cout, L)
    acc = acc + b.astype(jnp.float32)
    if act == "relu":
        acc = jnp.maximum(acc, 0.0)
    elif act == "leaky_relu":
        acc = jnp.where(acc >= 0.0, acc, acc * leaky_slope)
    if scale != 1.0:
        acc = acc * scale
    acc = jnp.where(valid, acc, 0.0).astype(out_dtype)           # zero pad cols

    cout = acc.shape[0]
    border = w_img + 3                     # == wp + 1 == hpwp - (wp + 1) - l
    zeros = jnp.zeros((cout, border), out_dtype)
    return jnp.concatenate([zeros, acc, zeros], axis=1)          # (Cout, HpWp)


# ----------------------------------------------------------------------------
# Generic single-conv Pallas kernel (used for upsampler / tail convs)
# ----------------------------------------------------------------------------
def _conv_kernel(x_ref, w_ref, b_ref, o_ref, *, k, act, scale, h, w_img,
                 leaky_slope):
    valid = _valid_mask(h, w_img)
    out = _conv_on_padded_flat(x_ref[0], w_ref[...], b_ref[...], k=k, act=act,
                               scale=scale, h=h, w_img=w_img, valid=valid,
                               leaky_slope=leaky_slope, out_dtype=o_ref.dtype)
    o_ref[0] = out


def _flatten_weight(w):
    kh, kw, cin, cout = w.shape
    return jnp.transpose(w.reshape(kh * kw * cin, cout), (1, 0)).astype(jnp.bfloat16)


def conv2d_padded_flat(x, w, b, h, w_img, *, act=None, scale=1.0,
                       leaky_slope=0.01, out_dtype=None):
    """x: (N, Cin, (H+2)*(W+2)) padded-flat -> (N, Cout, (H+2)*(W+2))."""
    n, cin, hpwp = x.shape
    kh, kw, _, cout = w.shape
    assert kh == kw and kh in (1, 3)
    w2 = _flatten_weight(w)
    b2 = b.reshape(cout, 1).astype(jnp.float32)
    xb = x.astype(jnp.bfloat16)
    out_dtype = out_dtype if out_dtype is not None else x.dtype
    l = (h - 1) * (w_img + 2) + w_img

    kern = functools.partial(_conv_kernel, k=kh, act=act, scale=float(scale),
                             h=h, w_img=w_img, leaky_slope=float(leaky_slope))
    cost = pl.CostEstimate(
        flops=2 * n * cout * kh * kw * cin * l,
        transcendentals=0,
        bytes_accessed=int(xb.size * 2 + w2.size * 2 + b2.size * 4
                           + n * cout * hpwp * jnp.dtype(out_dtype).itemsize))
    return pl.pallas_call(
        kern,
        out_shape=jax.ShapeDtypeStruct((n, cout, hpwp), out_dtype),
        grid=(n,),
        in_specs=[pl.BlockSpec((1, cin, hpwp), lambda i: (i, 0, 0)),
                  pl.BlockSpec((cout, kh * kw * cin), lambda i: (0, 0)),
                  pl.BlockSpec((cout, 1), lambda i: (0, 0))],
        out_specs=pl.BlockSpec((1, cout, hpwp), lambda i: (i, 0, 0)),
        compiler_params=pltpu.CompilerParams(
            dimension_semantics=("parallel",),
            vmem_limit_bytes=32 * 1024 * 1024),
        cost_estimate=cost,
    )(xb, w2, b2)


# ----------------------------------------------------------------------------
# Fused head + dense blocks + bottleneck: feature map stays in VMEM.
# ----------------------------------------------------------------------------
def _fused_features_kernel(*refs, h, w_img, layer_meta, net_type,
                           n_dense_blocks, n_dense_layers, leaky_slope):
    x_ref, o_ref = refs[0], refs[-1]
    wb = refs[1:-1]
    valid = _valid_mask(h, w_img)

    def conv(xv, idx):
        k, act, scale = layer_meta[idx]
        return _conv_on_padded_flat(
            xv, wb[2 * idx][...], wb[2 * idx + 1][...], k=k, act=act,
            scale=scale, h=h, w_img=w_img, valid=valid,
            leaky_slope=leaky_slope, out_dtype=jnp.bfloat16)

    idx = 0
    cur = conv(x_ref[0], idx)                      # head conv (no activation)
    idx += 1
    fmaps = []
    if net_type in ("hl", "all"):
        fmaps.append(cur)
    for _ in range(n_dense_blocks):
        for _ in range(n_dense_layers):            # conv -> act -> *dense_scale
            y = conv(cur, idx)
            idx += 1
            cur = jnp.concatenate([cur, y], axis=0)    # VMEM-local concat
        if net_type == "all":
            fmaps.append(cur)
    if net_type in ("h", "hl"):
        fmaps.append(cur)
    fm = fmaps[0] if len(fmaps) == 1 else jnp.concatenate(fmaps, axis=0)
    o_ref[0] = conv(fm, idx)                       # 1x1 bottleneck


def fused_features(params, xf, cfg, h, w_img):
    """head + dense blocks + bottleneck in one VMEM-resident pallas_call."""
    n, cin0, hpwp = xf.shape
    convs = [(params["head"]["w"], params["head"]["b"], None, 1.0)]
    for block in params["body"]:
        for layer in block:
            convs.append((layer["w"], layer["b"], cfg["act"], cfg["dense_scale"]))
    convs.append((params["bottleneck"]["w"], params["bottleneck"]["b"], None, 1.0))

    l = (h - 1) * (w_img + 2) + w_img
    args = [xf]
    in_specs = [pl.BlockSpec((1, cin0, hpwp), lambda i: (i, 0, 0))]
    layer_meta, flops, bytes_acc = [], 0, int(xf.size) * 2
    for (w, b, act, scale) in convs:
        k, _, cin, cout = w.shape
        w2 = _flatten_weight(w)
        b2 = b.reshape(cout, 1).astype(jnp.float32)
        args += [w2, b2]
        in_specs += [pl.BlockSpec(w2.shape, lambda i: (0, 0)),
                     pl.BlockSpec(b2.shape, lambda i: (0, 0))]
        layer_meta.append((k, act, float(scale)))
        flops += 2 * n * cout * k * k * cin * l
        bytes_acc += int(w2.size) * 2 + int(b2.size) * 4

    n_feats = cfg["n_feats"]
    bytes_acc += n * n_feats * hpwp * 2
    kern = functools.partial(
        _fused_features_kernel, h=h, w_img=w_img, layer_meta=tuple(layer_meta),
        net_type=cfg["type"], n_dense_blocks=cfg["n_dense_blocks"],
        n_dense_layers=cfg["n_dense_layers"],
        leaky_slope=float(cfg.get("leaky_relu_slope", 0.01)))
    return pl.pallas_call(
        kern,
        out_shape=jax.ShapeDtypeStruct((n, n_feats, hpwp), jnp.bfloat16),
        grid=(n,),
        in_specs=in_specs,
        out_specs=pl.BlockSpec((1, n_feats, hpwp), lambda i: (i, 0, 0)),
        compiler_params=pltpu.CompilerParams(
            dimension_semantics=("parallel",),
            vmem_limit_bytes=32 * 1024 * 1024),
        cost_estimate=pl.CostEstimate(flops=flops, transcendentals=0,
                                      bytes_accessed=bytes_acc),
    )(*args)


# ----------------------------------------------------------------------------
# Parameter initialization (deterministic, synthetic)
# ----------------------------------------------------------------------------
def _make_conv(key, kh, kw, cin, cout):
    wk, bk = jax.random.split(key)
    fan_in = kh * kw * cin
    w = jax.random.normal(wk, (kh, kw, cin, cout), jnp.float32) / jnp.sqrt(fan_in)
    b = jax.random.normal(bk, (cout,), jnp.float32) * 0.01
    return {"w": w, "b": b}


def init_params(key, cfg):
    keys = iter(jax.random.split(key, 128))
    gr, ic = cfg["growth_rate"], cfg["input_channel"]
    params = {"head": _make_conv(next(keys), 3, 3, ic, gr)}

    body, n_out_feats_of_blocks = [], []
    in_ch = gr
    for _ in range(cfg["n_dense_blocks"]):
        layers, c = [], in_ch
        for _ in range(cfg["n_dense_layers"]):
            layers.append(_make_conv(next(keys), 3, 3, c, gr))
            c += gr
        body.append(layers)
        in_ch = c
        n_out_feats_of_blocks.append(in_ch)
    params["body"] = body

    if cfg["type"] == "h":
        b_in = n_out_feats_of_blocks[-1]
    elif cfg["type"] == "hl":
        b_in = gr + n_out_feats_of_blocks[-1]
    else:  # 'all'
        b_in = gr + sum(n_out_feats_of_blocks)
    params["bottleneck"] = _make_conv(next(keys), 1, 1, b_in, cfg["n_feats"])

    ups = []
    if cfg["sr_scale"] > 1:
        s = cfg["sr_scale"]
        assert (s & (s - 1)) == 0, "power-of-2 sr_scale supported here"
        for _ in range(int(math.log2(s))):
            ups.append(_make_conv(next(keys), 3, 3, cfg["n_feats"], 4 * cfg["n_feats"]))
    params["upsampler"] = ups
    params["tail"] = _make_conv(next(keys), 3, 3, cfg["n_feats"], ic)

    params["mean"] = jnp.zeros((ic,), jnp.float32)    # MeanShift defaults
    params["std"] = jnp.ones((ic,), jnp.float32)
    return params


# ----------------------------------------------------------------------------
# Forward pass (mirrors SRDenseNet.forward, feature_maps_only=False)
# ----------------------------------------------------------------------------
def srdensenet_forward(params, x_nchw, cfg):
    if cfg["act"] not in ("relu", "leaky_relu"):
        # TODO(synk): prelu needs a learned slope parameter; not implemented.
        raise NotImplementedError("act=%s" % cfg["act"])
    if cfg.get("bn", False):
        # TODO(synk): BatchNorm inside DenseBlock not implemented.
        raise NotImplementedError("bn=True")

    mean = params["mean"][None, :, None, None]
    std = params["std"][None, :, None, None]
    n, _, h, w = x_nchw.shape

    x = (x_nchw.astype(jnp.float32) - mean) / std              # sub_mean
    xf = to_padded_flat(x).astype(jnp.bfloat16)                # (N, Cin, HpWp)

    x = fused_features(params, xf, cfg, h, w)                  # head+dense+bottleneck

    ch, cw = h, w
    for up in params["upsampler"]:                             # UpSampler stages
        x = conv2d_padded_flat(x, up["w"], up["b"], ch, cw)
        x = pixel_shuffle_padded_flat(x, ch, cw, 2)
        ch, cw = ch * 2, cw * 2
    x = conv2d_padded_flat(x, params["tail"]["w"], params["tail"]["b"], ch, cw,
                           out_dtype=jnp.float32)              # final 3x3 conv
    img = from_padded_flat(x, ch, cw)
    img = img * std + mean                                     # add_mean
    return img


# ----------------------------------------------------------------------------
if __name__ == "__main__":
    cfg = dict(
        sr_scale=2,
        input_channel=4,
        growth_rate=8,
        n_dense_layers=2,
        n_dense_blocks=2,
        type="all",
        dense_scale=1.0,
        n_feats=16,
        bn=False,
        act="relu",
    )
    key = jax.random.PRNGKey(0)
    pkey, xkey = jax.random.split(key)
    params = init_params(pkey, cfg)

    x = jax.random.normal(xkey, (2, cfg["input_channel"], 16, 16), jnp.float32)
    fwd = jax.jit(functools.partial(srdensenet_forward, cfg=cfg))
    y = jax.block_until_ready(fwd(params, x))

    expected = (2, cfg["input_channel"], 16 * cfg["sr_scale"], 16 * cfg["sr_scale"])
    assert y.shape == expected, (y.shape, expected)
    assert bool(jnp.all(jnp.isfinite(y)))
    print("KERNEL_OK")
</pallas_src>

<mosaic_0001>
module attributes {stable_mosaic.version = 11 : i64} {
  func.func @_conv_kernel(%arg0: i32, %arg1: memref<1x16x324xbf16, #tpu.memory_space<vmem>>, %arg2: memref<64x144xbf16, #tpu.memory_space<vmem>>, %arg3: memref<64x1xf32, #tpu.memory_space<vmem>>, %arg4: memref<1x64x324xbf16, #tpu.memory_space<vmem>>) attributes {dimension_semantics = [#tpu.dimension_semantics<parallel>], iteration_bounds = array<i64: 2>, scalar_prefetch = 0 : i64, scratch_operands = 0 : i64, tpu.core_type = #tpu.core_type<tc>, window_params = [{transform_indices = @transform_0, window_bounds = array<i64: 1, 16, 324>}, {pipeline_mode = #tpu.pipeline_mode<synchronous>, transform_indices = @transform_1, window_bounds = array<i64: 64, 144>}, {pipeline_mode = #tpu.pipeline_mode<synchronous>, transform_indices = @transform_2, window_bounds = array<i64: 64, 1>}, {transform_indices = @transform_3, window_bounds = array<i64: 1, 64, 324>}]} {
    %0 = tpu.iota {dimensions = array<i32: 1>} : vector<1x286xi32>
    %c18_i32 = arith.constant 18 : i32
    %c0_i32 = arith.constant 0 : i32
    %1 = arith.cmpi eq, %c18_i32, %c0_i32 : i32
    %c1_i32 = arith.constant 1 : i32
    %2 = arith.select %1, %c1_i32, %c18_i32 : i32
    %3 = vector.broadcast %2 : i32 to vector<1x286xi32>
    %4 = arith.remsi %0, %3 : vector<1x286xi32>
    %c0_i32_0 = arith.constant 0 : i32
    %5 = vector.broadcast %c0_i32_0 : i32 to vector<1x286xi32>
    %6 = arith.cmpi ne, %4, %5 : vector<1x286xi32>
    %c0_i32_1 = arith.constant 0 : i32
    %7 = vector.broadcast %c0_i32_1 : i32 to vector<1x286xi32>
    %8 = arith.cmpi slt, %4, %7 : vector<1x286xi32>
    %c0_i32_2 = arith.constant 0 : i32
    %9 = arith.cmpi slt, %2, %c0_i32_2 : i32
    %10 = vector.broadcast %9 : i1 to vector<1x286xi1>
    %11 = vector.broadcast %10 : vector<1x286xi1> to vector<1x286xi1>
    %12 = arith.xori %8, %11 : vector<1x286xi1>
    %13 = arith.andi %12, %6 : vector<1x286xi1>
    %14 = vector.broadcast %2 : i32 to vector<1x286xi32>
    %15 = arith.addi %4, %14 : vector<1x286xi32>
    %16 = arith.select %13, %15, %4 : vector<1x286xi1>, vector<1x286xi32>
    %c16_i32 = arith.constant 16 : i32
    %17 = vector.broadcast %c16_i32 : i32 to vector<1x286xi32>
    %18 = arith.cmpi slt, %16, %17 : vector<1x286xi32>
    %c0 = arith.constant 0 : index
    %c0_3 = arith.constant 0 : index
    %c0_4 = arith.constant 0 : index
    %19 = vector.load %arg1[%c0, %c0_3, %c0_4] : memref<1x16x324xbf16, #tpu.memory_space<vmem>>, vector<1x16x324xbf16>
    %20 = vector.shape_cast %19 : vector<1x16x324xbf16> to vector<16x324xbf16>
    %c0_5 = arith.constant 0 : index
    %c0_6 = arith.constant 0 : index
    %21 = vector.load %arg2[%c0_5, %c0_6] : memref<64x144xbf16, #tpu.memory_space<vmem>>, vector<64x144xbf16>
    %c0_7 = arith.constant 0 : index
    %c0_8 = arith.constant 0 : index
    %22 = vector.load %arg3[%c0_7, %c0_8] : memref<64x1xf32, #tpu.memory_space<vmem>>, vector<64x1xf32>
    %23 = vector.extract_strided_slice %20 {offsets = [0, 0], sizes = [16, 286], strides = [1, 1]} : vector<16x324xbf16> to vector<16x286xbf16>
    %24 = vector.extract_strided_slice %20 {offsets = [0, 1], sizes = [16, 286], strides = [1, 1]} : vector<16x324xbf16> to vector<16x286xbf16>
    %25 = vector.extract_strided_slice %20 {offsets = [0, 2], sizes = [16, 286], strides = [1, 1]} : vector<16x324xbf16> to vector<16x286xbf16>
    %26 = vector.extract_strided_slice %20 {offsets = [0, 18], sizes = [16, 286], strides = [1, 1]} : vector<16x324xbf16> to vector<16x286xbf16>
    %27 = vector.extract_strided_slice %20 {offsets = [0, 19], sizes = [16, 286], strides = [1, 1]} : vector<16x324xbf16> to vector<16x286xbf16>
    %28 = vector.extract_strided_slice %20 {offsets = [0, 20], sizes = [16, 286], strides = [1, 1]} : vector<16x324xbf16> to vector<16x286xbf16>
    %29 = vector.extract_strided_slice %20 {offsets = [0, 36], sizes = [16, 286], strides = [1, 1]} : vector<16x324xbf16> to vector<16x286xbf16>
    %30 = vector.extract_strided_slice %20 {offsets = [0, 37], sizes = [16, 286], strides = [1, 1]} : vector<16x324xbf16> to vector<16x286xbf16>
    %31 = vector.extract_strided_slice %20 {offsets = [0, 38], sizes = [16, 286], strides = [1, 1]} : vector<16x324xbf16> to vector<16x286xbf16>
    %32 = tpu.concatenate %23, %24, %25, %26, %27, %28, %29, %30, %31 in 0 : vector<16x286xbf16>, vector<16x286xbf16>, vector<16x286xbf16>, vector<16x286xbf16>, vector<16x286xbf16>, vector<16x286xbf16>, vector<16x286xbf16>, vector<16x286xbf16>, vector<16x286xbf16> -> vector<144x286xbf16>
    %cst = arith.constant dense<0.000000e+00> : vector<64x286xf32>
    %33 = tpu.matmul %21, %32, %cst {dimension_numbers = #tpu.dot_dimension_numbers<[1], [0], [0], [1], [0, 0, 1, 1], [], []>} : vector<64x144xbf16>, vector<144x286xbf16>, vector<64x286xf32> -> vector<64x286xf32>
    %34 = vector.broadcast %22 : vector<64x1xf32> to vector<64x286xf32>
    %35 = arith.addf %33, %34 : vector<64x286xf32>
    %cst_9 = arith.constant 0.000000e+00 : f32
    %36 = vector.shape_cast %18 : vector<1x286xi1> to vector<1x286xi1>
    %37 = vector.broadcast %36 : vector<1x286xi1> to vector<64x286xi1>
    %38 = vector.broadcast %cst_9 : f32 to vector<64x286xf32>
    %39 = arith.select %37, %35, %38 : vector<64x286xi1>, vector<64x286xf32>
    %40 = arith.truncf %39 : vector<64x286xf32> to vector<64x286xbf16>
    %cst_10 = arith.constant 0.000000e+00 : bf16
    %41 = vector.broadcast %cst_10 : bf16 to vector<64x19xbf16>
    %42 = tpu.concatenate %41, %40, %41 in 1 : vector<64x19xbf16>, vector<64x286xbf16>, vector<64x19xbf16> -> vector<64x324xbf16>
    %c0_11 = arith.constant 0 : index
    %c0_12 = arith.constant 0 : index
    %c0_13 = arith.constant 0 : index
    %43 = vector.load %arg4[%c0_11, %c0_12, %c0_13] : memref<1x64x324xbf16, #tpu.memory_space<vmem>>, vector<1x64x324xbf16>
    %44 = vector.shape_cast %43 : vector<1x64x324xbf16> to vector<64x324xbf16>
    %45 = vector.shape_cast %42 : vector<64x324xbf16> to vector<1x64x324xbf16>
    tpu.vector_store %arg4[%c0_11, %c0_12, %c0_13], %45 {strides = array<i32>} : memref<1x64x324xbf16, #tpu.memory_space<vmem>>, vector<1x64x324xbf16>,
    return
  }
  func.func @transform_0(%arg0: i32) -> (i32, i32, i32) {
    %c0_i32 = arith.constant 0 : i32
    %c0_i32_0 = arith.constant 0 : i32
    %c0_i32_1 = arith.constant 0 : i32
    return %arg0, %c0_i32, %c0_i32_0 : i32, i32, i32
  }
  func.func @transform_1(%arg0: i32) -> (i32, i32) {
    %c0_i32 = arith.constant 0 : i32
    %c0_i32_0 = arith.constant 0 : i32
    %c0_i32_1 = arith.constant 0 : i32
    return %c0_i32, %c0_i32_0 : i32, i32
  }
  func.func @transform_2(%arg0: i32) -> (i32, i32) {
    %c0_i32 = arith.constant 0 : i32
    %c0_i32_0 = arith.constant 0 : i32
    %c0_i32_1 = arith.constant 0 : i32
    return %c0_i32, %c0_i32_0 : i32, i32
  }
  func.func @transform_3(%arg0: i32) -> (i32, i32, i32) {
    %c0_i32 = arith.constant 0 : i32
    %c0_i32_0 = arith.constant 0 : i32
    %c0_i32_1 = arith.constant 0 : i32
    return %arg0, %c0_i32, %c0_i32_0 : i32, i32, i32
  }
}

module attributes {stable_mosaic.version = 11 : i64} {
  func.func @_fused_features_kernel(%arg0: i32, %arg1: memref<1x4x324xbf16, #tpu.memory_space<vmem>>, %arg2: memref<8x36xbf16, #tpu.memory_space<vmem>>, %arg3: memref<8x1xf32, #tpu.memory_space<vmem>>, %arg4: memref<8x72xbf16, #tpu.memory_space<vmem>>, %arg5: memref<8x1xf32, #tpu.memory_space<vmem>>, %arg6: memref<8x144xbf16, #tpu.memory_space<vmem>>, %arg7: memref<8x1xf32, #tpu.memory_space<vmem>>, %arg8: memref<8x216xbf16, #tpu.memory_space<vmem>>, %arg9: memref<8x1xf32, #tpu.memory_space<vmem>>, %arg10: memref<8x288xbf16, #tpu.memory_space<vmem>>, %arg11: memref<8x1xf32, #tpu.memory_space<vmem>>, %arg12: memref<16x72xbf16, #tpu.memory_space<vmem>>, %arg13: memref<16x1xf32, #tpu.memory_space<vmem>>, %arg14: memref<1x16x324xbf16, #tpu.memory_space<vmem>>) attributes {dimension_semantics = [#tpu.dimension_semantics<parallel>], iteration_bounds = array<i64: 2>, scalar_prefetch = 0 : i64, scratch_operands = 0 : i64, tpu.core_type = #tpu.core_type<tc>, window_params = [{transform_indices = @transform_0, window_bounds = array<i64: 1, 4, 324>}, {pipeline_mode = #tpu.pipeline_mode<synchronous>, transform_indices = @transform_1, window_bounds = array<i64: 8, 36>}, {pipeline_mode = #tpu.pipeline_mode<synchronous>, transform_indices = @transform_2, window_bounds = array<i64: 8, 1>}, {pipeline_mode = #tpu.pipeline_mode<synchronous>, transform_indices = @transform_3, window_bounds = array<i64: 8, 72>}, {pipeline_mode = #tpu.pipeline_mode<synchronous>, transform_indices = @transform_4, window_bounds = array<i64: 8, 1>}, {pipeline_mode = #tpu.pipeline_mode<synchronous>, transform_indices = @transform_5, window_bounds = array<i64: 8, 144>}, {pipeline_mode = #tpu.pipeline_mode<synchronous>, transform_indices = @transform_6, window_bounds = array<i64: 8, 1>}, {pipeline_mode = #tpu.pipeline_mode<synchronous>, transform_indices = @transform_7, window_bounds = array<i64: 8, 216>}, {pipeline_mode = #tpu.pipeline_mode<synchronous>, transform_indices = @transform_8, window_bounds = array<i64: 8, 1>}, {pipeline_mode = #tpu.pipeline_mode<synchronous>, transform_indices = @transform_9, window_bounds = array<i64: 8, 288>}, {pipeline_mode = #tpu.pipeline_mode<synchronous>, transform_indices = @transform_10, window_bounds = array<i64: 8, 1>}, {pipeline_mode = #tpu.pipeline_mode<synchronous>, transform_indices = @transform_11, window_bounds = array<i64: 16, 72>}, {pipeline_mode = #tpu.pipeline_mode<synchronous>, transform_indices = @transform_12, window_bounds = array<i64: 16, 1>}, {transform_indices = @transform_13, window_bounds = array<i64: 1, 16, 324>}]} {
    %0 = tpu.iota {dimensions = array<i32: 1>} : vector<1x286xi32>
    %c18_i32 = arith.constant 18 : i32
    %c0_i32 = arith.constant 0 : i32
    %1 = arith.cmpi eq, %c18_i32, %c0_i32 : i32
    %c1_i32 = arith.constant 1 : i32
    %2 = arith.select %1, %c1_i32, %c18_i32 : i32
    %3 = vector.broadcast %2 : i32 to vector<1x286xi32>
    %4 = arith.remsi %0, %3 : vector<1x286xi32>
    %c0_i32_0 = arith.constant 0 : i32
    %5 = vector.broadcast %c0_i32_0 : i32 to vector<1x286xi32>
    %6 = arith.cmpi ne, %4, %5 : vector<1x286xi32>
    %c0_i32_1 = arith.constant 0 : i32
    %7 = vector.broadcast %c0_i32_1 : i32 to vector<1x286xi32>
    %8 = arith.cmpi slt, %4, %7 : vector<1x286xi32>
    %c0_i32_2 = arith.constant 0 : i32
    %9 = arith.cmpi slt, %2, %c0_i32_2 : i32
    %10 = vector.broadcast %9 : i1 to vector<1x286xi1>
    %11 = vector.broadcast %10 : vector<1x286xi1> to vector<1x286xi1>
    %12 = arith.xori %8, %11 : vector<1x286xi1>
    %13 = arith.andi %12, %6 : vector<1x286xi1>
    %14 = vector.broadcast %2 : i32 to vector<1x286xi32>
    %15 = arith.addi %4, %14 : vector<1x286xi32>
    %16 = arith.select %13, %15, %4 : vector<1x286xi1>, vector<1x286xi32>
    %c16_i32 = arith.constant 16 : i32
    %17 = vector.broadcast %c16_i32 : i32 to vector<1x286xi32>
    %18 = arith.cmpi slt, %16, %17 : vector<1x286xi32>
    %c0 = arith.constant 0 : index
    %c0_3 = arith.constant 0 : index
    %c0_4 = arith.constant 0 : index
    %19 = vector.load %arg1[%c0, %c0_3, %c0_4] : memref<1x4x324xbf16, #tpu.memory_space<vmem>>, vector<1x4x324xbf16>
    %20 = vector.shape_cast %19 : vector<1x4x324xbf16> to vector<4x324xbf16>
    %c0_5 = arith.constant 0 : index
    %c0_6 = arith.constant 0 : index
    %21 = vector.load %arg2[%c0_5, %c0_6] : memref<8x36xbf16, #tpu.memory_space<vmem>>, vector<8x36xbf16>
    %c0_7 = arith.constant 0 : index
    %c0_8 = arith.constant 0 : index
    %22 = vector.load %arg3[%c0_7, %c0_8] : memref<8x1xf32, #tpu.memory_space<vmem>>, vector<8x1xf32>
    %23 = vector.extract_strided_slice %20 {offsets = [0, 0], sizes = [4, 286], strides = [1, 1]} : vector<4x324xbf16> to vector<4x286xbf16>
    %24 = vector.extract_strided_slice %20 {offsets = [0, 1], sizes = [4, 286], strides = [1, 1]} : vector<4x324xbf16> to vector<4x286xbf16>
    %25 = vector.extract_strided_slice %20 {offsets = [0, 2], sizes = [4, 286], strides = [1, 1]} : vector<4x324xbf16> to vector<4x286xbf16>
    %26 = vector.extract_strided_slice %20 {offsets = [0, 18], sizes = [4, 286], strides = [1, 1]} : vector<4x324xbf16> to vector<4x286xbf16>
    %27 = vector.extract_strided_slice %20 {offsets = [0, 19], sizes = [4, 286], strides = [1, 1]} : vector<4x324xbf16> to vector<4x286xbf16>
    %28 = vector.extract_strided_slice %20 {offsets = [0, 20], sizes = [4, 286], strides = [1, 1]} : vector<4x324xbf16> to vector<4x286xbf16>
    %29 = vector.extract_strided_slice %20 {offsets = [0, 36], sizes = [4, 286], strides = [1, 1]} : vector<4x324xbf16> to vector<4x286xbf16>
    %30 = vector.extract_strided_slice %20 {offsets = [0, 37], sizes = [4, 286], strides = [1, 1]} : vector<4x324xbf16> to vector<4x286xbf16>
    %31 = vector.extract_strided_slice %20 {offsets = [0, 38], sizes = [4, 286], strides = [1, 1]} : vector<4x324xbf16> to vector<4x286xbf16>
    %32 = tpu.concatenate %23, %24, %25, %26, %27, %28, %29, %30, %31 in 0 : vector<4x286xbf16>, vector<4x286xbf16>, vector<4x286xbf16>, vector<4x286xbf16>, vector<4x286xbf16>, vector<4x286xbf16>, vector<4x286xbf16>, vector<4x286xbf16>, vector<4x286xbf16> -> vector<36x286xbf16>
    %cst = arith.constant dense<0.000000e+00> : vector<8x286xf32>
    %33 = tpu.matmul %21, %32, %cst {dimension_numbers = #tpu.dot_dimension_numbers<[1], [0], [0], [1], [0, 0, 1, 1], [], []>} : vector<8x36xbf16>, vector<36x286xbf16>, vector<8x286xf32> -> vector<8x286xf32>
    %34 = vector.broadcast %22 : vector<8x1xf32> to vector<8x286xf32>
    %35 = arith.addf %33, %34 : vector<8x286xf32>
    %cst_9 = arith.constant 0.000000e+00 : f32
    %36 = vector.shape_cast %18 : vector<1x286xi1> to vector<1x286xi1>
    %37 = vector.broadcast %36 : vector<1x286xi1> to vector<8x286xi1>
    %38 = vector.broadcast %cst_9 : f32 to vector<8x286xf32>
    %39 = arith.select %37, %35, %38 : vector<8x286xi1>, vector<8x286xf32>
    %40 = arith.truncf %39 : vector<8x286xf32> to vector<8x286xbf16>
    %cst_10 = arith.constant 0.000000e+00 : bf16
    %41 = vector.broadcast %cst_10 : bf16 to vector<8x19xbf16>
    %42 = tpu.concatenate %41, %40, %41 in 1 : vector<8x19xbf16>, vector<8x286xbf16>, vector<8x19xbf16> -> vector<8x324xbf16>
    %c0_11 = arith.constant 0 : index
    %c0_12 = arith.constant 0 : index
    %43 = vector.load %arg4[%c0_11, %c0_12] : memref<8x72xbf16, #tpu.memory_space<vmem>>, vector<8x72xbf16>
    %c0_13 = arith.constant 0 : index
    %c0_14 = arith.constant 0 : index
    %44 = vector.load %arg5[%c0_13, %c0_14] : memref<8x1xf32, #tpu.memory_space<vmem>>, vector<8x1xf32>
    %45 = vector.extract_strided_slice %42 {offsets = [0, 0], sizes = [8, 286], strides = [1, 1]} : vector<8x324xbf16> to vector<8x286xbf16>
    %46 = vector.extract_strided_slice %42 {offsets = [0, 1], sizes = [8, 286], strides = [1, 1]} : vector<8x324xbf16> to vector<8x286xbf16>
    %47 = vector.extract_strided_slice %42 {offsets = [0, 2], sizes = [8, 286], strides = [1, 1]} : vector<8x324xbf16> to vector<8x286xbf16>
    %48 = vector.extract_strided_slice %42 {offsets = [0, 18], sizes = [8, 286], strides = [1, 1]} : vector<8x324xbf16> to vector<8x286xbf16>
    %49 = vector.extract_strided_slice %42 {offsets = [0, 19], sizes = [8, 286], strides = [1, 1]} : vector<8x324xbf16> to vector<8x286xbf16>
    %50 = vector.extract_strided_slice %42 {offsets = [0, 20], sizes = [8, 286], strides = [1, 1]} : vector<8x324xbf16> to vector<8x286xbf16>
    %51 = vector.extract_strided_slice %42 {offsets = [0, 36], sizes = [8, 286], strides = [1, 1]} : vector<8x324xbf16> to vector<8x286xbf16>
    %52 = vector.extract_strided_slice %42 {offsets = [0, 37], sizes = [8, 286], strides = [1, 1]} : vector<8x324xbf16> to vector<8x286xbf16>
    %53 = vector.extract_strided_slice %42 {offsets = [0, 38], sizes = [8, 286], strides = [1, 1]} : vector<8x324xbf16> to vector<8x286xbf16>
    %54 = tpu.concatenate %45, %46, %47, %48, %49, %50, %51, %52, %53 in 0 : vector<8x286xbf16>, vector<8x286xbf16>, vector<8x286xbf16>, vector<8x286xbf16>, vector<8x286xbf16>, vector<8x286xbf16>, vector<8x286xbf16>, vector<8x286xbf16>, vector<8x286xbf16> -> vector<72x286xbf16>
    %cst_15 = arith.constant dense<0.000000e+00> : vector<8x286xf32>
    %55 = tpu.matmul %43, %54, %cst_15 {dimension_numbers = #tpu.dot_dimension_numbers<[1], [0], [0], [1], [0, 0, 1, 1], [], []>} : vector<8x72xbf16>, vector<72x286xbf16>, vector<8x286xf32> -> vector<8x286xf32>
    %56 = vector.broadcast %44 : vector<8x1xf32> to vector<8x286xf32>
    %57 = arith.addf %55, %56 : vector<8x286xf32>
    %cst_16 = arith.constant 0.000000e+00 : f32
    %58 = vector.broadcast %cst_16 : f32 to vector<8x286xf32>
    %59 = arith.maximumf %57, %58 : vector<8x286xf32>
    %cst_17 = arith.constant 0.000000e+00 : f32
    %60 = vector.shape_cast %18 : vector<1x286xi1> to vector<1x286xi1>
    %61 = vector.broadcast %60 : vector<1x286xi1> to vector<8x286xi1>
    %62 = vector.broadcast %cst_17 : f32 to vector<8x286xf32>
    %63 = arith.select %61, %59, %62 : vector<8x286xi1>, vector<8x286xf32>
    %64 = arith.truncf %63 : vector<8x286xf32> to vector<8x286xbf16>
    %cst_18 = arith.constant 0.000000e+00 : bf16
    %65 = vector.broadcast %cst_18 : bf16 to vector<8x19xbf16>
    %66 = tpu.concatenate %65, %64, %65 in 1 : vector<8x19xbf16>, vector<8x286xbf16>, vector<8x19xbf16> -> vector<8x324xbf16>
    %67 = tpu.concatenate %42, %66 in 0 : vector<8x324xbf16>, vector<8x324xbf16> -> vector<16x324xbf16>
    %c0_19 = arith.constant 0 : index
    %c0_20 = arith.constant 0 : index
    %68 = vector.load %arg6[%c0_19, %c0_20] : memref<8x144xbf16, #tpu.memory_space<vmem>>, vector<8x144xbf16>
    %c0_21 = arith.constant 0 : index
    %c0_22 = arith.constant 0 : index
    %69 = vector.load %arg7[%c0_21, %c0_22] : memref<8x1xf32, #tpu.memory_space<vmem>>, vector<8x1xf32>
    %70 = vector.extract_strided_slice %67 {offsets = [0, 0], sizes = [16, 286], strides = [1, 1]} : vector<16x324xbf16> to vector<16x286xbf16>
    %71 = vector.extract_strided_slice %67 {offsets = [0, 1], sizes = [16, 286], strides = [1, 1]} : vector<16x324xbf16> to vector<16x286xbf16>
    %72 = vector.extract_strided_slice %67 {offsets = [0, 2], sizes = [16, 286], strides = [1, 1]} : vector<16x324xbf16> to vector<16x286xbf16>
    %73 = vector.extract_strided_slice %67 {offsets = [0, 18], sizes = [16, 286], strides = [1, 1]} : vector<16x324xbf16> to vector<16x286xbf16>
    %74 = vector.extract_strided_slice %67 {offsets = [0, 19], sizes = [16, 286], strides = [1, 1]} : vector<16x324xbf16> to vector<16x286xbf16>
    %75 = vector.extract_strided_slice %67 {offsets = [0, 20], sizes = [16, 286], strides = [1, 1]} : vector<16x324xbf16> to vector<16x286xbf16>
    %76 = vector.extract_strided_slice %67 {offsets = [0, 36], sizes = [16, 286], strides = [1, 1]} : vector<16x324xbf16> to vector<16x286xbf16>
    %77 = vector.extract_strided_slice %67 {offsets = [0, 37], sizes = [16, 286], strides = [1, 1]} : vector<16x324xbf16> to vector<16x286xbf16>
    %78 = vector.extract_strided_slice %67 {offsets = [0, 38], sizes = [16, 286], strides = [1, 1]} : vector<16x324xbf16> to vector<16x286xbf16>
    %79 = tpu.concatenate %70, %71, %72, %73, %74, %75, %76, %77, %78 in 0 : vector<16x286xbf16>, vector<16x286xbf16>, vector<16x286xbf16>, vector<16x286xbf16>, vector<16x286xbf16>, vector<16x286xbf16>, vector<16x286xbf16>, vector<16x286xbf16>, vector<16x286xbf16> -> vector<144x286xbf16>
    %cst_23 = arith.constant dense<0.000000e+00> : vector<8x286xf32>
    %80 = tpu.matmul %68, %79, %cst_23 {dimension_numbers = #tpu.dot_dimension_numbers<[1], [0], [0], [1], [0, 0, 1, 1], [], []>} : vector<8x144xbf16>, vector<144x286xbf16>, vector<8x286xf32> -> vector<8x286xf32>
    %81 = vector.broadcast %69 : vector<8x1xf32> to vector<8x286xf32>
    %82 = arith.addf %80, %81 : vector<8x286xf32>
    %cst_24 = arith.constant 0.000000e+00 : f32
    %83 = vector.broadcast %cst_24 : f32 to vector<8x286xf32>
    %84 = arith.maximumf %82, %83 : vector<8x286xf32>
    %cst_25 = arith.constant 0.000000e+00 : f32
    %85 = vector.shape_cast %18 : vector<1x286xi1> to vector<1x286xi1>
    %86 = vector.broadcast %85 : vector<1x286xi1> to vector<8x286xi1>
    %87 = vector.broadcast %cst_25 : f32 to vector<8x286xf32>
    %88 = arith.select %86, %84, %87 : vector<8x286xi1>, vector<8x286xf32>
    %89 = arith.truncf %88 : vector<8x286xf32> to vector<8x286xbf16>
    %cst_26 = arith.constant 0.000000e+00 : bf16
    %90 = vector.broadcast %cst_26 : bf16 to vector<8x19xbf16>
    %91 = tpu.concatenate %90, %89, %90 in 1 : vector<8x19xbf16>, vector<8x286xbf16>, vector<8x19xbf16> -> vector<8x324xbf16>
    %92 = tpu.concatenate %67, %91 in 0 : vector<16x324xbf16>, vector<8x324xbf16> -> vector<24x324xbf16>
    %c0_27 = arith.constant 0 : index
    %c0_28 = arith.constant 0 : index
    %93 = vector.load %arg8[%c0_27, %c0_28] : memref<8x216xbf16, #tpu.memory_space<vmem>>, vector<8x216xbf16>
    %c0_29 = arith.constant 0 : index
    %c0_30 = arith.constant 0 : index
    %94 = vector.load %arg9[%c0_29, %c0_30] : memref<8x1xf32, #tpu.memory_space<vmem>>, vector<8x1xf32>
    %95 = vector.extract_strided_slice %92 {offsets = [0, 0], sizes = [24, 286], strides = [1, 1]} : vector<24x324xbf16> to vector<24x286xbf16>
    %96 = vector.extract_strided_slice %92 {offsets = [0, 1], sizes = [24, 286], strides = [1, 1]} : vector<24x324xbf16> to vector<24x286xbf16>
    %97 = vector.extract_strided_slice %92 {offsets = [0, 2], sizes = [24, 286], strides = [1, 1]} : vector<24x324xbf16> to vector<24x286xbf16>
    %98 = vector.extract_strided_slice %92 {offsets = [0, 18], sizes = [24, 286], strides = [1, 1]} : vector<24x324xbf16> to vector<24x286xbf16>
    %99 = vector.extract_strided_slice %92 {offsets = [0, 19], sizes = [24, 286], strides = [1, 1]} : vector<24x324xbf16> to vector<24x286xbf16>
    %100 = vector.extract_strided_slice %92 {offsets = [0, 20], sizes = [24, 286], strides = [1, 1]} : vector<24x324xbf16> to vector<24x286xbf16>
    %101 = vector.extract_strided_slice %92 {offsets = [0, 36], sizes = [24, 286], strides = [1, 1]} : vector<24x324xbf16> to vector<24x286xbf16>
    %102 = vector.extract_strided_slice %92 {offsets = [0, 37], sizes = [24, 286], strides = [1, 1]} : vector<24x324xbf16> to vector<24x286xbf16>
    %103 = vector.extract_strided_slice %92 {offsets = [0, 38], sizes = [24, 286], strides = [1, 1]} : vector<24x324xbf16> to vector<24x286xbf16>
    %104 = tpu.concatenate %95, %96, %97, %98, %99, %100, %101, %102, %103 in 0 : vector<24x286xbf16>, vector<24x286xbf16>, vector<24x286xbf16>, vector<24x286xbf16>, vector<24x286xbf16>, vector<24x286xbf16>, vector<24x286xbf16>, vector<24x286xbf16>, vector<24x286xbf16> -> vector<216x286xbf16>
    %cst_31 = arith.constant dense<0.000000e+00> : vector<8x286xf32>
    %105 = tpu.matmul %93, %104, %cst_31 {dimension_numbers = #tpu.dot_dimension_numbers<[1], [0], [0], [1], [0, 0, 1, 1], [], []>} : vector<8x216xbf16>, vector<216x286xbf16>, vector<8x286xf32> -> vector<8x286xf32>
    %106 = vector.broadcast %94 : vector<8x1xf32> to vector<8x286xf32>
    %107 = arith.addf %105, %106 : vector<8x286xf32>
    %cst_32 = arith.constant 0.000000e+00 : f32
    %108 = vector.broadcast %cst_32 : f32 to vector<8x286xf32>
    %109 = arith.maximumf %107, %108 : vector<8x286xf32>
    %cst_33 = arith.constant 0.000000e+00 : f32
    %110 = vector.shape_cast %18 : vector<1x286xi1> to vector<1x286xi1>
    %111 = vector.broadcast %110 : vector<1x286xi1> to vector<8x286xi1>
    %112 = vector.broadcast %cst_33 : f32 to vector<8x286xf32>
    %113 = arith.select %111, %109, %112 : vector<8x286xi1>, vector<8x286xf32>
    %114 = arith.truncf %113 : vector<8x286xf32> to vector<8x286xbf16>
    %cst_34 = arith.constant 0.000000e+00 : bf16
    %115 = vector.broadcast %cst_34 : bf16 to vector<8x19xbf16>
    %116 = tpu.concatenate %115, %114, %115 in 1 : vector<8x19xbf16>, vector<8x286xbf16>, vector<8x19xbf16> -> vector<8x324xbf16>
    %117 = tpu.concatenate %92, %116 in 0 : vector<24x324xbf16>, vector<8x324xbf16> -> vector<32x324xbf16>
    %c0_35 = arith.constant 0 : index
    %c0_36 = arith.constant 0 : index
    %118 = vector.load %arg10[%c0_35, %c0_36] : memref<8x288xbf16, #tpu.memory_space<vmem>>, vector<8x288xbf16>
    %c0_37 = arith.constant 0 : index
    %c0_38 = arith.constant 0 : index
    %119 = vector.load %arg11[%c0_37, %c0_38] : memref<8x1xf32, #tpu.memory_space<vmem>>, vector<8x1xf32>
    %120 = vector.extract_strided_slice %117 {offsets = [0, 0], sizes = [32, 286], strides = [1, 1]} : vector<32x324xbf16> to vector<32x286xbf16>
    %121 = vector.extract_strided_slice %117 {offsets = [0, 1], sizes = [32, 286], strides = [1, 1]} : vector<32x324xbf16> to vector<32x286xbf16>
    %122 = vector.extract_strided_slice %117 {offsets = [0, 2], sizes = [32, 286], strides = [1, 1]} : vector<32x324xbf16> to vector<32x286xbf16>
    %123 = vector.extract_strided_slice %117 {offsets = [0, 18], sizes = [32, 286], strides = [1, 1]} : vector<32x324xbf16> to vector<32x286xbf16>
    %124 = vector.extract_strided_slice %117 {offsets = [0, 19], sizes = [32, 286], strides = [1, 1]} : vector<32x324xbf16> to vector<32x286xbf16>
    %125 = vector.extract_strided_slice %117 {offsets = [0, 20], sizes = [32, 286], strides = [1, 1]} : vector<32x324xbf16> to vector<32x286xbf16>
    %126 = vector.extract_strided_slice %117 {offsets = [0, 36], sizes = [32, 286], strides = [1, 1]} : vector<32x324xbf16> to vector<32x286xbf16>
    %127 = vector.extract_strided_slice %117 {offsets = [0, 37], sizes = [32, 286], strides = [1, 1]} : vector<32x324xbf16> to vector<32x286xbf16>
    %128 = vector.extract_strided_slice %117 {offsets = [0, 38], sizes = [32, 286], strides = [1, 1]} : vector<32x324xbf16> to vector<32x286xbf16>
    %129 = tpu.concatenate %120, %121, %122, %123, %124, %125, %126, %127, %128 in 0 : vector<32x286xbf16>, vector<32x286xbf16>, vector<32x286xbf16>, vector<32x286xbf16>, vector<32x286xbf16>, vector<32x286xbf16>, vector<32x286xbf16>, vector<32x286xbf16>, vector<32x286xbf16> -> vector<288x286xbf16>
    %cst_39 = arith.constant dense<0.000000e+00> : vector<8x286xf32>
    %130 = tpu.matmul %118, %129, %cst_39 {dimension_numbers = #tpu.dot_dimension_numbers<[1], [0], [0], [1], [0, 0, 1, 1], [], []>} : vector<8x288xbf16>, vector<288x286xbf16>, vector<8x286xf32> -> vector<8x286xf32>
    %131 = vector.broadcast %119 : vector<8x1xf32> to vector<8x286xf32>
    %132 = arith.addf %130, %131 : vector<8x286xf32>
    %cst_40 = arith.constant 0.000000e+00 : f32
    %133 = vector.broadcast %cst_40 : f32 to vector<8x286xf32>
    %134 = arith.maximumf %132, %133 : vector<8x286xf32>
    %cst_41 = arith.constant 0.000000e+00 : f32
    %135 = vector.shape_cast %18 : vector<1x286xi1> to vector<1x286xi1>
    %136 = vector.broadcast %135 : vector<1x286xi1> to vector<8x286xi1>
    %137 = vector.broadcast %cst_41 : f32 to vector<8x286xf32>
    %138 = arith.select %136, %134, %137 : vector<8x286xi1>, vector<8x286xf32>
    %139 = arith.truncf %138 : vector<8x286xf32> to vector<8x286xbf16>
    %cst_42 = arith.constant 0.000000e+00 : bf16
    %140 = vector.broadcast %cst_42 : bf16 to vector<8x19xbf16>
    %141 = tpu.concatenate %140, %139, %140 in 1 : vector<8x19xbf16>, vector<8x286xbf16>, vector<8x19xbf16> -> vector<8x324xbf16>
    %142 = tpu.concatenate %117, %141 in 0 : vector<32x324xbf16>, vector<8x324xbf16> -> vector<40x324xbf16>
    %143 = tpu.concatenate %42, %92, %142 in 0 : vector<8x324xbf16>, vector<24x324xbf16>, vector<40x324xbf16> -> vector<72x324xbf16>
    %c0_43 = arith.constant 0 : index
    %c0_44 = arith.constant 0 : index
    %144 = vector.load %arg12[%c0_43, %c0_44] : memref<16x72xbf16, #tpu.memory_space<vmem>>, vector<16x72xbf16>
    %c0_45 = arith.constant 0 : index
    %c0_46 = arith.constant 0 : index
    %145 = vector.load %arg13[%c0_45, %c0_46] : memref<16x1xf32, #tpu.memory_space<vmem>>, vector<16x1xf32>
    %146 = vector.extract_strided_slice %143 {offsets = [0, 19], sizes = [72, 286], strides = [1, 1]} : vector<72x324xbf16> to vector<72x286xbf16>
    %cst_47 = arith.constant dense<0.000000e+00> : vector<16x286xf32>
    %147 = tpu.matmul %144, %146, %cst_47 {dimension_numbers = #tpu.dot_dimension_numbers<[1], [0], [0], [1], [0, 0, 1, 1], [], []>} : vector<16x72xbf16>, vector<72x286xbf16>, vector<16x286xf32> -> vector<16x286xf32>
    %148 = vector.broadcast %145 : vector<16x1xf32> to vector<16x286xf32>
    %149 = arith.addf %147, %148 : vector<16x286xf32>
    %cst_48 = arith.constant 0.000000e+00 : f32
    %150 = vector.shape_cast %18 : vector<1x286xi1> to vector<1x286xi1>
    %151 = vector.broadcast %150 : vector<1x286xi1> to vector<16x286xi1>
    %152 = vector.broadcast %cst_48 : f32 to vector<16x286xf32>
    %153 = arith.select %151, %149, %152 : vector<16x286xi1>, vector<16x286xf32>
    %154 = arith.truncf %153 : vector<16x286xf32> to vector<16x286xbf16>
    %cst_49 = arith.constant 0.000000e+00 : bf16
    %155 = vector.broadcast %cst_49 : bf16 to vector<16x19xbf16>
    %156 = tpu.concatenate %155, %154, %155 in 1 : vector<16x19xbf16>, vector<16x286xbf16>, vector<16x19xbf16> -> vector<16x324xbf16>
    %c0_50 = arith.constant 0 : index
    %c0_51 = arith.constant 0 : index
    %c0_52 = arith.constant 0 : index
    %157 = vector.load %arg14[%c0_50, %c0_51, %c0_52] : memref<1x16x324xbf16, #tpu.memory_space<vmem>>, vector<1x16x324xbf16>
    %158 = vector.shape_cast %157 : vector<1x16x324xbf16> to vector<16x324xbf16>
    %159 = vector.shape_cast %156 : vector<16x324xbf16> to vector<1x16x324xbf16>
    tpu.vector_store %arg14[%c0_50, %c0_51, %c0_52], %159 {strides = array<i32>} : memref<1x16x324xbf16, #tpu.memory_space<vmem>>, vector<1x16x324xbf16>,
    return
  }
  func.func @transform_0(%arg0: i32) -> (i32, i32, i32) {
    %c0_i32 = arith.constant 0 : i32
    %c0_i32_0 = arith.constant 0 : i32
    %c0_i32_1 = arith.constant 0 : i32
    return %arg0, %c0_i32, %c0_i32_0 : i32, i32, i32
  }
  func.func @transform_1(%arg0: i32) -> (i32, i32) {
    %c0_i32 = arith.constant 0 : i32
    %c0_i32_0 = arith.constant 0 : i32
    %c0_i32_1 = arith.constant 0 : i32
    return %c0_i32, %c0_i32_0 : i32, i32
  }
  func.func @transform_2(%arg0: i32) -> (i32, i32) {
    %c0_i32 = arith.constant 0 : i32
    %c0_i32_0 = arith.constant 0 : i32
    %c0_i32_1 = arith.constant 0 : i32
    return %c0_i32, %c0_i32_0 : i32, i32
  }
  func.func @transform_3(%arg0: i32) -> (i32, i32) {
    %c0_i32 = arith.constant 0 : i32
    %c0_i32_0 = arith.constant 0 : i32
    %c0_i32_1 = arith.constant 0 : i32
    return %c0_i32, %c0_i32_0 : i32, i32
  }
  func.func @transform_4(%arg0: i32) -> (i32, i32) {
    %c0_i32 = arith.constant 0 : i32
    %c0_i32_0 = arith.constant 0 : i32
    %c0_i32_1 = arith.constant 0 : i32
    return %c0_i32, %c0_i32_0 : i32, i32
  }
  func.func @transform_5(%arg0: i32) -> (i32, i32) {
    %c0_i32 = arith.constant 0 : i32
    %c0_i32_0 = arith.constant 0 : i32
    %c0_i32_1 = arith.constant 0 : i32
    return %c0_i32, %c0_i32_0 : i32, i32
  }
  func.func @transform_6(%arg0: i32) -> (i32, i32) {
    %c0_i32 = arith.constant 0 : i32
    %c0_i32_0 = arith.constant 0 : i32
    %c0_i32_1 = arith.constant 0 : i32
    return %c0_i32, %c0_i32_0 : i32, i32
  }
  func.func @transform_7(%arg0: i32) -> (i32, i32) {
    %c0_i32 = arith.constant 0 : i32
    %c0_i32_0 = arith.constant 0 : i32
    %c0_i32_1 = arith.constant 0 : i32
    return %c0_i32, %c0_i32_0 : i32, i32
  }
  func.func @transform_8(%arg0: i32) -> (i32, i32) {
    %c0_i32 = arith.constant 0 : i32
    %c0_i32_0 = arith.constant 0 : i32
    %c0_i32_1 = arith.constant 0 : i32
    return %c0_i32, %c0_i32_0 : i32, i32
  }
  func.func @transform_9(%arg0: i32) -> (i32, i32) {
    %c0_i32 = arith.constant 0 : i32
    %c0_i32_0 = arith.constant 0 : i32
    %c0_i32_1 = arith.constant 0 : i32
    return %c0_i32, %c0_i32_0 : i32, i32
  }
  func.func @transform_10(%arg0: i32) -> (i32, i32) {
    %c0_i32 = arith.constant 0 : i32
    %c0_i32_0 = arith.constant 0 : i32
    %c0_i32_1 = arith.constant 0 : i32
    return %c0_i32, %c0_i32_0 : i32, i32
  }
  func.func @transform_11(%arg0: i32) -> (i32, i32) {
    %c0_i32 = arith.constant 0 : i32
    %c0_i32_0 = arith.constant 0 : i32
    %c0_i32_1 = arith.constant 0 : i32
    return %c0_i32, %c0_i32_0 : i32, i32
  }
  func.func @transform_12(%arg0: i32) -> (i32, i32) {
    %c0_i32 = arith.constant 0 : i32
    %c0_i32_0 = arith.constant 0 : i32
    %c0_i32_1 = arith.constant 0 : i32
    return %c0_i32, %c0_i32_0 : i32, i32
  }
  func.func @transform_13(%arg0: i32) -> (i32, i32, i32) {
    %c0_i32 = arith.constant 0 : i32
    %c0_i32_0 = arith.constant 0 : i32
    %c0_i32_1 = arith.constant 0 : i32
    return %arg0, %c0_i32, %c0_i32_0 : i32, i32, i32
  }
}

module attributes {stable_mosaic.version = 11 : i64} {
  func.func @_conv_kernel(%arg0: i32, %arg1: memref<1x16x1156xbf16, #tpu.memory_space<vmem>>, %arg2: memref<4x144xbf16, #tpu.memory_space<vmem>>, %arg3: memref<4x1xf32, #tpu.memory_space<vmem>>, %arg4: memref<1x4x1156xf32, #tpu.memory_space<vmem>>) attributes {dimension_semantics = [#tpu.dimension_semantics<parallel>], iteration_bounds = array<i64: 2>, scalar_prefetch = 0 : i64, scratch_operands = 0 : i64, tpu.core_type = #tpu.core_type<tc>, window_params = [{transform_indices = @transform_0, window_bounds = array<i64: 1, 16, 1156>}, {pipeline_mode = #tpu.pipeline_mode<synchronous>, transform_indices = @transform_1, window_bounds = array<i64: 4, 144>}, {pipeline_mode = #tpu.pipeline_mode<synchronous>, transform_indices = @transform_2, window_bounds = array<i64: 4, 1>}, {transform_indices = @transform_3, window_bounds = array<i64: 1, 4, 1156>}]} {
    %0 = tpu.iota {dimensions = array<i32: 1>} : vector<1x1086xi32>
    %c34_i32 = arith.constant 34 : i32
    %c0_i32 = arith.constant 0 : i32
    %1 = arith.cmpi eq, %c34_i32, %c0_i32 : i32
    %c1_i32 = arith.constant 1 : i32
    %2 = arith.select %1, %c1_i32, %c34_i32 : i32
    %3 = vector.broadcast %2 : i32 to vector<1x1086xi32>
    %4 = arith.remsi %0, %3 : vector<1x1086xi32>
    %c0_i32_0 = arith.constant 0 : i32
    %5 = vector.broadcast %c0_i32_0 : i32 to vector<1x1086xi32>
    %6 = arith.cmpi ne, %4, %5 : vector<1x1086xi32>
    %c0_i32_1 = arith.constant 0 : i32
    %7 = vector.broadcast %c0_i32_1 : i32 to vector<1x1086xi32>
    %8 = arith.cmpi slt, %4, %7 : vector<1x1086xi32>
    %c0_i32_2 = arith.constant 0 : i32
    %9 = arith.cmpi slt, %2, %c0_i32_2 : i32
    %10 = vector.broadcast %9 : i1 to vector<1x1086xi1>
    %11 = vector.broadcast %10 : vector<1x1086xi1> to vector<1x1086xi1>
    %12 = arith.xori %8, %11 : vector<1x1086xi1>
    %13 = arith.andi %12, %6 : vector<1x1086xi1>
    %14 = vector.broadcast %2 : i32 to vector<1x1086xi32>
    %15 = arith.addi %4, %14 : vector<1x1086xi32>
    %16 = arith.select %13, %15, %4 : vector<1x1086xi1>, vector<1x1086xi32>
    %c32_i32 = arith.constant 32 : i32
    %17 = vector.broadcast %c32_i32 : i32 to vector<1x1086xi32>
    %18 = arith.cmpi slt, %16, %17 : vector<1x1086xi32>
    %c0 = arith.constant 0 : index
    %c0_3 = arith.constant 0 : index
    %c0_4 = arith.constant 0 : index
    %19 = vector.load %arg1[%c0, %c0_3, %c0_4] : memref<1x16x1156xbf16, #tpu.memory_space<vmem>>, vector<1x16x1156xbf16>
    %20 = vector.shape_cast %19 : vector<1x16x1156xbf16> to vector<16x1156xbf16>
    %c0_5 = arith.constant 0 : index
    %c0_6 = arith.constant 0 : index
    %21 = vector.load %arg2[%c0_5, %c0_6] : memref<4x144xbf16, #tpu.memory_space<vmem>>, vector<4x144xbf16>
    %c0_7 = arith.constant 0 : index
    %c0_8 = arith.constant 0 : index
    %22 = vector.load %arg3[%c0_7, %c0_8] : memref<4x1xf32, #tpu.memory_space<vmem>>, vector<4x1xf32>
    %23 = vector.extract_strided_slice %20 {offsets = [0, 0], sizes = [16, 1086], strides = [1, 1]} : vector<16x1156xbf16> to vector<16x1086xbf16>
    %24 = vector.extract_strided_slice %20 {offsets = [0, 1], sizes = [16, 1086], strides = [1, 1]} : vector<16x1156xbf16> to vector<16x1086xbf16>
    %25 = vector.extract_strided_slice %20 {offsets = [0, 2], sizes = [16, 1086], strides = [1, 1]} : vector<16x1156xbf16> to vector<16x1086xbf16>
    %26 = vector.extract_strided_slice %20 {offsets = [0, 34], sizes = [16, 1086], strides = [1, 1]} : vector<16x1156xbf16> to vector<16x1086xbf16>
    %27 = vector.extract_strided_slice %20 {offsets = [0, 35], sizes = [16, 1086], strides = [1, 1]} : vector<16x1156xbf16> to vector<16x1086xbf16>
    %28 = vector.extract_strided_slice %20 {offsets = [0, 36], sizes = [16, 1086], strides = [1, 1]} : vector<16x1156xbf16> to vector<16x1086xbf16>
    %29 = vector.extract_strided_slice %20 {offsets = [0, 68], sizes = [16, 1086], strides = [1, 1]} : vector<16x1156xbf16> to vector<16x1086xbf16>
    %30 = vector.extract_strided_slice %20 {offsets = [0, 69], sizes = [16, 1086], strides = [1, 1]} : vector<16x1156xbf16> to vector<16x1086xbf16>
    %31 = vector.extract_strided_slice %20 {offsets = [0, 70], sizes = [16, 1086], strides = [1, 1]} : vector<16x1156xbf16> to vector<16x1086xbf16>
    %32 = tpu.concatenate %23, %24, %25, %26, %27, %28, %29, %30, %31 in 0 : vector<16x1086xbf16>, vector<16x1086xbf16>, vector<16x1086xbf16>, vector<16x1086xbf16>, vector<16x1086xbf16>, vector<16x1086xbf16>, vector<16x1086xbf16>, vector<16x1086xbf16>, vector<16x1086xbf16> -> vector<144x1086xbf16>
    %cst = arith.constant dense<0.000000e+00> : vector<4x1086xf32>
    %33 = tpu.matmul %21, %32, %cst {dimension_numbers = #tpu.dot_dimension_numbers<[1], [0], [0], [1], [0, 0, 1, 1], [], []>} : vector<4x144xbf16>, vector<144x1086xbf16>, vector<4x1086xf32> -> vector<4x1086xf32>
    %34 = vector.broadcast %22 : vector<4x1xf32> to vector<4x1086xf32>
    %35 = arith.addf %33, %34 : vector<4x1086xf32>
    %cst_9 = arith.constant 0.000000e+00 : f32
    %36 = vector.shape_cast %18 : vector<1x1086xi1> to vector<1x1086xi1>
    %37 = vector.broadcast %36 : vector<1x1086xi1> to vector<4x1086xi1>
    %38 = vector.broadcast %cst_9 : f32 to vector<4x1086xf32>
    %39 = arith.select %37, %35, %38 : vector<4x1086xi1>, vector<4x1086xf32>
    %cst_10 = arith.constant 0.000000e+00 : f32
    %40 = vector.broadcast %cst_10 : f32 to vector<4x35xf32>
    %41 = tpu.concatenate %40, %39, %40 in 1 : vector<4x35xf32>, vector<4x1086xf32>, vector<4x35xf32> -> vector<4x1156xf32>
    %c0_11 = arith.constant 0 : index
    %c0_12 = arith.constant 0 : index
    %c0_13 = arith.constant 0 : index
    %42 = vector.load %arg4[%c0_11, %c0_12, %c0_13] : memref<1x4x1156xf32, #tpu.memory_space<vmem>>, vector<1x4x1156xf32>
    %43 = vector.shape_cast %42 : vector<1x4x1156xf32> to vector<4x1156xf32>
    %44 = vector.shape_cast %41 : vector<4x1156xf32> to vector<1x4x1156xf32>
    tpu.vector_store %arg4[%c0_11, %c0_12, %c0_13], %44 {strides = array<i32>} : memref<1x4x1156xf32, #tpu.memory_space<vmem>>, vector<1x4x1156xf32>,
    return
  }
  func.func @transform_0(%arg0: i32) -> (i32, i32, i32) {
    %c0_i32 = arith.constant 0 : i32
    %c0_i32_0 = arith.constant 0 : i32
    %c0_i32_1 = arith.constant 0 : i32
    return %arg0, %c0_i32, %c0_i32_0 : i32, i32, i32
  }
  func.func @transform_1(%arg0: i32) -> (i32, i32) {
    %c0_i32 = arith.constant 0 : i32
    %c0_i32_0 = arith.constant 0 : i32
    %c0_i32_1 = arith.constant 0 : i32
    return %c0_i32, %c0_i32_0 : i32, i32
  }
  func.func @transform_2(%arg0: i32) -> (i32, i32) {
    %c0_i32 = arith.constant 0 : i32
    %c0_i32_0 = arith.constant 0 : i32
    %c0_i32_1 = arith.constant 0 : i32
    return %c0_i32, %c0_i32_0 : i32, i32
  }
  func.func @transform_3(%arg0: i32) -> (i32, i32, i32) {
    %c0_i32 = arith.constant 0 : i32
    %c0_i32_0 = arith.constant 0 : i32
    %c0_i32_1 = arith.constant 0 : i32
    return %arg0, %c0_i32, %c0_i32_0 : i32, i32, i32
  }
}

</mosaic_0001>

<bundles_post_ra>
// kernel: srdensenet_forward.4
= control target key start
LH: loop header
LB: loop body
LE: loop exit
PB: predicated region body
PF: predicated region fallthrough
CT: control target
= control target key end

     0   :  { %s954_s12 = smov 0   ;;  %s1218_s0 = inlined_call_operand.vmem [shape: bf16[2,16,324], index: 0, kind: input, shape index: {}]   ;;  %s1219_s1 = inlined_call_operand.vmem [shape: bf16[64,144], index: 1, kind: input, shape index: {}]   ;;  %s1220_s2 = inlined_call_operand.vmem [shape: f32[64,1], index: 2, kind: input, shape index: {}]   ;;  %s1221_s3 = inlined_call_operand.vmem [shape: bf16[2,64,324], index: 3, kind: output, shape index: {}]  }
   0x1 LB: > { %s828_s13 = sadd.s32 4294967295, %s922_s12   ;;  %p832_p0 = scmp.ge.s32.totalorder %s922_s12, 1  ;;  %s922_s12 = sphi %s954_s12, %s13_s12  }
   0x2   : > { %p137_p1 = scmp.lt.s32.totalorder %s922_s12, 3 }
   0x4   : > { %p138_p2 = pnand %p832_p0, %p137_p1 }
   0x5   : > { %p161_p3 = scmp.lt.s32.totalorder (!%p138_p2), %s828_s13, 1  ;;  %s925_s18 = smov (!%p138_p2), 91  }
   0x6   : > { %141 = sbr.rel (%p138_p2) target bundleno = 534 (0x216), region = 32  ;;  %s926_s19 = smov (!%p138_p2), 92  }
   0x7   : > { %s927_s20 = smov (!%p138_p2), 108   ;;  %s928_s21 = smov (!%p138_p2), 109  }
   0x8   : > { %s929_s22 = smov (!%p138_p2), 110   ;;  %s930_s23 = smov (!%p138_p2), 126  }
   0x9   : > { %s931_s26 = smov (!%p138_p2), 127   ;;  %s932_s27 = smov (!%p138_p2), 90  }
   0xa   : > { %s933_s6 = smov (!%p138_p2), 19  }
   0xb   : > { %v924_v0 = vmov 0   ;;  %s1233_s13 = smov (!%p161_p3, %s828_s13), 1  ;;  %v906_v4 = vld [vmem:[%s1219_s1 + $0x4] ss:$8 sps:$4 sm:$0xff]   ;;  %vm435_vm0 = vcmask 130048   ;;  %v242_v7 = vld [vmem:[%s1220_s2 + $0x18] sm:$0xff]  ;;  %v172_v60 = vlaneseq }
   0xc   : > { %521 = vmatprep.subr.bf16.mxu1 %v924_v0  ;;  %898 = vset.pattern.permute.xlu0 %v924_v0  ;;  %s872_s14 = smul.u32 24, %s1233_s13  ;;  %v239_v5 = vld [vmem:[%s1220_s2] sm:$0xff]  ;;  %v240_v6 = vld [vmem:[%s1220_s2 + $0x8] sm:$0xff]  ;;  %v241_v8 = vld [vmem:[%s1220_s2 + $0x10] sm:$0xff]  ;;  %vm341_vm1 = vcmask 744448   ;;  %vm329_vm2 = vcmask 752640  }
   0xd   : > { %899 = vset.pattern.permute.xlu1 %v924_v0  ;;  %850 = vmatprep.mubr.msk.bf16.mxu1 %vm435_vm0, %v906_v4  ;;  %v244_v9 = vld [vmem:[%s1220_s2 + $0x28] sm:$0xff]  ;;  %v243_v10 = vld [vmem:[%s1220_s2 + $0x20] sm:$0xff]  ;;  %v246_v11 = vld [vmem:[%s1220_s2 + $0x38] sm:$0xff]  ;;  %vm317_vm3 = vcmask 883712   ;;  %vm305_vm4 = vcmask 891904   ;;  %vm293_vm5 = vcmask 900096  }
   0xe   : > { %s165_s17 = scalar_lea.vmem %s1218_s0, %s872_s14  ;;  %846 = vmatprep.mubr.msk.bf16.mxu0 %vm435_vm0, %v906_v4  ;;  %v245_v12 = vld [vmem:[%s1220_s2 + $0x30] sm:$0xff]  ;;  %vm281_vm6 = vcmask 1031168   ;;  %vm269_vm7 = vcmask 1039360   ;;  %vm353_vm8 = vcmask 736256   ;;  %v904_v51 = vld [vmem:[%s1219_s1] ss:$8 sps:$4 sm:$0xff]  }
   0xf   : > { %v971_v1 = vld [vmem:[%s165_s17 + $0x4] ss:$12 sps:$4 sm:$0xff]   ;;  %v973_v2 = vld [vmem:[%s165_s17] ss:$12 sps:$4 sm:$0xff]   ;;  %v976_v3 = vld [vmem:[%s165_s17 + $0x8] ss:$12 sps:$4 sm:$0xff]  }
  0x10   : > { %337 = vrot.lane.b32.xlu0 %v971_v1, %s925_s18  ;;  %335 = vrot.lane.b32.xlu1 %v973_v2, %s925_s18  ;;  %v907_v53 = vld [vmem:[%s1219_s1 + $0x14] ss:$8 sps:$4 sm:$0xff]   ;;  %v909_v55 = vld [vmem:[%s1219_s1 + $0x10] ss:$8 sps:$4 sm:$0xff]   ;;  %v173_v61 = vand.u32 127, %v172_v60  ;;  %s873_s7 = smul.u32 96, %s1233_s13 }
  0x11   : > { %v910_v56 = vld [vmem:[%s1219_s1 + $0x24] ss:$8 sps:$4 sm:$0xff]   ;;  %v912_v57 = vld [vmem:[%s1219_s1 + $0x20] ss:$8 sps:$4 sm:$0xff]   ;;  %v913_v58 = vld [vmem:[%s1219_s1 + $0x34] ss:$8 sps:$4 sm:$0xff]  }
  0x12   : > { %v915_v59 = vld [vmem:[%s1219_s1 + $0x30] ss:$8 sps:$4 sm:$0xff]   ;;  %v175_v62 = vadd.s32 256, %v173_v61  ;;  %s1173_s10 = scalar_lea.vmem %s1221_s3, %s873_s7 }
  0x14   : > { %339 = vrot.lane.b32.xlu0 %v976_v3, %s925_s18  ;;  %325 = vrot.lane.b32.xlu1 %v971_v1, %s926_s19 }
  0x18   : > { %327 = vrot.lane.b32.xlu0 %v976_v3, %s926_s19  ;;  %323 = vrot.lane.b32.xlu1 %v973_v2, %s926_s19 }
  0x1c   : > { %313 = vrot.lane.b32.xlu0 %v971_v1, %s927_s20  ;;  %315 = vrot.lane.b32.xlu1 %v976_v3, %s927_s20 }
  0x20   : > { %311 = vrot.lane.b32.xlu0 %v973_v2, %s927_s20  ;;  %301 = vrot.lane.b32.xlu1 %v971_v1, %s928_s21 }
  0x24   : > { %303 = vrot.lane.b32.xlu0 %v976_v3, %s928_s21  ;;  %299 = vrot.lane.b32.xlu1 %v973_v2, %s928_s21 }
  0x28   : > { %289 = vrot.lane.b32.xlu0 %v971_v1, %s929_s22  ;;  %291 = vrot.lane.b32.xlu1 %v976_v3, %s929_s22 }
  0x2c   : > { %287 = vrot.lane.b32.xlu0 %v973_v2, %s929_s22  ;;  %277 = vrot.lane.b32.xlu1 %v971_v1, %s930_s23 }
  0x30   : > { %279 = vrot.lane.b32.xlu0 %v976_v3, %s930_s23  ;;  %275 = vrot.lane.b32.xlu1 %v973_v2, %s930_s23 }
  0x34   : > { %265 = vrot.lane.b32.xlu0 %v971_v1, %s931_s26  ;;  %267 = vrot.lane.b32.xlu1 %v976_v3, %s931_s26 }
  0x38   : > { %263 = vrot.lane.b32.xlu0 %v973_v2, %s931_s26  ;;  %349 = vrot.lane.b32.xlu1 %v971_v1, %s932_s27 }
  0x3c   : > { %351 = vrot.lane.b32.xlu0 %v976_v3, %s932_s27  ;;  %347 = vrot.lane.b32.xlu1 %v973_v2, %s932_s27 }
  0x40   : > { %361 = vperm.xlu0 %898, %v239_v5   ;;  %366 = vperm.xlu1 %899, %v240_v6  }
  0x44   : > { %376 = vperm.xlu0 %898, %v242_v7   ;;  %371 = vperm.xlu1 %899, %v241_v8  }
  0x48   : > { %386 = vperm.xlu0 %898, %v244_v9   ;;  %381 = vperm.xlu1 %899, %v243_v10  }
  0x4c   : > { %396 = vperm.xlu0 %898, %v246_v11   ;;  %391 = vperm.xlu1 %899, %v245_v12  }
  0x82   : > { %v338_v13 = vpop.permute.xlu0 %337  ;;  %v336_v14 = vpop.permute.xlu1 %335 }
  0x83   : > { %v342_v18 = vsel %vm341_vm1, %v336_v14, %v338_v13 }
  0x86   : > { %v340_v15 = vpop.permute.xlu0 %339  ;;  %v326_v16 = vpop.permute.xlu1 %325 }
  0x87   : > { %522 = vmatpush1.bf16.msra.mxu1 %v340_v15  ;;  %v343_v17 = vsel %vm341_vm1, %v338_v13, %v340_v15 }
  0x88   : > { %448 = vmatprep.subr.bf16.mxu0 %v343_v17  ;;  %523 = vmatprep.subr.bf16.mxu1 %v924_v0 }
  0x89   : > { %449 = vmatpush1.bf16.msra.mxu0 %v342_v18 }
  0x8a   : > { %v328_v19 = vpop.permute.xlu0 %327  ;;  %v324_v20 = vpop.permute.xlu1 %323 }
  0x8b   : > { %524 = vmatpush1.bf16.msra.mxu1 %v328_v19  ;;  %v331_v21 = vsel %vm329_vm2, %v326_v16, %v328_v19  ;;  %v330_v22 = vsel %vm329_vm2, %v324_v20, %v326_v16 }
  0x8c   : > { %450 = vmatprep.subr.bf16.mxu0 %v331_v21  ;;  %525 = vmatprep.subr.bf16.mxu1 %v924_v0 }
  0x8d   : > { %451 = vmatpush1.bf16.msra.mxu0 %v330_v22 }
  0x8e   : > { %v314_v23 = vpop.permute.xlu0 %313  ;;  %v316_v24 = vpop.permute.xlu1 %315 }
  0x8f   : > { %v319_v25 = vsel %vm317_vm3, %v314_v23, %v316_v24  ;;  %526 = vmatpush1.bf16.msra.mxu1 %v316_v24 }
  0x90   : > { %452 = vmatprep.subr.bf16.mxu0 %v319_v25  ;;  %527 = vmatprep.subr.bf16.mxu1 %v924_v0 }
  0x92   : > { %v312_v26 = vpop.permute.xlu0 %311  ;;  %v302_v27 = vpop.permute.xlu1 %301 }
  0x93   : > { %v318_v28 = vsel %vm317_vm3, %v312_v26, %v314_v23 }
  0x94   : > { %453 = vmatpush1.bf16.msra.mxu0 %v318_v28 }
  0x96   : > { %v304_v29 = vpop.permute.xlu0 %303  ;;  %v300_v30 = vpop.permute.xlu1 %299 }
  0x97   : > { %528 = vmatpush1.bf16.msra.mxu1 %v304_v29  ;;  %v307_v31 = vsel %vm305_vm4, %v302_v27, %v304_v29  ;;  %v306_v32 = vsel %vm305_vm4, %v300_v30, %v302_v27 }
  0x98   : > { %454 = vmatprep.subr.bf16.mxu0 %v307_v31  ;;  %529 = vmatprep.subr.bf16.mxu1 %v924_v0 }
  0x99   : > { %455 = vmatpush1.bf16.msra.mxu0 %v306_v32 }
  0x9a   : > { %v290_v33 = vpop.permute.xlu0 %289  ;;  %v292_v34 = vpop.permute.xlu1 %291 }
  0x9b   : > { %v295_v35 = vsel %vm293_vm5, %v290_v33, %v292_v34  ;;  %530 = vmatpush1.bf16.msra.mxu1 %v292_v34 }
  0x9c   : > { %456 = vmatprep.subr.bf16.mxu0 %v295_v35  ;;  %531 = vmatprep.subr.bf16.mxu1 %v924_v0 }
  0x9e   : > { %v288_v36 = vpop.permute.xlu0 %287  ;;  %v278_v37 = vpop.permute.xlu1 %277 }
  0x9f   : > { %v294_v38 = vsel %vm293_vm5, %v288_v36, %v290_v33  ;;  %vm664_vm5 = vcmask 154624  }
  0xa0   : > { %457 = vmatpush1.bf16.msra.mxu0 %v294_v38 }
  0xa2   : > { %v280_v39 = vpop.permute.xlu0 %279  ;;  %v276_v40 = vpop.permute.xlu1 %275 }
  0xa3   : > { %532 = vmatpush1.bf16.msra.mxu1 %v280_v39  ;;  %v283_v41 = vsel %vm281_vm6, %v278_v37, %v280_v39  ;;  %v282_v42 = vsel %vm281_vm6, %v276_v40, %v278_v37  ;;  %vm683_vm6 = vcmask 400384  }
  0xa4   : > { %458 = vmatprep.subr.bf16.mxu0 %v283_v41  ;;  %533 = vmatprep.subr.bf16.mxu1 %v924_v0 }
  0xa5   : > { %459 = vmatpush1.bf16.msra.mxu0 %v282_v42 }
  0xa6   : > { %v266_v43 = vpop.permute.xlu0 %265  ;;  %v268_v44 = vpop.permute.xlu1 %267 }
  0xa7   : > { %534 = vmatpush1.bf16.msra.mxu1 %v268_v44  ;;  %v271_v45 = vsel %vm269_vm7, %v266_v43, %v268_v44 }
  0xa8   : > { %460 = vmatprep.subr.bf16.mxu0 %v271_v45  ;;  %535 = vmatprep.subr.bf16.mxu1 %v924_v0 }
  0xaa   : > { %v264_v46 = vpop.permute.xlu0 %263  ;;  %v350_v47 = vpop.permute.xlu1 %349 }
  0xab   : > { %v270_v48 = vsel %vm269_vm7, %v264_v46, %v266_v43  ;;  %536 = vmatpush1.bf16.msra.mxu1 %v976_v3  ;;  %v174_v3 = vadd.s32 128, %v173_v61  ;;  %vm757_vm7 = vcmask 551936  }
  0xac   : > { %461 = vmatpush1.bf16.msra.mxu0 %v270_v48  ;;  %551 = vmatprep.subr.bf16.mxu1 %v924_v0  ;;  %v1068_v63 = vmul.u32.u64.low 3817748708, %v175_v62  ;;  %v1069_v0 = vmul.u32.u64.high 3817748708, %v175_v62, %v1068_v63 }
  0xad   : > { %462 = vmatprep.subr.bf16.mxu0 %v971_v1  ;;  %v1075_v5 = vmul.u32.u64.low 3817748708, %v174_v3  ;;  %v1076_v6 = vmul.u32.u64.high 3817748708, %v174_v3, %v1075_v5 }
  0xae   : > { %v352_v49 = vpop.permute.xlu0 %351  ;;  %v348_v52 = vpop.permute.xlu1 %347  ;;  %v204_v4 = vshrl.u32 %v1069_v0, 4 }
  0xaf   : > { %v355_v50 = vsel %vm353_vm8, %v350_v47, %v352_v49  ;;  %552 = vmatpush2.bf16.msra.mxu1 %v352_v49  ;;  %v354_v54 = vsel %vm353_vm8, %v348_v52, %v350_v47  ;;  %v193_v11 = vshrl.u32 %v1076_v6, 4 }
  0xb0   : > { %463 = vmatpush1.bf16.msra.mxu0 %v973_v2  ;;  %v1071_v1 = vmul.u32.u64.low 3817748708, %v173_v61  ;;  %v1072_v2 = vmul.u32.u64.high 3817748708, %v173_v61, %v1071_v1  ;;  %v205_v7 = vmul.u32 18, %v204_v4 }
  0xb1   : > { %478 = vmatprep.subr.bf16.mxu0 %v355_v50  ;;  %v194_v13 = vmul.u32 18, %v193_v11 }
  0xb2   : > { %554 = vmatmul.mubr.bf16.vlgmr.msra.gmra.mxu1 %v904_v51  ;;  %v182_v8 = vshrl.u32 %v1072_v2, 4  ;;  %v206_v9 = vsub.s32 %v175_v62, %v205_v7 }
  0xb3   : > { %851 = vmatprep.mubr.msk.bf16.mxu1 %vm435_vm0, %v907_v53  ;;  %v195_v15 = vsub.s32 %v174_v3, %v194_v13 }
  0xb4   : > { %479 = vmatpush2.bf16.msra.mxu0 %v354_v54  ;;  %v183_v10 = vmul.u32 18, %v182_v8  ;;  %vm211_vm9 = vcmp.ne.s32.totalorder %v206_v9, 0  ;;  %vm214_vm10 = vcmp.lt.s32.totalorder %v206_v9, 0  ;;  %v220_v14 = vadd.s32 18, %v206_v9 }
  0xb5   : > { %vm217_vm11 = vmand %vm214_vm10, %vm211_vm9  ;;  %vm213_vm1 = vcmp.lt.s32.totalorder %v195_v15, 0  ;;  %v219_v28 = vadd.s32 18, %v195_v15 }
  0xb6   : > { %v184_v12 = vsub.s32 %v173_v61, %v183_v10  ;;  %v223_v16 = vsel %vm217_vm11, %v220_v14, %v206_v9 }
  0xb7   : > { %481 = vmatmul.mubr.bf16.vlgmr.msra.gmra.mxu0 %v904_v51  ;;  %vm1084_vm15 = vcmp.lt.s32.totalorder %v223_v16, 16 }
  0xb8   : > { %847 = vmatprep.mubr.msk.bf16.mxu0 %vm435_vm0, %v907_v53  ;;  %vm209_vm12 = vcmp.ne.s32.totalorder %v184_v12, 0  ;;  %vm212_vm13 = vcmp.lt.s32.totalorder %v184_v12, 0  ;;  %v218_v20 = vadd.s32 18, %v184_v12 }
  0xb9   : > { %vm1080_vm14 = vmand %vm212_vm13, %vm209_vm12 }
  0xba   : > { %562 = vmatmul.mubr.bf16.gmra.mxu1 %v909_v55  ;;  %v221_v27 = vsel %vm1080_vm14, %v218_v20, %v184_v12 }
  0xbb   : > { %852 = vmatprep.mubr.msk.bf16.mxu1 %vm435_vm0, %v910_v56  ;;  %v362_v18 = vpop.permute.xlu0 %361  ;;  %v367_v21 = vpop.permute.xlu1 %366  ;;  %vm1098_vm3 = vcmp.lt.s32.totalorder %v221_v27, 16 }
  0xbf   : > { %491 = vmatmul.mubr.bf16.gmra.mxu0 %v909_v55  ;;  %v372_v35 = vpop.permute.xlu1 %371  ;;  %v377_v49 = vpop.permute.xlu0 %376 }
  0xc0   : > { %848 = vmatprep.mubr.msk.bf16.mxu0 %vm435_vm0, %v910_v56 }
  0xc2   : > { %570 = vmatmul.mubr.bf16.gmra.mxu1 %v912_v57 }
  0xc3   : > { %853 = vmatprep.mubr.msk.bf16.mxu1 %vm435_vm0, %v913_v58  ;;  %v1122_v63 = vpop.permute.xlu1 %381  ;;  %v387_v10 = vpop.permute.xlu0 %386 }
  0xc7   : > { %501 = vmatmul.mubr.bf16.gmra.mxu0 %v912_v57  ;;  %v397_v32 = vpop.permute.xlu0 %396 }
  0xc8   : > { %849 = vmatprep.mubr.msk.bf16.mxu0 %vm435_vm0, %v913_v58  ;;  %vm210_vm0 = vcmp.ne.s32.totalorder %v195_v15, 0 }
  0xc9   : > { %vm1092_vm2 = vmand %vm213_vm1, %vm210_vm0 }
  0xca   : > { %578 = vmatmul.mubr.bf16.gmra.mxu1 %v915_v59  ;;  %v222_v41 = vsel %vm1092_vm2, %v219_v28, %v195_v15  ;;  %v392_v28 = vpop.permute.xlu1 %391 }
  0xcb   : > { %vm1109_vm4 = vcmp.lt.s32.totalorder %v222_v41, 16 }
  0xcf   : > { %511 = vmatmul.mubr.bf16.gmra.mxu0 %v915_v59 }
 0x172   : > { %v555_v17 = vpop.f32.mrf.mxu1 }
 0x173   : > { %v556_v19 = vadd.f32 %v555_v17, %v362_v18 }
 0x174   : > { %v557_v22 = vpop.f32.mrf.mxu1 }
 0x175   : > { %v594_v30 = vsel %vm1084_vm15, %v556_v19, 0.0 }
 0x176   : > { %v558_v25 = vpop.f32.mrf.mxu1 }
 0x177   : > { %v482_v26 = vpop.f32.mrf.mxu0  ;;  %v559_v29 = vadd.f32 %v558_v25, %v367_v21 }
 0x178   : > { %v560_v31 = vpop.f32.mrf.mxu1  ;;  %v483_v34 = vadd.f32 %v482_v26, %v362_v18 }
 0x179   : > { %v484_v33 = vpop.f32.mrf.mxu0  ;;  %v597_v36 = vsel %vm1084_vm15, %v559_v29, 0.0 }
 0x17a   : > { %v563_v38 = vpop.f32.mrf.mxu1  ;;  %v618_v40 = vpack.c.bf16 %v597_v36, %v594_v30  ;;  %v592_v46 = vsel %vm1098_vm3, %v483_v34, 0.0  ;;  %v485_v47 = vadd.f32 %v484_v33, %v362_v18 }
 0x17b   : > { %v486_v39 = vpop.f32.mrf.mxu0  ;;  %v564_v43 = vadd.f32 %v563_v38, %v372_v35 }
 0x17c   : > { %v487_v42 = vadd.f32 %v486_v39, %v367_v21  ;;  %v565_v44 = vpop.f32.mrf.mxu1  ;;  %644 = vrot.lane.b32.xlu0 %v618_v40, %s933_s6  ;;  %v593_v60 = vsel %vm1109_vm4, %v485_v47, 0.0 }
 0x17d   : > { %v488_v45 = vpop.f32.mrf.mxu0  ;;  %v600_v57 = vsel %vm1084_vm15, %v564_v43, 0.0 }
 0x17e   : > { %v595_v48 = vsel %vm1098_vm3, %v487_v42, 0.0  ;;  %v489_v50 = vadd.f32 %v488_v45, %v367_v21  ;;  %v566_v53 = vpop.f32.mrf.mxu1 }
 0x17f   : > { %v616_v52 = vpack.c.bf16 %v595_v48, %v592_v46  ;;  %v492_v54 = vpop.f32.mrf.mxu0  ;;  %v567_v56 = vadd.f32 %v566_v53, %v377_v49 }
 0x180   : > { %v596_v55 = vsel %vm1109_vm4, %v489_v50, 0.0  ;;  %v568_v58 = vpop.f32.mrf.mxu1  ;;  %v493_v62 = vadd.f32 %v492_v54, %v372_v35 }
 0x181   : > { %v494_v59 = vpop.f32.mrf.mxu0  ;;  %640 = vrot.lane.b32.xlu1 %v616_v52, %s933_s6  ;;  %v603_v61 = vsel %vm1084_vm15, %v567_v56, 0.0  ;;  %v617_v0 = vpack.c.bf16 %v596_v55, %v593_v60 }
 0x182   : > { %v621_v1 = vpack.c.bf16 %v603_v61, %v600_v57  ;;  %v571_v2 = vpop.f32.mrf.mxu1  ;;  %v495_v4 = vadd.f32 %v494_v59, %v372_v35  ;;  %v598_v9 = vsel %vm1098_vm3, %v493_v62, 0.0 }
 0x183   : > { %v496_v3 = vpop.f32.mrf.mxu0  ;;  %v572_v5 = vadd.f32 %v571_v2, %v1122_v63 }
 0x184   : > { %v497_v6 = vadd.f32 %v496_v3, %v377_v49  ;;  %v573_v7 = vpop.f32.mrf.mxu1  ;;  %650 = vrot.lane.b32.xlu0 %v621_v1, %s933_s6  ;;  %v599_v16 = vsel %vm1109_vm4, %v495_v4, 0.0 }
 0x185   : > { %v498_v8 = vpop.f32.mrf.mxu0  ;;  %642 = vrot.lane.b32.xlu1 %v617_v0, %s933_s6  ;;  %v606_v17 = vsel %vm1084_vm15, %v572_v5, 0.0 }
 0x186   : > { %v601_v11 = vsel %vm1098_vm3, %v497_v6, 0.0  ;;  %v499_v12 = vadd.f32 %v498_v8, %v377_v49  ;;  %v574_v14 = vpop.f32.mrf.mxu1 }
 0x187   : > { %v619_v13 = vpack.c.bf16 %v601_v11, %v598_v9  ;;  %v502_v15 = vpop.f32.mrf.mxu0  ;;  %v575_v19 = vadd.f32 %v574_v14, %v387_v10 }
 0x188   : > { %v602_v18 = vsel %vm1109_vm4, %v499_v12, 0.0  ;;  %v576_v21 = vpop.f32.mrf.mxu1  ;;  %v503_v57 = vadd.f32 %v502_v15, %v1122_v63 }
 0x189   : > { %v620_v20 = vpack.c.bf16 %v602_v18, %v599_v16  ;;  %v504_v22 = vpop.f32.mrf.mxu0  ;;  %646 = vrot.lane.b32.xlu0 %v619_v13, %s933_s6  ;;  %v609_v23 = vsel %vm1084_vm15, %v575_v19, 0.0 }
 0x18a   : > { %v624_v25 = vpack.c.bf16 %v609_v23, %v606_v17  ;;  %v579_v26 = vpop.f32.mrf.mxu1  ;;  %v505_v29 = vadd.f32 %v504_v22, %v1122_v63  ;;  %v604_v62 = vsel %vm1098_vm3, %v503_v57, 0.0 }
 0x18b   : > { %v506_v27 = vpop.f32.mrf.mxu0  ;;  %648 = vrot.lane.b32.xlu1 %v620_v20, %s933_s6  ;;  %v580_v33 = vadd.f32 %v579_v26, %v392_v28 }
 0x18c   : > { %v581_v30 = vpop.f32.mrf.mxu1  ;;  %v605_v38 = vsel %vm1109_vm4, %v505_v29, 0.0  ;;  %v507_v53 = vadd.f32 %v506_v27, %v387_v10 }
 0x18d   : > { %v508_v31 = vpop.f32.mrf.mxu0  ;;  %656 = vrot.lane.b32.xlu0 %v624_v25, %s933_s6  ;;  %v612_v44 = vsel %vm1084_vm15, %v580_v33, 0.0 }
 0x18e   : > { %v509_v34 = vadd.f32 %v508_v31, %v387_v10  ;;  %v582_v35 = vpop.f32.mrf.mxu1  ;;  %v607_v61 = vsel %vm1098_vm3, %v507_v53, 0.0 }
 0x18f   : > { %v512_v36 = vpop.f32.mrf.mxu0  ;;  %v583_v40 = vadd.f32 %v582_v35, %v397_v32  ;;  %v622_v0 = vpack.c.bf16 %v607_v61, %v604_v62 }
 0x190   : > { %v608_v39 = vsel %vm1109_vm4, %v509_v34, 0.0  ;;  %v584_v43 = vpop.f32.mrf.mxu1  ;;  %v513_v46 = vadd.f32 %v512_v36, %v392_v28 }
 0x191   : > { %v623_v41 = vpack.c.bf16 %v608_v39, %v605_v38  ;;  %v514_v42 = vpop.f32.mrf.mxu0  ;;  %v615_v45 = vsel %vm1084_vm15, %v583_v40, 0.0 }
 0x192   : > { %v627_v47 = vpack.c.bf16 %v615_v45, %v612_v44  ;;  %v515_v49 = vadd.f32 %v514_v42, %v392_v28  ;;  %v610_v54 = vsel %vm1098_vm3, %v513_v46, 0.0 }
 0x193   : > { %v516_v48 = vpop.f32.mrf.mxu0  ;;  %654 = vrot.lane.b32.xlu1 %v623_v41, %s933_s6 }
 0x194   : > { %v517_v50 = vadd.f32 %v516_v48, %v397_v32  ;;  %662 = vrot.lane.b32.xlu0 %v627_v47, %s933_s6  ;;  %v611_v58 = vsel %vm1109_vm4, %v515_v49, 0.0 }
 0x195   : > { %v518_v52 = vpop.f32.mrf.mxu0 }
 0x196   : > { %v613_v55 = vsel %vm1098_vm3, %v517_v50, 0.0  ;;  %v519_v24 = vadd.f32 %v518_v52, %v397_v32 }
 0x197   : > { %v625_v56 = vpack.c.bf16 %v613_v55, %v610_v54 }
 0x198   : > { %v614_v59 = vsel %vm1109_vm4, %v519_v24, 0.0 }
 0x199   : > { %v626_v60 = vpack.c.bf16 %v614_v59, %v611_v58  ;;  %658 = vrot.lane.b32.xlu0 %v625_v56, %s933_s6 }
 0x19b   : > { %660 = vrot.lane.b32.xlu1 %v626_v60, %s933_s6 }
 0x19f   : > { %652 = vrot.lane.b32.xlu1 %v622_v0, %s933_s6 }
 0x1ee   : > { %v645_v63 = vpop.permute.xlu0 %644 }
 0x1f3   : > { %v641_v1 = vpop.permute.xlu1 %640 }
 0x1f4   : > { %v676_v37 = vsel %vm664_vm5, 0, %v641_v1 }
 0x1f6   : > { %v651_v51 = vpop.permute.xlu0 %650 }
 0x1f7   : > { %v643_v2 = vpop.permute.xlu1 %642 }
 0x1f8   : > { %v665_v3 = vsel %vm664_vm5, %v641_v1, %v643_v2  ;;  %v666_v4 = vsel %vm664_vm5, %v643_v2, %v645_v63 }
 0x1f9   : > { %v685_v5 = vsel %vm683_vm6, %v666_v4, 0  ;;  %v854_v6 = vcombine.low %v676_v37, %v665_v3  ;;  %v856_v7 = vcombine.high %v676_v37, %v665_v3 }
 0x1fa   : > { %v855_v8 = vcombine.low %v685_v5, %v685_v5  ;;  %v857_v9 = vcombine.high %v685_v5, %v685_v5 }
 0x1fb   : > { %756 = vst [vmem:[%s1173_s10] sm:$0xff] %v854_v6  ;;  %759 = vst [vmem:[%s1173_s10 + $0xc] sm:$0xff] %v856_v7  ;;  %v647_v10 = vpop.permute.xlu0 %646 }
 0x1fc   : > { %758 = vst.msk [vmem:[%s1173_s10 + $0x8] sm:$0xf] %vm757_vm7, %v855_v8  ;;  %760 = vst.msk [vmem:[%s1173_s10 + $0x14] sm:$0xf] %vm757_vm7, %v857_v9  ;;  %v678_v12 = vsel %vm664_vm5, 0, %v647_v10 }
 0x1fd   : > { %v649_v11 = vpop.permute.xlu1 %648 }
 0x1fe   : > { %v667_v13 = vsel %vm664_vm5, %v647_v10, %v649_v11  ;;  %v668_v14 = vsel %vm664_vm5, %v649_v11, %v651_v51 }
 0x1ff   : > { %v687_v15 = vsel %vm683_vm6, %v668_v14, 0  ;;  %v858_v16 = vcombine.low %v678_v12, %v667_v13  ;;  %v860_v17 = vcombine.high %v678_v12, %v667_v13  ;;  %v657_v20 = vpop.permute.xlu0 %656 }
 0x200   : > { %v859_v18 = vcombine.low %v687_v15, %v687_v15  ;;  %v861_v19 = vcombine.high %v687_v15, %v687_v15 }
 0x201   : > { %761 = vst [vmem:[%s1173_s10 + $0x18] sm:$0xff] %v858_v16  ;;  %763 = vst [vmem:[%s1173_s10 + $0x24] sm:$0xff] %v860_v17 }
 0x202   : > { %762 = vst.msk [vmem:[%s1173_s10 + $0x20] sm:$0xf] %vm757_vm7, %v859_v18  ;;  %764 = vst.msk [vmem:[%s1173_s10 + $0x2c] sm:$0xf] %vm757_vm7, %v861_v19 }
 0x205   : > { %v655_v21 = vpop.permute.xlu1 %654 }
 0x206   : > { %v670_v22 = vsel %vm664_vm5, %v655_v21, %v657_v20  ;;  %v663_v25 = vpop.permute.xlu0 %662 }
 0x207   : > { %v689_v23 = vsel %vm683_vm6, %v670_v22, 0 }
 0x208   : > { %v863_v26 = vcombine.low %v689_v23, %v689_v23  ;;  %v865_v27 = vcombine.high %v689_v23, %v689_v23 }
 0x20a   : > { %766 = vst.msk [vmem:[%s1173_s10 + $0x38] sm:$0xf] %vm757_vm7, %v863_v26  ;;  %768 = vst.msk [vmem:[%s1173_s10 + $0x44] sm:$0xf] %vm757_vm7, %v865_v27 }
 0x20b   : > { %v659_v28 = vpop.permute.xlu0 %658 }
 0x20c   : > { %v682_v30 = vsel %vm664_vm5, 0, %v659_v28 }
 0x20d   : > { %v661_v29 = vpop.permute.xlu1 %660 }
 0x20e   : > { %v671_v31 = vsel %vm664_vm5, %v659_v28, %v661_v29  ;;  %v672_v32 = vsel %vm664_vm5, %v661_v29, %v663_v25 }
 0x20f   : > { %v691_v33 = vsel %vm683_vm6, %v672_v32, 0  ;;  %v866_v34 = vcombine.low %v682_v30, %v671_v31  ;;  %v868_v35 = vcombine.high %v682_v30, %v671_v31 }
 0x210   : > { %v867_v36 = vcombine.low %v691_v33, %v691_v33  ;;  %v869_v38 = vcombine.high %v691_v33, %v691_v33 }
 0x211   : > { %769 = vst [vmem:[%s1173_s10 + $0x48] sm:$0xff] %v866_v34  ;;  %771 = vst [vmem:[%s1173_s10 + $0x54] sm:$0xff] %v868_v35  ;;  %v653_v39 = vpop.permute.xlu1 %652 }
 0x212   : > { %770 = vst.msk [vmem:[%s1173_s10 + $0x50] sm:$0xf] %vm757_vm7, %v867_v36  ;;  %772 = vst.msk [vmem:[%s1173_s10 + $0x5c] sm:$0xf] %vm757_vm7, %v869_v38  ;;  %v669_v40 = vsel %vm664_vm5, %v653_v39, %v655_v21  ;;  %v680_v41 = vsel %vm664_vm5, 0, %v653_v39 }
 0x213   : > { %v862_v42 = vcombine.low %v680_v41, %v669_v40  ;;  %v864_v43 = vcombine.high %v680_v41, %v669_v40 }
 0x215   : > { %765 = vst [vmem:[%s1173_s10 + $0x30] sm:$0xff] %v862_v42  ;;  %767 = vst [vmem:[%s1173_s10 + $0x3c] sm:$0xff] %v864_v43 }
 0x216 PF: > { %s13_s12 = sadd.s32 1, %s922_s12  }
 0x217   : > { %p10_p4 = scmp.ge.s32.totalorder %s13_s12, 4  }
 0x219   :  { %12 = sbr.rel (!%p10_p4) target bundleno = 1 (0x1), region = 62 }

// kernel: srdensenet_forward.3
= control target key start
LH: loop header
LB: loop body
LE: loop exit
PB: predicated region body
PF: predicated region fallthrough
CT: control target
= control target key end

     0   :  { %s2371_s25 = smov 0   ;;  %s3277_s0 = inlined_call_operand.vmem [shape: bf16[2,4,324], index: 0, kind: input, shape index: {}]   ;;  %s3278_s1 = inlined_call_operand.vmem [shape: bf16[8,36], index: 1, kind: input, shape index: {}]   ;;  %s3279_s2 = inlined_call_operand.vmem [shape: f32[8,1], index: 2, kind: input, shape index: {}]   ;;  %s3280_s3 = inlined_call_operand.vmem [shape: bf16[8,72], index: 3, kind: input, shape index: {}]   ;;  %s3281_s4 = inlined_call_operand.vmem [shape: f32[8,1], index: 4, kind: input, shape index: {}]   ;;  %s3282_s5 = inlined_call_operand.vmem [shape: bf16[8,144], index: 5, kind: input, shape index: {}]   ;;  %s3283_s6 = inlined_call_operand.vmem [shape: f32[8,1], index: 6, kind: input, shape index: {}]   ;;  %s3284_s7 = inlined_call_operand.vmem [shape: bf16[8,216], index: 7, kind: input, shape index: {}]   ;;  %s3285_s8 = inlined_call_operand.vmem [shape: f32[8,1], index: 8, kind: input, shape index: {}]   ;;  %s3286_s9 = inlined_call_operand.vmem [shape: bf16[8,288], index: 9, kind: input, shape index: {}]   ;;  %s3287_s10 = inlined_call_operand.vmem [shape: f32[8,1], index: 10, kind: input, shape index: {}]   ;;  %s3288_s11 = inlined_call_operand.vmem [shape: bf16[16,72], index: 11, kind: input, shape index: {}]   ;;  %s3289_s12 = inlined_call_operand.vmem [shape: f32[16,1], index: 12, kind: input, shape index: {}]   ;;  %s3290_s13 = inlined_call_operand.vmem [shape: bf16[2,16,324], index: 13, kind: output, shape index: {}]  }
   0x1 LB: > { %s2115_s26 = sadd.s32 4294967295, %s2286_s25   ;;  %p2119_p0 = scmp.ge.s32.totalorder %s2286_s25, 1  ;;  %s2286_s25 = sphi %s2371_s25, %s23_s25  }
   0x2   : > { %p387_p1 = scmp.lt.s32.totalorder %s2286_s25, 3 }
   0x4   : > { %p388_p2 = pnand %p2119_p0, %p387_p1 }
   0x5   : > { %p431_p3 = scmp.lt.s32.totalorder (!%p388_p2), %s2115_s26, 1  ;;  %s2289_s14 = smov (!%p388_p2), 109  }
   0x6   : > { %391 = sbr.rel (%p388_p2) target bundleno = 2965 (0xb95), region = 72  ;;  %s2290_s15 = smov (!%p388_p2), 90  }
   0x7   : > { %s2291_s16 = smov (!%p388_p2), 108   ;;  %s2292_s17 = smov (!%p388_p2), 92  }
   0x8   : > { %s2293_s18 = smov (!%p388_p2), 91   ;;  %s2294_s19 = smov (!%p388_p2), 127  }
   0x9   : > { %s2296_s20 = smov (!%p388_p2), 126   ;;  %s2297_s21 = smov (!%p388_p2), 110  }
   0xa   : > { %s2300_s28 = smov (!%p388_p2), 19  }
   0xb   : > { %v442_v0 = vlaneseq  ;;  %v2288_v1 = vmov 1983009808   ;;  %s3321_s26 = smov (!%p431_p3, %s2115_s26), 1  ;;  %v2295_v17 = vmov 0   ;;  %v499_v18 = vld [vmem:[%s3279_s2] sm:$0xff]  ;;  %vm598_vm0 = vcmask 736256  }
   0xc   : > { %v503_v2 = vunpack.c.l.s4 %v2288_v1  ;;  %s2239_s27 = smul.u32 6, %s3321_s26  ;;  %702 = vmatprep.mubr.bf16.mxu1 %v2295_v17  ;;  %2268 = vset.pattern.permute.xlu0 %v2295_v17  ;;  %vm601_vm1 = vcmask 1041408   ;;  %vm571_vm2 = vcmask 883712   ;;  %vm580_vm3 = vcmask 752640  }
   0xd   : > { %v506_v3 = vshrl.u32 %v442_v0, 7  ;;  %949 = vmatprep.mubr.bf16.mxu0 %v2295_v17  ;;  %2269 = vset.pattern.permute.xlu1 %v2295_v17  ;;  %vm3295_vm4 = vcmask 891904   ;;  %vm611_vm5 = vcmask 1043456   ;;  %vm589_vm6 = vcmask 744448   ;;  %s2240_s24 = smul.u32 24, %s3321_s26 }
   0xe   : > { %v504_v4 = vunpack.c.0.s8 %v503_v2  ;;  %s435_s30 = scalar_lea.vmem %s3277_s0, %s2239_s27  ;;  %vm618_vm7 = vcmask 1045504   ;;  %vm3293_vm8 = vcmask 1039360   ;;  %vm543_vm9 = vcmask 1031168  }
   0xf   : > { %v497_v6 = vld [vmem:[%s435_s30] sm:$0x3f]  ;;  %vm553_vm10 = vcmask 900096   ;;  %vm657_vm11 = vcmask 293888   ;;  %vm3291_vm12 = vmmov 0  }
  0x10   : > { %v507_v5 = vsub.s32 %v504_v4, %v506_v3  ;;  %v501_v8 = vcombine.high %v497_v6, %v497_v6  ;;  %v517_v10 = vcombine.low %v497_v6, %v497_v6 }
  0x12   : > { %v2386_v7 = vrot.slane %v497_v6, %v507_v5  ;;  %v2392_v9 = vrot.slane %v501_v8, %v507_v5  ;;  %v524_v12 = vrot.slane %v517_v10, %v507_v5 }
  0x14   : > { %556 = vrot.lane.b32.xlu1 %v2386_v7, %s2289_s14  ;;  %592 = vrot.lane.b32.xlu0 %v2386_v7, %s2290_s15  ;;  %v2400_v11 = vcombine.high %v2386_v7, %v2386_v7  ;;  %v525_v13 = vcombine.high %v524_v12, %v524_v12  ;;  %v535_v14 = vcombine.low %v2386_v7, %v2386_v7 }
  0x15   : > { %v536_v15 = vcombine.low %v2392_v9, %v2392_v9  ;;  %v546_v16 = vcombine.low %v524_v12, %v524_v12 }
  0x18   : > { %569 = vrot.lane.b32.xlu0 %v2386_v7, %s2291_s16  ;;  %596 = vrot.lane.b32.xlu1 %v2392_v9, %s2290_s15 }
  0x1c   : > { %594 = vrot.lane.b32.xlu0 %v2400_v11, %s2290_s15  ;;  %558 = vrot.lane.b32.xlu1 %v2400_v11, %s2289_s14 }
  0x20   : > { %560 = vrot.lane.b32.xlu0 %v2392_v9, %s2289_s14  ;;  %567 = vrot.lane.b32.xlu1 %v525_v13, %s2291_s16 }
  0x24   : > { %565 = vrot.lane.b32.xlu0 %v524_v12, %s2291_s16  ;;  %576 = vrot.lane.b32.xlu1 %v2386_v7, %s2292_s17 }
  0x28   : > { %574 = vrot.lane.b32.xlu1 %v535_v14, %s2292_s17  ;;  %578 = vrot.lane.b32.xlu0 %v536_v15, %s2292_s17 }
  0x2c   : > { %587 = vrot.lane.b32.xlu1 %v535_v14, %s2293_s18  ;;  %585 = vrot.lane.b32.xlu0 %v524_v12, %s2293_s18 }
  0x30   : > { %528 = vrot.lane.b32.xlu1 %v525_v13, %s2294_s19  ;;  %583 = vrot.lane.b32.xlu0 %v546_v16, %s2293_s18 }
  0x34   : > { %526 = vrot.lane.b32.xlu1 %v524_v12, %s2294_s19  ;;  %530 = vrot.lane.b32.xlu0 %v2386_v7, %s2294_s19 }
  0x38   : > { %541 = vrot.lane.b32.xlu1 %v536_v15, %s2296_s20  ;;  %539 = vrot.lane.b32.xlu0 %v2386_v7, %s2296_s20 }
  0x3c   : > { %549 = vrot.lane.b32.xlu1 %v524_v12, %s2297_s21  ;;  %537 = vrot.lane.b32.xlu0 %v535_v14, %s2296_s20 }
  0x40   : > { %547 = vrot.lane.b32.xlu1 %v546_v16, %s2297_s21  ;;  %551 = vrot.lane.b32.xlu0 %v535_v14, %s2297_s21 }
  0x44   : > { %654 = vperm.xlu0 %2268, %v499_v18  }
  0x86   : > { %v557_v19 = vpop.permute.xlu1 %556  ;;  %v593_v20 = vpop.permute.xlu0 %592 }
  0x8a   : > { %v2439_v21 = vpop.permute.xlu0 %569  ;;  %v2441_v22 = vpop.permute.xlu1 %596 }
  0x8b   : > { %v668_v12 = vsel %vm601_vm1, %v2441_v22, 0 }
  0x8e   : > { %v595_v23 = vpop.permute.xlu0 %594  ;;  %v559_v24 = vpop.permute.xlu1 %558 }
  0x8f   : > { %v600_v25 = vsel %vm598_vm0, %v595_v23, %v2441_v22  ;;  %v599_v26 = vsel %vm598_vm0, %v593_v20, %v595_v23  ;;  %v563_v45 = vsel %vm3295_vm4, %v557_v19, %v559_v24  ;;  %v443_v20 = vand.u32 127, %v442_v0 }
  0x90   : > { %2122 = vmatprep.subr.msk.bf16.mxu1 %vm601_vm1, %v600_v25  ;;  %v662_v27 = vsel %vm601_vm1, %v599_v26, 0 }
  0x91   : > { %681 = vmatpush1.bf16.msra.mxu1 %v662_v27  ;;  %v2505_v22 = vmul.u32.u64.low 3817748708, %v443_v20  ;;  %v2506_v23 = vmul.u32.u64.high 3817748708, %v443_v20, %v2505_v22  ;;  %v445_v26 = vadd.s32 256, %v443_v20 }
  0x92   : > { %v2448_v28 = vpop.permute.xlu0 %560  ;;  %v568_v29 = vpop.permute.xlu1 %567 }
  0x93   : > { %v564_v34 = vsel %vm3295_vm4, %v559_v24, %v2448_v28  ;;  %v573_v35 = vsel %vm571_vm2, %v568_v29, %v2439_v21  ;;  %v636_v13 = vsel %vm601_vm1, %v2448_v28, %v2439_v21  ;;  %v444_v21 = vadd.s32 128, %v443_v20 }
  0x94   : > { %v633_v37 = vsel %vm601_vm1, %v564_v34, %v573_v35  ;;  %v452_v25 = vshrl.u32 %v2506_v23, 4 }
  0x96   : > { %v566_v30 = vpop.permute.xlu0 %565  ;;  %v577_v31 = vpop.permute.xlu1 %576  ;;  %v453_v28 = vmul.u32 18, %v452_v25 }
  0x97   : > { %v572_v40 = vsel %vm571_vm2, %v566_v30, %v568_v29  ;;  %v2513_v29 = vmul.u32.u64.low 3817748708, %v445_v26  ;;  %v2514_v30 = vmul.u32.u64.high 3817748708, %v445_v26, %v2513_v29 }
  0x98   : > { %v630_v46 = vsel %vm601_vm1, %v563_v45, %v572_v40 }
  0x99   : > { %v474_v0 = vshrl.u32 %v2514_v30, 4 }
  0x9a   : > { %v575_v32 = vpop.permute.xlu1 %574  ;;  %v579_v33 = vpop.permute.xlu0 %578 }
  0x9b   : > { %v582_v36 = vsel %vm580_vm3, %v577_v31, %v579_v33  ;;  %v581_v43 = vsel %vm580_vm3, %v575_v32, %v577_v31  ;;  %v642_v14 = vsel %vm611_vm5, %v636_v13, %v579_v33  ;;  %v454_v32 = vsub.s32 %v443_v20, %v453_v28 }
  0x9c   : > { %v640_v42 = vsel %vm611_vm5, %v633_v37, %v582_v36  ;;  %v638_v50 = vsel %vm611_vm5, %v630_v46, %v581_v43  ;;  %v475_v36 = vmul.u32 18, %v474_v0 }
  0x9d   : > { %vm479_vm13 = vcmp.ne.s32.totalorder %v454_v32, 0  ;;  %vm482_vm14 = vcmp.lt.s32.totalorder %v454_v32, 0  ;;  %v488_v34 = vadd.s32 18, %v454_v32 }
  0x9e   : > { %v588_v38 = vpop.permute.xlu1 %587  ;;  %v586_v39 = vpop.permute.xlu0 %585  ;;  %v476_v40 = vsub.s32 %v445_v26, %v475_v36 }
  0x9f   : > { %v591_v41 = vsel %vm589_vm6, %v586_v39, %v588_v38  ;;  %v650_v15 = vsel %vm618_vm7, %v642_v14, %v588_v38 }
  0xa0   : > { %v647_v44 = vsel %vm618_vm7, %v640_v42, %v591_v41 }
  0xa1   : > { %682 = vmatprep.subr.bf16.mxu1 %v647_v44 }
  0xa2   : > { %v529_v47 = vpop.permute.xlu1 %528  ;;  %v584_v48 = vpop.permute.xlu0 %583 }
  0xa3   : > { %v590_v49 = vsel %vm589_vm6, %v584_v48, %v586_v39 }
  0xa4   : > { %v644_v51 = vsel %vm618_vm7, %v638_v50, %v590_v49 }
  0xa5   : > { %683 = vmatpush1.bf16.msra.mxu1 %v644_v51  ;;  %v490_v51 = vadd.s32 18, %v476_v40 }
  0xa6   : > { %v527_v52 = vpop.permute.xlu1 %526  ;;  %v531_v53 = vpop.permute.xlu0 %530 }
  0xa7   : > { %v533_v58 = vsel %vm3293_vm8, %v527_v52, %v529_v47  ;;  %v534_v59 = vsel %vm3293_vm8, %v529_v47, %v531_v53  ;;  %v610_v16 = vsel %vm601_vm1, %v2392_v9, %v531_v53 }
  0xa8   : > { %v604_v62 = vsel %vm601_vm1, %v2386_v7, %v533_v58  ;;  %v607_v63 = vsel %vm601_vm1, %v2400_v11, %v534_v59  ;;  %v498_v7 = vld [vmem:[%s3278_s1] sm:$0xf]  ;;  %v2298_v11 = vmov 0.0  }
  0xa9   : > { %v2508_v9 = vmul.u32.u64.low 3817748708, %v444_v21  ;;  %v2509_v24 = vmul.u32.u64.high 3817748708, %v444_v21, %v2508_v9 }
  0xaa   : > { %v542_v54 = vpop.permute.xlu1 %541  ;;  %v540_v55 = vpop.permute.xlu0 %539 }
  0xab   : > { %v545_v60 = vsel %vm543_vm9, %v540_v55, %v542_v54  ;;  %v617_v18 = vsel %vm611_vm5, %v610_v16, %v542_v54  ;;  %v463_v27 = vshrl.u32 %v2509_v24, 4 }
  0xac   : > { %v615_v5 = vsel %vm611_vm5, %v607_v63, %v545_v60 }
  0xad   : > { %v464_v31 = vmul.u32 18, %v463_v27 }
  0xae   : > { %v550_v56 = vpop.permute.xlu1 %549  ;;  %v538_v57 = vpop.permute.xlu0 %537 }
  0xaf   : > { %v544_v61 = vsel %vm543_vm9, %v538_v57, %v540_v55  ;;  %v465_v33 = vsub.s32 %v444_v21, %v464_v31 }
  0xb0   : > { %v613_v6 = vsel %vm611_vm5, %v604_v62, %v544_v61 }
  0xb1   : > { %vm480_vm15 = vcmp.ne.s32.totalorder %v465_v33, 0  ;;  %vm483_vm1 = vcmp.lt.s32.totalorder %v465_v33, 0  ;;  %v489_v35 = vadd.s32 18, %v465_v33 }
  0xb2   : > { %v548_v1 = vpop.permute.xlu1 %547  ;;  %v552_v2 = vpop.permute.xlu0 %551 }
  0xb3   : > { %v554_v3 = vsel %vm553_vm10, %v548_v1, %v550_v56  ;;  %v555_v4 = vsel %vm553_vm10, %v550_v56, %v552_v2  ;;  %v626_v19 = vsel %vm618_vm7, %v617_v18, %v552_v2 }
  0xb4   : > { %v623_v8 = vsel %vm618_vm7, %v615_v5, %v555_v4  ;;  %v620_v10 = vsel %vm618_vm7, %v613_v6, %v554_v3  ;;  %vm485_vm7 = vmand %vm482_vm14, %vm479_vm13  ;;  %vm481_vm13 = vcmp.ne.s32.totalorder %v476_v40, 0  ;;  %vm484_vm14 = vcmp.lt.s32.totalorder %v476_v40, 0 }
  0xb5   : > { %684 = vmatprep.subr.bf16.mxu1 %v623_v8  ;;  %v491_v37 = vsel %vm485_vm7, %v488_v34, %v454_v32  ;;  %vm772_vm7 = vcmask 154624  }
  0xb6   : > { %685 = vmatpush1.bf16.msra.mxu1 %v620_v10 }
  0xb7   : > { %2193 = vmatprep.subr.bf16.mxu1 %v2298_v11 }
  0xb9   : > { %2123 = vmatmul.mubr.msk.bf16.vlgmr.msra.gmra.mxu1 %vm657_vm11, %v498_v7 }
  0xba   : > { %2194 = vmatpush3.bf16.msra.mxu1 %v668_v12  ;;  %2199 = vmatprep.mubr.msk.bf16.mxu1 %vm3291_vm12, %v2298_v11  ;;  %v783_v12 = vld [vmem:[%s3281_s4] sm:$0xff] }
  0xbb   : > { %2195 = vmatprep.subr.bf16.mxu1 %v2298_v11 }
  0xbe   : > { %2196 = vmatpush3.bf16.msra.mxu1 %v650_v15 }
  0xbf   : > { %2197 = vmatprep.subr.bf16.mxu1 %v2298_v11  ;;  %v655_v38 = vpop.permute.xlu0 %654 }
  0xc2   : > { %2198 = vmatpush3.bf16.msra.mxu1 %v626_v19 }
  0xc3   : > { %2203 = vmatprep.subr.bf16.mxu1 %v2298_v11 }
  0xc5   : > { %2200 = vmatmul.mubr.msk.bf16.vlgmr.msra.gmra.mxu1 %vm657_vm11, %v498_v7  ;;  %vm486_vm11 = vmand %vm483_vm1, %vm480_vm15 }
  0xc6   : > { %2213 = vmatprep.mubr.msk.bf16.mxu1 %vm3291_vm12, %v2298_v11  ;;  %v492_v39 = vsel %vm486_vm11, %v489_v35, %v465_v33  ;;  %vm2517_vm12 = vcmp.lt.s32.totalorder %v491_v37, 16  ;;  %vm487_vm15 = vmand %vm484_vm14, %vm481_vm13  ;;  %vm779_vm11 = vcmask 400384   ;;  %vm3302_vm13 = vcmask 1039360  }
  0xc7   : > { %vm2521_vm8 = vcmp.lt.s32.totalorder %v492_v39, 16  ;;  %v493_v54 = vsel %vm487_vm15, %v490_v51, %v476_v40  ;;  %vm3303_vm14 = vmmov %vm3302_vm13  ;;  %vm3294_vm15 = vcmask 588800  }
  0xc8   : > { %vm2531_vm1 = vcmp.lt.s32.totalorder %v493_v54, 16 }
 0x179   : > { %v704_v41 = vpop.f32.mrf.mxu1 }
 0x17a   : > { %v705_v43 = vadd.f32 %v704_v41, %v655_v38 }
 0x17b   : > { %v706_v45 = vpop.f32.mrf.mxu1 }
 0x17c   : > { %v707_v46 = vadd.f32 %v706_v45, %v655_v38  ;;  %v757_v47 = vsel %vm2517_vm12, %v705_v43, 0.0 }
 0x17d   : > { %v708_v48 = vpop.f32.mrf.mxu1  ;;  %v760_v49 = vpack.c.bf16 %v757_v47, %v757_v47 }
 0x17e   : > { %v758_v50 = vsel %vm2521_vm8, %v707_v46, 0.0 }
 0x17f   : > { %v761_v52 = vpack.c.bf16 %v758_v50, %v758_v50  ;;  %v709_v53 = vpop.f32.mrf.mxu1  ;;  %766 = vrot.lane.b32.xlu0 %v760_v49, %s2300_s28 }
 0x181   : > { %768 = vrot.lane.b32.xlu1 %v761_v52, %s2300_s28 }
 0x185   : > { %v745_v56 = vpop.f32.mrf.mxu1 }
 0x186   : > { %v746_v57 = vadd.f32 %v745_v56, %v655_v38 }
 0x187   : > { %v2201_v58 = vpop.f32.mrf.mxu1 }
 0x188   : > { %v759_v59 = vsel %vm2531_vm1, %v746_v57, 0.0 }
 0x189   : > { %v762_v60 = vpack.c.bf16 %v759_v59, %v759_v59  ;;  %v748_v61 = vpop.f32.mrf.mxu1 }
 0x18b   : > { %v2202_v62 = vpop.f32.mrf.mxu1  ;;  %770 = vrot.lane.b32.xlu1 %v762_v60, %s2300_s28 }
 0x1f1   : > { %v767_v63 = vpop.permute.xlu0 %766 }
 0x1f2   : > { %v2539_v1 = vsel %vm772_vm7, 0, %v767_v63 }
 0x1f3   : > { %829 = vrot.lane.b32.xlu0 %v2539_v1, %s2292_s17  ;;  %845 = vrot.lane.b32.xlu1 %v2539_v1, %s2290_s15  ;;  %v786_v2 = vrot.slane %v2539_v1, 4  ;;  %v769_v3 = vpop.permute.xlu1 %768 }
 0x1f4   : > { %v2553_v5 = vsel %vm772_vm7, %v767_v63, %v769_v3 }
 0x1f5   : > { %v787_v10 = vrot.slane %v2553_v5, 4 }
 0x1f7   : > { %813 = vrot.lane.b32.xlu0 %v2539_v1, %s2289_s14  ;;  %837 = vrot.lane.b32.xlu1 %v786_v2, %s2293_s18 }
 0x1fb   : > { %797 = vrot.lane.b32.xlu0 %v2539_v1, %s2296_s20  ;;  %821 = vrot.lane.b32.xlu1 %v786_v2, %s2291_s16 }
 0x1fd   : > { %v771_v4 = vpop.permute.xlu1 %770 }
 0x1fe   : > { %v774_v6 = vsel %vm772_vm7, %v769_v3, %v771_v4 }
 0x1ff   : > { %805 = vrot.lane.b32.xlu1 %v786_v2, %s2297_s21  ;;  %847 = vrot.lane.b32.xlu0 %v2553_v5, %s2290_s15  ;;  %v2560_v8 = vsel %vm779_vm11, %v774_v6, 0 }
 0x200   : > { %v788_v7 = vrot.slane %v2560_v8, 4 }
 0x203   : > { %849 = vrot.lane.b32.xlu1 %v2560_v8, %s2290_s15  ;;  %831 = vrot.lane.b32.xlu0 %v2553_v5, %s2292_s17 }
 0x207   : > { %833 = vrot.lane.b32.xlu1 %v2560_v8, %s2292_s17  ;;  %815 = vrot.lane.b32.xlu0 %v2553_v5, %s2289_s14 }
 0x20b   : > { %817 = vrot.lane.b32.xlu1 %v2560_v8, %s2289_s14  ;;  %799 = vrot.lane.b32.xlu0 %v2553_v5, %s2296_s20 }
 0x20f   : > { %801 = vrot.lane.b32.xlu1 %v2560_v8, %s2296_s20  ;;  %839 = vrot.lane.b32.xlu0 %v787_v10, %s2293_s18 }
 0x213   : > { %841 = vrot.lane.b32.xlu1 %v788_v7, %s2293_s18  ;;  %823 = vrot.lane.b32.xlu0 %v787_v10, %s2291_s16 }
 0x217   : > { %825 = vrot.lane.b32.xlu1 %v788_v7, %s2291_s16  ;;  %807 = vrot.lane.b32.xlu0 %v787_v10, %s2297_s21 }
 0x21b   : > { %809 = vrot.lane.b32.xlu1 %v788_v7, %s2297_s21  ;;  %791 = vrot.lane.b32.xlu0 %v787_v10, %s2294_s19 }
 0x21f   : > { %793 = vrot.lane.b32.xlu1 %v788_v7, %s2294_s19  ;;  %789 = vrot.lane.b32.xlu0 %v786_v2, %s2294_s19  ;;  %v782_v7 = vld [vmem:[%s3280_s3] sm:$0xf] }
 0x223   : > { %901 = vperm.xlu1 %2269, %v783_v12  }
 0x265   : > { %v830_v13 = vpop.permute.xlu0 %829  ;;  %v846_v14 = vpop.permute.xlu1 %845 }
 0x269   : > { %v814_v15 = vpop.permute.xlu0 %813  ;;  %v838_v16 = vpop.permute.xlu1 %837 }
 0x26d   : > { %v798_v18 = vpop.permute.xlu0 %797  ;;  %v822_v19 = vpop.permute.xlu1 %821 }
 0x271   : > { %v806_v20 = vpop.permute.xlu1 %805  ;;  %v848_v21 = vpop.permute.xlu0 %847 }
 0x272   : > { %v851_v22 = vsel %vm598_vm0, %v846_v14, %v848_v21 }
 0x273   : > { %v909_v26 = vsel %vm611_vm5, %v851_v22, 0 }
 0x275   : > { %v850_v23 = vpop.permute.xlu1 %849  ;;  %v832_v9 = vpop.permute.xlu0 %831 }
 0x276   : > { %v852_v24 = vsel %vm598_vm0, %v848_v21, %v850_v23  ;;  %v915_v25 = vsel %vm611_vm5, %v850_v23, 0  ;;  %v835_v38 = vsel %vm580_vm3, %v830_v13, %v832_v9 }
 0x277   : > { %2125 = vmatprep.subr.msk.bf16.mxu0 %vm611_vm5, %v852_v24  ;;  %2204 = vmatpush3.bf16.msra.mxu1 %v915_v25 }
 0x278   : > { %924 = vmatpush1.bf16.msra.mxu0 %v909_v26  ;;  %2205 = vmatprep.subr.bf16.mxu1 %v2298_v11 }
 0x279   : > { %v834_v27 = vpop.permute.xlu1 %833  ;;  %v816_v28 = vpop.permute.xlu0 %815 }
 0x27a   : > { %v836_v35 = vsel %vm580_vm3, %v832_v9, %v834_v27  ;;  %v819_v49 = vsel %vm3295_vm4, %v814_v15, %v816_v28 }
 0x27d   : > { %v818_v29 = vpop.permute.xlu1 %817  ;;  %v800_v30 = vpop.permute.xlu0 %799 }
 0x27e   : > { %v820_v46 = vsel %vm3295_vm4, %v816_v28, %v818_v29  ;;  %v803_v59 = vsel %vm543_vm9, %v798_v18, %v800_v30 }
 0x281   : > { %v802_v31 = vpop.permute.xlu1 %801  ;;  %v840_v32 = vpop.permute.xlu0 %839 }
 0x282   : > { %v843_v33 = vsel %vm589_vm6, %v838_v16, %v840_v32  ;;  %v804_v56 = vsel %vm543_vm9, %v800_v30, %v802_v31 }
 0x283   : > { %v889_v40 = vsel %vm611_vm5, %v835_v38, %v843_v33 }
 0x285   : > { %v842_v0 = vpop.permute.xlu1 %841  ;;  %v824_v34 = vpop.permute.xlu0 %823 }
 0x286   : > { %v844_v36 = vsel %vm589_vm6, %v840_v32, %v842_v0  ;;  %v897_v37 = vsel %vm611_vm5, %v834_v27, %v842_v0  ;;  %v827_v41 = vsel %vm571_vm2, %v822_v19, %v824_v34 }
 0x287   : > { %2206 = vmatpush3.bf16.msra.mxu1 %v897_v37  ;;  %v893_v39 = vsel %vm611_vm5, %v836_v35, %v844_v36  ;;  %v877_v51 = vsel %vm611_vm5, %v819_v49, %v827_v41  ;;  %v1037_v49 = vld [vmem:[%s3283_s6] sm:$0xff] }
 0x288   : > { %925 = vmatprep.subr.bf16.mxu0 %v893_v39  ;;  %2207 = vmatprep.subr.bf16.mxu1 %v2298_v11 }
 0x289   : > { %v826_v43 = vpop.permute.xlu1 %825  ;;  %926 = vmatpush1.bf16.msra.mxu0 %v889_v40  ;;  %v808_v45 = vpop.permute.xlu0 %807 }
 0x28a   : > { %v828_v47 = vsel %vm571_vm2, %v824_v34, %v826_v43  ;;  %v885_v48 = vsel %vm611_vm5, %v818_v29, %v826_v43  ;;  %v811_v52 = vsel %vm553_vm10, %v806_v20, %v808_v45 }
 0x28b   : > { %2208 = vmatpush3.bf16.msra.mxu1 %v885_v48  ;;  %v881_v50 = vsel %vm611_vm5, %v820_v46, %v828_v47  ;;  %v865_v61 = vsel %vm611_vm5, %v803_v59, %v811_v52  ;;  %v2694_v47 = vld [vmem:[%s3282_s5] sm:$0xff] }
 0x28c   : > { %927 = vmatprep.subr.bf16.mxu0 %v881_v50  ;;  %2209 = vmatprep.subr.bf16.mxu1 %v2298_v11  ;;  %v2129_v48 = vcombine.high %v2694_v47, %v2694_v47 }
 0x28d   : > { %v810_v53 = vpop.permute.xlu1 %809  ;;  %928 = vmatpush1.bf16.msra.mxu0 %v877_v51  ;;  %v792_v54 = vpop.permute.xlu0 %791 }
 0x28e   : > { %v812_v57 = vsel %vm553_vm10, %v808_v45, %v810_v53  ;;  %v873_v58 = vsel %vm611_vm5, %v802_v31, %v810_v53 }
 0x28f   : > { %2210 = vmatpush3.bf16.msra.mxu1 %v873_v58  ;;  %v869_v60 = vsel %vm611_vm5, %v804_v56, %v812_v57 }
 0x290   : > { %929 = vmatprep.subr.bf16.mxu0 %v869_v60  ;;  %2211 = vmatprep.subr.bf16.mxu1 %v2298_v11 }
 0x291   : > { %v794_v62 = vpop.permute.xlu1 %793  ;;  %930 = vmatpush1.bf16.msra.mxu0 %v865_v61  ;;  %v790_v63 = vpop.permute.xlu0 %789 }
 0x292   : > { %v796_v2 = vsel %vm3302_vm13, %v792_v54, %v794_v62  ;;  %v795_v3 = vsel %vm3303_vm14, %v790_v63, %v792_v54  ;;  %v861_v4 = vsel %vm611_vm5, %v2560_v8, %v794_v62  ;;  %vm1140_vm13 = vcmask 130048  }
 0x293   : > { %2212 = vmatpush3.bf16.msra.mxu1 %v861_v4  ;;  %v858_v6 = vsel %vm611_vm5, %v2553_v5, %v796_v2  ;;  %v854_v10 = vsel %vm611_vm5, %v2539_v1, %v795_v3 }
 0x294   : > { %931 = vmatprep.subr.bf16.mxu0 %v858_v6  ;;  %1185 = vmatprep.subr.bf16.mxu1 %v2295_v17 }
 0x295   : > { %932 = vmatpush1.bf16.msra.mxu0 %v854_v10 }
 0x296   : > { %2214 = vmatmul.mubr.msk.bf16.vlgmr.msra.gmra.mxu1 %vm3294_vm15, %v782_v7 }
 0x297   : > { %2131 = vmatprep.mubr.msk.bf16.mxu1 %vm1140_vm13, %v2129_v48 }
 0x298   : > { %2126 = vmatmul.mubr.msk.bf16.vlgmr.msra.gmra.mxu0 %vm3294_vm15, %v782_v7 }
 0x299   : > { %2130 = vmatprep.mubr.msk.bf16.mxu0 %vm1140_vm13, %v2129_v48  ;;  %vm3304_vm13 = vmmov %vm3303_vm14 }
 0x29a   : > { %vm3306_vm15 = vmmov %vm3304_vm13 }
 0x29e   : > { %v902_v12 = vpop.permute.xlu1 %901 }
 0x356   : > { %v992_v13 = vpop.f32.mrf.mxu1 }
 0x357   : > { %v993_v14 = vadd.f32 %v992_v13, %v902_v12 }
 0x358   : > { %v951_v15 = vpop.f32.mrf.mxu0  ;;  %v2215_v16 = vpop.f32.mrf.mxu1 }
 0x359   : > { %v952_v18 = vadd.f32 %v951_v15, %v902_v12  ;;  %v1000_v19 = vmax.f32 %v993_v14, 0.0 }
 0x35a   : > { %v953_v20 = vpop.f32.mrf.mxu0  ;;  %v995_v21 = vpop.f32.mrf.mxu1 }
 0x35b   : > { %v954_v22 = vadd.f32 %v953_v20, %v902_v12  ;;  %v1003_v23 = vsel %vm2531_vm1, %v1000_v19, 0.0  ;;  %v998_v26 = vmax.f32 %v952_v18, 0.0 }
 0x35c   : > { %v1006_v9 = vpack.c.bf16 %v1003_v23, %v1003_v23  ;;  %v955_v24 = vpop.f32.mrf.mxu0  ;;  %v2216_v25 = vpop.f32.mrf.mxu1 }
 0x35d   : > { %v999_v27 = vmax.f32 %v954_v22, 0.0  ;;  %v1001_v31 = vsel %vm2517_vm12, %v998_v26, 0.0 }
 0x35e   : > { %v956_v28 = vpop.f32.mrf.mxu0  ;;  %1014 = vrot.lane.b32.xlu1 %v1006_v9, %s2300_s28  ;;  %v1004_v32 = vpack.c.bf16 %v1001_v31, %v1001_v31 }
 0x35f   : > { %v1002_v29 = vsel %vm2521_vm8, %v999_v27, 0.0 }
 0x360   : > { %v1005_v30 = vpack.c.bf16 %v1002_v29, %v1002_v29 }
 0x362   : > { %1012 = vrot.lane.b32.xlu0 %v1005_v30, %s2300_s28  ;;  %v2128_v30 = vcombine.low %v2694_v47, %v2694_v47 }
 0x366   : > { %1010 = vrot.lane.b32.xlu0 %v1004_v32, %s2300_s28 }
 0x3d0   : > { %v1015_v37 = vpop.permute.xlu1 %1014 }
 0x3d4   : > { %v1013_v33 = vpop.permute.xlu0 %1012 }
 0x3d5   : > { %v1017_v40 = vsel %vm772_vm7, %v1013_v33, %v1015_v37 }
 0x3d6   : > { %v1021_v43 = vsel %vm779_vm11, %v1017_v40, 0 }
 0x3d7   : > { %v1026_v45 = vrot.slane %v1021_v43, 4 }
 0x3d8   : > { %v1011_v0 = vpop.permute.xlu0 %1010 }
 0x3d9   : > { %v1016_v34 = vsel %vm772_vm7, %v1011_v0, %v1013_v33  ;;  %v1019_v35 = vsel %vm772_vm7, 0, %v1011_v0  ;;  %v2669_v46 = vsel %vm611_vm5, %v2560_v8, %v1026_v45 }
 0x3da   : > { %v1024_v36 = vrot.slane %v1019_v35, 4  ;;  %v1025_v38 = vrot.slane %v1016_v34, 4 }
 0x3dc   : > { %v2647_v39 = vsel %vm611_vm5, %v2539_v1, %v1024_v36  ;;  %v2656_v41 = vsel %vm611_vm5, %v2553_v5, %v1025_v38 }
 0x3dd   : > { %1096 = vrot.lane.b32.xlu0 %v2647_v39, %s2292_s17  ;;  %1107 = vrot.lane.b32.xlu1 %v2647_v39, %s2293_s18 }
 0x3e1   : > { %1085 = vrot.lane.b32.xlu1 %v2647_v39, %s2291_s16  ;;  %1098 = vrot.lane.b32.xlu0 %v2656_v41, %s2292_s17 }
 0x3e5   : > { %1076 = vrot.lane.b32.xlu0 %v2656_v41, %s2289_s14  ;;  %1109 = vrot.lane.b32.xlu1 %v2656_v41, %s2293_s18 }
 0x3e9   : > { %1111 = vrot.lane.b32.xlu0 %v2669_v46, %s2293_s18  ;;  %1087 = vrot.lane.b32.xlu1 %v2656_v41, %s2291_s16 }
 0x3ed   : > { %1074 = vrot.lane.b32.xlu0 %v2647_v39, %s2289_s14  ;;  %1100 = vrot.lane.b32.xlu1 %v2669_v46, %s2292_s17 }
 0x3f1   : > { %1089 = vrot.lane.b32.xlu0 %v2669_v46, %s2291_s16  ;;  %1065 = vrot.lane.b32.xlu1 %v2656_v41, %s2297_s21 }
 0x3f5   : > { %1054 = vrot.lane.b32.xlu0 %v2656_v41, %s2296_s20  ;;  %1078 = vrot.lane.b32.xlu1 %v2669_v46, %s2289_s14 }
 0x3f9   : > { %1067 = vrot.lane.b32.xlu0 %v2669_v46, %s2297_s21  ;;  %1063 = vrot.lane.b32.xlu1 %v2647_v39, %s2297_s21 }
 0x3fd   : > { %1052 = vrot.lane.b32.xlu0 %v2647_v39, %s2296_s20  ;;  %1056 = vrot.lane.b32.xlu1 %v2669_v46, %s2296_s20 }
 0x401   : > { %1045 = vrot.lane.b32.xlu0 %v2669_v46, %s2294_s19  ;;  %1043 = vrot.lane.b32.xlu1 %v2656_v41, %s2294_s19 }
 0x405   : > { %1120 = vrot.lane.b32.xlu0 %v2656_v41, %s2290_s15  ;;  %1041 = vrot.lane.b32.xlu1 %v2647_v39, %s2294_s19 }
 0x409   : > { %1118 = vrot.lane.b32.xlu0 %v2647_v39, %s2290_s15  ;;  %1122 = vrot.lane.b32.xlu1 %v2669_v46, %s2290_s15 }
 0x40d   : > { %1131 = vperm.xlu1 %2269, %v1037_v49  }
 0x44f   : > { %v1097_v50 = vpop.permute.xlu0 %1096  ;;  %v1108_v51 = vpop.permute.xlu1 %1107 }
 0x453   : > { %v1086_v52 = vpop.permute.xlu1 %1085  ;;  %v1099_v53 = vpop.permute.xlu0 %1098 }
 0x454   : > { %v2739_v2 = vsel %vm580_vm3, %v1097_v50, %v1099_v53 }
 0x457   : > { %v1077_v54 = vpop.permute.xlu0 %1076  ;;  %v1110_v56 = vpop.permute.xlu1 %1109 }
 0x458   : > { %v2726_v60 = vsel %vm589_vm6, %v1108_v51, %v1110_v56 }
 0x45b   : > { %v2717_v57 = vpop.permute.xlu0 %1111  ;;  %v1088_v58 = vpop.permute.xlu1 %1087 }
 0x45c   : > { %1186 = vmatpush1.bf16.msra.mxu1 %v2717_v57  ;;  %v2722_v59 = vsel %vm589_vm6, %v1110_v56, %v2717_v57  ;;  %v2752_v10 = vsel %vm571_vm2, %v1086_v52, %v1088_v58 }
 0x45d   : > { %1144 = vmatprep.subr.bf16.mxu0 %v2722_v59  ;;  %1187 = vmatprep.subr.bf16.mxu1 %v2295_v17 }
 0x45e   : > { %1145 = vmatpush1.bf16.msra.mxu0 %v2726_v60 }
 0x45f   : > { %v1075_v61 = vpop.permute.xlu0 %1074  ;;  %v2730_v62 = vpop.permute.xlu1 %1100 }
 0x460   : > { %1188 = vmatpush1.bf16.msra.mxu1 %v2730_v62  ;;  %v2735_v63 = vsel %vm580_vm3, %v1099_v53, %v2730_v62  ;;  %v2764_v14 = vsel %vm3295_vm4, %v1075_v61, %v1077_v54 }
 0x461   : > { %1146 = vmatprep.subr.bf16.mxu0 %v2735_v63  ;;  %1189 = vmatprep.subr.bf16.mxu1 %v2295_v17 }
 0x462   : > { %1147 = vmatpush1.bf16.msra.mxu0 %v2739_v2 }
 0x463   : > { %v2743_v3 = vpop.permute.xlu0 %1089  ;;  %v1066_v4 = vpop.permute.xlu1 %1065 }
 0x464   : > { %1190 = vmatpush1.bf16.msra.mxu1 %v2743_v3  ;;  %v2748_v6 = vsel %vm571_vm2, %v1088_v58, %v2743_v3 }
 0x465   : > { %1148 = vmatprep.subr.bf16.mxu0 %v2748_v6  ;;  %1191 = vmatprep.subr.bf16.mxu1 %v2295_v17 }
 0x466   : > { %1149 = vmatpush1.bf16.msra.mxu0 %v2752_v10 }
 0x467   : > { %v1055_v7 = vpop.permute.xlu0 %1054  ;;  %v2756_v12 = vpop.permute.xlu1 %1078 }
 0x468   : > { %1192 = vmatpush1.bf16.msra.mxu1 %v2756_v12  ;;  %v2761_v13 = vsel %vm3295_vm4, %v1077_v54, %v2756_v12  ;;  %v2831_v54 = vrot.slane %v2656_v41, 4 }
 0x469   : > { %1150 = vmatprep.subr.bf16.mxu0 %v2761_v13  ;;  %1193 = vmatprep.subr.bf16.mxu1 %v2295_v17 }
 0x46a   : > { %1151 = vmatpush1.bf16.msra.mxu0 %v2764_v14 }
 0x46b   : > { %v2769_v15 = vpop.permute.xlu0 %1067  ;;  %v1064_v16 = vpop.permute.xlu1 %1063 }
 0x46c   : > { %v2772_v18 = vsel %vm553_vm10, %v1064_v16, %v1066_v4  ;;  %1194 = vmatpush1.bf16.msra.mxu1 %v2769_v15  ;;  %v2777_v19 = vsel %vm553_vm10, %v1066_v4, %v2769_v15  ;;  %v2842_v16 = vrot.slane %v2669_v46, 4 }
 0x46d   : > { %1152 = vmatprep.subr.bf16.mxu0 %v2777_v19  ;;  %1195 = vmatprep.subr.bf16.mxu1 %v2295_v17 }
 0x46e   : > { %1153 = vmatpush1.bf16.msra.mxu0 %v2772_v18 }
 0x46f   : > { %v1053_v20 = vpop.permute.xlu0 %1052  ;;  %v2782_v21 = vpop.permute.xlu1 %1056 }
 0x470   : > { %v2785_v22 = vsel %vm543_vm9, %v1053_v20, %v1055_v7  ;;  %1196 = vmatpush1.bf16.msra.mxu1 %v2782_v21  ;;  %v2790_v23 = vsel %vm543_vm9, %v1055_v7, %v2782_v21  ;;  %v2847_v20 = vrot.slane %v2647_v39, 4 }
 0x471   : > { %1154 = vmatprep.subr.bf16.mxu0 %v2790_v23  ;;  %1197 = vmatprep.subr.bf16.mxu1 %v2295_v17 }
 0x472   : > { %1155 = vmatpush1.bf16.msra.mxu0 %v2785_v22 }
 0x473   : > { %v2795_v9 = vpop.permute.xlu0 %1045  ;;  %v1044_v24 = vpop.permute.xlu1 %1043 }
 0x474   : > { %1198 = vmatpush1.bf16.msra.mxu1 %v2795_v9  ;;  %v2800_v25 = vsel %vm3303_vm14, %v1044_v24, %v2795_v9  ;;  %vm1428_vm14 = vcmask 719872  }
 0x475   : > { %1156 = vmatprep.subr.bf16.mxu0 %v2800_v25  ;;  %1199 = vmatprep.subr.bf16.mxu1 %v2295_v17 }
 0x477   : > { %v1121_v26 = vpop.permute.xlu0 %1120  ;;  %v1042_v27 = vpop.permute.xlu1 %1041 }
 0x478   : > { %v2805_v28 = vsel %vm3304_vm13, %v1042_v27, %v1044_v24  ;;  %1200 = vmatpush1.bf16.msra.mxu1 %v2669_v46 }
 0x479   : > { %1157 = vmatpush1.bf16.msra.mxu0 %v2805_v28  ;;  %1215 = vmatprep.subr.bf16.mxu1 %v2295_v17 }
 0x47a   : > { %1158 = vmatprep.subr.bf16.mxu0 %v2656_v41 }
 0x47b   : > { %v2811_v29 = vpop.permute.xlu1 %1122  ;;  %v1119_v32 = vpop.permute.xlu0 %1118 }
 0x47c   : > { %1216 = vmatpush2.bf16.msra.mxu1 %v2811_v29  ;;  %v2818_v31 = vsel %vm598_vm0, %v1121_v26, %v2811_v29  ;;  %v2824_v33 = vsel %vm598_vm0, %v1119_v32, %v1121_v26 }
 0x47d   : > { %1159 = vmatpush1.bf16.msra.mxu0 %v2647_v39  ;;  %1482 = vmatprep.subr.bf16.mxu1 %v2295_v17 }
 0x47e   : > { %1174 = vmatprep.subr.bf16.mxu0 %v2818_v31 }
 0x47f   : > { %1218 = vmatmul.mubr.bf16.vlgmr.msra.gmra.mxu1 %v2128_v30 }
 0x481   : > { %1175 = vmatpush2.bf16.msra.mxu0 %v2824_v33 }
 0x484   : > { %1177 = vmatmul.mubr.bf16.vlgmr.msra.gmra.mxu0 %v2128_v30 }
 0x488   : > { %v1132_v0 = vpop.permute.xlu1 %1131 }
 0x53f   : > { %v1219_v34 = vpop.f32.mrf.mxu1 }
 0x540   : > { %v1220_v35 = vadd.f32 %v1219_v34, %v1132_v0 }
 0x541   : > { %v1221_v36 = vpop.f32.mrf.mxu1 }
 0x542   : > { %v1227_v37 = vmax.f32 %v1220_v35, 0.0 }
 0x543   : > { %v1222_v38 = vpop.f32.mrf.mxu1 }
 0x544   : > { %v1230_v40 = vsel %vm2531_vm1, %v1227_v37, 0.0  ;;  %v1178_v43 = vpop.f32.mrf.mxu0 }
 0x545   : > { %v1233_v45 = vpack.c.bf16 %v1230_v40, %v1230_v40  ;;  %v1179_v47 = vadd.f32 %v1178_v43, %v1132_v0  ;;  %v1223_v48 = vpop.f32.mrf.mxu1 }
 0x546   : > { %v1180_v49 = vpop.f32.mrf.mxu0  ;;  %v1250_v48 = vld [vmem:[%s3285_s8] sm:$0xff] }
 0x547   : > { %v1181_v50 = vadd.f32 %v1180_v49, %v1132_v0  ;;  %1241 = vrot.lane.b32.xlu1 %v1233_v45, %s2300_s28  ;;  %v1225_v52 = vmax.f32 %v1179_v47, 0.0  ;;  %v2935_v45 = vld [vmem:[%s3284_s7] sm:$0xff] }
 0x548   : > { %v1182_v51 = vpop.f32.mrf.mxu0  ;;  %v2133_v47 = vcombine.high %v2935_v45, %v2935_v45 }
 0x549   : > { %v1226_v53 = vmax.f32 %v1181_v50, 0.0  ;;  %v1228_v4 = vsel %vm2517_vm12, %v1225_v52, 0.0 }
 0x54a   : > { %v1183_v56 = vpop.f32.mrf.mxu0  ;;  %v1231_v7 = vpack.c.bf16 %v1228_v4, %v1228_v4  ;;  %2136 = vmatprep.mubr.msk.bf16.mxu1 %vm1428_vm14, %v2133_v47  ;;  %2135 = vmatprep.mubr.msk.bf16.mxu0 %vm1428_vm14, %v2133_v47  ;;  %vm3305_vm14 = vmmov %vm3304_vm13 }
 0x54b   : > { %v1229_v58 = vsel %vm2521_vm8, %v1226_v53, 0.0  ;;  %1319 = vrot.lane.b32.xlu1 %v2831_v54, %s2291_s16 }
 0x54c   : > { %v1232_v61 = vpack.c.bf16 %v1229_v58, %v1229_v58 }
 0x54e   : > { %1239 = vrot.lane.b32.xlu0 %v1232_v61, %s2300_s28 }
 0x552   : > { %1237 = vrot.lane.b32.xlu0 %v1231_v7, %s2300_s28 }
 0x556   : > { %1321 = vrot.lane.b32.xlu0 %v2842_v16, %s2291_s16 }
 0x55a   : > { %1317 = vrot.lane.b32.xlu0 %v2847_v20, %s2291_s16 }
 0x5b9   : > { %v1242_v27 = vpop.permute.xlu1 %1241 }
 0x5bd   : > { %v1320_v50 = vpop.permute.xlu1 %1319 }
 0x5c0   : > { %v1240_v24 = vpop.permute.xlu0 %1239 }
 0x5c1   : > { %v1244_v0 = vsel %vm772_vm7, %v1240_v24, %v1242_v27 }
 0x5c2   : > { %v2863_v34 = vsel %vm779_vm11, %v1244_v0, 0 }
 0x5c3   : > { %v1261_v35 = vrot.slane %v2863_v34, 4 }
 0x5c4   : > { %v1238_v26 = vpop.permute.xlu0 %1237 }
 0x5c5   : > { %v2852_v30 = vsel %vm772_vm7, %v1238_v26, %v1240_v24  ;;  %v2855_v32 = vsel %vm772_vm7, 0, %v1238_v26  ;;  %v2881_v37 = vsel %vm611_vm5, %v2842_v16, %v1261_v35 }
 0x5c6   : > { %1284 = vrot.lane.b32.xlu0 %v2852_v30, %s2296_s20  ;;  %1309 = vrot.lane.b32.xlu1 %v2855_v32, %s2289_s14  ;;  %v1257_v36 = vrot.slane %v2855_v32, 4  ;;  %v1259_v40 = vrot.slane %v2852_v30, 4 }
 0x5c8   : > { %v2885_v38 = vsel %vm611_vm5, %v2847_v20, %v1257_v36  ;;  %v2894_v43 = vsel %vm611_vm5, %v2831_v54, %v1259_v40  ;;  %v1322_v49 = vpop.permute.xlu0 %1321 }
 0x5c9   : > { %v1330_v56 = vsel %vm571_vm2, %v1320_v50, %v1322_v49 }
 0x5ca   : > { %1313 = vrot.lane.b32.xlu0 %v2863_v34, %s2289_s14  ;;  %1311 = vrot.lane.b32.xlu1 %v2852_v30, %s2289_s14 }
 0x5cc   : > { %v1318_v51 = vpop.permute.xlu0 %1317 }
 0x5cd   : > { %v1329_v4 = vsel %vm571_vm2, %v1318_v51, %v1320_v50 }
 0x5ce   : > { %1292 = vrot.lane.b32.xlu0 %v2831_v54, %s2297_s21  ;;  %1294 = vrot.lane.b32.xlu1 %v2842_v16, %s2297_s21 }
 0x5d2   : > { %1282 = vrot.lane.b32.xlu0 %v2855_v32, %s2296_s20  ;;  %1290 = vrot.lane.b32.xlu1 %v2847_v20, %s2297_s21 }
 0x5d6   : > { %1300 = vrot.lane.b32.xlu0 %v2881_v37, %s2297_s21  ;;  %1296 = vrot.lane.b32.xlu1 %v2885_v38, %s2297_s21 }
 0x5da   : > { %1286 = vrot.lane.b32.xlu1 %v2863_v34, %s2296_s20  ;;  %1271 = vrot.lane.b32.xlu0 %v2894_v43, %s2294_s19 }
 0x5de   : > { %1269 = vrot.lane.b32.xlu0 %v2885_v38, %s2294_s19  ;;  %1298 = vrot.lane.b32.xlu1 %v2894_v43, %s2297_s21 }
 0x5e2   : > { %1267 = vrot.lane.b32.xlu0 %v2842_v16, %s2294_s19  ;;  %1265 = vrot.lane.b32.xlu1 %v2831_v54, %s2294_s19 }
 0x5e6   : > { %1363 = vrot.lane.b32.xlu0 %v2855_v32, %s2290_s15  ;;  %1263 = vrot.lane.b32.xlu1 %v2847_v20, %s2294_s19 }
 0x5ea   : > { %1367 = vrot.lane.b32.xlu0 %v2863_v34, %s2290_s15  ;;  %1273 = vrot.lane.b32.xlu1 %v2881_v37, %s2294_s19 }
 0x5ee   : > { %1338 = vrot.lane.b32.xlu0 %v2852_v30, %s2292_s17  ;;  %1365 = vrot.lane.b32.xlu1 %v2852_v30, %s2290_s15 }
 0x5f2   : > { %1346 = vrot.lane.b32.xlu0 %v2831_v54, %s2293_s18  ;;  %1352 = vrot.lane.b32.xlu1 %v2894_v43, %s2293_s18 }
 0x5f6   : > { %1354 = vrot.lane.b32.xlu0 %v2881_v37, %s2293_s18  ;;  %1350 = vrot.lane.b32.xlu1 %v2885_v38, %s2293_s18 }
 0x5fa   : > { %1336 = vrot.lane.b32.xlu0 %v2855_v32, %s2292_s17  ;;  %1340 = vrot.lane.b32.xlu1 %v2863_v34, %s2292_s17 }
 0x5fe   : > { %1325 = vrot.lane.b32.xlu0 %v2894_v43, %s2291_s16  ;;  %1348 = vrot.lane.b32.xlu1 %v2842_v16, %s2293_s18 }
 0x602   : > { %1323 = vrot.lane.b32.xlu0 %v2885_v38, %s2291_s16  ;;  %1344 = vrot.lane.b32.xlu1 %v2847_v20, %s2293_s18 }
 0x606   : > { %1327 = vrot.lane.b32.xlu1 %v2881_v37, %s2291_s16 }
 0x60a   : > { %1419 = vperm.xlu1 %2269, %v1250_v48  }
 0x638   : > { %v1285_v52 = vpop.permute.xlu0 %1284  ;;  %v1310_v53 = vpop.permute.xlu1 %1309 }
 0x63c   : > { %v1314_v58 = vpop.permute.xlu0 %1313  ;;  %v1312_v61 = vpop.permute.xlu1 %1311 }
 0x63d   : > { %v1403_v7 = vsel %vm611_vm5, %v1314_v58, %v1322_v49  ;;  %v1315_v24 = vsel %vm3295_vm4, %v1310_v53, %v1312_v61  ;;  %v1316_v26 = vsel %vm3295_vm4, %v1312_v61, %v1314_v58  ;;  %vm3307_vm4 = vmmov %vm3304_vm13 }
 0x63e   : > { %1483 = vmatpush1.bf16.msra.mxu1 %v1403_v7  ;;  %v1399_v27 = vsel %vm611_vm5, %v1316_v26, %v1330_v56  ;;  %v1395_v0 = vsel %vm611_vm5, %v1315_v24, %v1329_v4 }
 0x63f   : > { %1441 = vmatprep.subr.bf16.mxu0 %v1399_v27  ;;  %1484 = vmatprep.subr.bf16.mxu1 %v2295_v17 }
 0x640   : > { %v1293_v35 = vpop.permute.xlu0 %1292  ;;  %1442 = vmatpush1.bf16.msra.mxu0 %v1395_v0  ;;  %v1295_v36 = vpop.permute.xlu1 %1294 }
 0x641   : > { %1443 = vmatprep.subr.bf16.mxu0 %v2761_v13  ;;  %v1303_v24 = vsel %vm553_vm10, %v1293_v35, %v1295_v36 }
 0x642   : > { %1485 = vmatpush1.bf16.msra.mxu1 %v2756_v12 }
 0x643   : > { %1486 = vmatprep.subr.bf16.mxu1 %v2295_v17 }
 0x644   : > { %v1283_v40 = vpop.permute.xlu0 %1282  ;;  %1444 = vmatpush1.bf16.msra.mxu0 %v2764_v14  ;;  %v1291_v47 = vpop.permute.xlu1 %1290 }
 0x645   : > { %v1288_v26 = vsel %vm543_vm9, %v1283_v40, %v1285_v52  ;;  %v1302_v27 = vsel %vm553_vm10, %v1291_v47, %v1293_v35 }
 0x648   : > { %v1301_v48 = vpop.permute.xlu0 %1300  ;;  %v1297_v49 = vpop.permute.xlu1 %1296 }
 0x649   : > { %1487 = vmatpush1.bf16.msra.mxu1 %v1301_v48 }
 0x64a   : > { %1488 = vmatprep.subr.bf16.mxu1 %v2295_v17 }
 0x64c   : > { %v1287_v50 = vpop.permute.xlu1 %1286  ;;  %v1272_v51 = vpop.permute.xlu0 %1271 }
 0x64d   : > { %v1391_v53 = vsel %vm611_vm5, %v1287_v50, %v1295_v36  ;;  %v1289_v56 = vsel %vm543_vm9, %v1285_v52, %v1287_v50 }
 0x64e   : > { %1489 = vmatpush1.bf16.msra.mxu1 %v1391_v53  ;;  %v1387_v0 = vsel %vm611_vm5, %v1289_v56, %v1303_v24 }
 0x64f   : > { %1490 = vmatprep.subr.bf16.mxu1 %v2295_v17 }
 0x650   : > { %v1270_v58 = vpop.permute.xlu0 %1269  ;;  %v1299_v61 = vpop.permute.xlu1 %1298 }
 0x651   : > { %v1304_v4 = vsel %vm553_vm10, %v1297_v49, %v1299_v61  ;;  %v1305_v7 = vsel %vm553_vm10, %v1299_v61, %v1301_v48  ;;  %v1383_v49 = vsel %vm611_vm5, %v1288_v26, %v1302_v27  ;;  %v1277_v56 = vsel %vm3306_vm15, %v1270_v58, %v1272_v51 }
 0x652   : > { %1445 = vmatprep.subr.bf16.mxu0 %v1305_v7  ;;  %1491 = vmatpush1.bf16.msra.mxu1 %v2782_v21 }
 0x653   : > { %1446 = vmatpush1.bf16.msra.mxu0 %v1304_v4  ;;  %1492 = vmatprep.subr.bf16.mxu1 %v2295_v17 }
 0x654   : > { %v1268_v50 = vpop.permute.xlu0 %1267  ;;  %1447 = vmatprep.subr.bf16.mxu0 %v1387_v0  ;;  %v1266_v53 = vpop.permute.xlu1 %1265 }
 0x655   : > { %v1276_v52 = vsel %vm3304_vm13, %v1266_v53, %v1268_v50  ;;  %v1379_v7 = vsel %vm611_vm5, %v2863_v34, %v1268_v50 }
 0x656   : > { %v1376_v4 = vsel %vm611_vm5, %v2852_v30, %v1276_v52 }
 0x657   : > { %1448 = vmatpush1.bf16.msra.mxu0 %v1383_v49 }
 0x658   : > { %v1364_v48 = vpop.permute.xlu0 %1363  ;;  %1449 = vmatprep.subr.bf16.mxu0 %v2790_v23  ;;  %v1264_v36 = vpop.permute.xlu1 %1263 }
 0x659   : > { %v1275_v61 = vsel %vm3307_vm4, %v1264_v36, %v1266_v53 }
 0x65a   : > { %v1372_v27 = vsel %vm611_vm5, %v2855_v32, %v1275_v61 }
 0x65b   : > { %1450 = vmatpush1.bf16.msra.mxu0 %v2785_v22 }
 0x65c   : > { %v1368_v35 = vpop.permute.xlu0 %1367  ;;  %v1274_v40 = vpop.permute.xlu1 %1273 }
 0x65d   : > { %1493 = vmatpush1.bf16.msra.mxu1 %v1274_v40  ;;  %v1278_v47 = vsel %vm3305_vm14, %v1272_v51, %v1274_v40  ;;  %v1439_v53 = vsel %vm611_vm5, %v1368_v35, 0 }
 0x65e   : > { %1451 = vmatprep.subr.bf16.mxu0 %v1278_v47  ;;  %1494 = vmatprep.subr.bf16.mxu1 %v2295_v17 }
 0x65f   : > { %1452 = vmatpush1.bf16.msra.mxu0 %v1277_v56 }
 0x660   : > { %v1339_v24 = vpop.permute.xlu0 %1338  ;;  %1453 = vmatprep.subr.bf16.mxu0 %v1376_v4  ;;  %v1366_v26 = vpop.permute.xlu1 %1365 }
 0x661   : > { %1495 = vmatpush1.bf16.msra.mxu1 %v1379_v7  ;;  %v1369_v0 = vsel %vm598_vm0, %v1364_v48, %v1366_v26  ;;  %v1370_v50 = vsel %vm598_vm0, %v1366_v26, %v1368_v35 }
 0x662   : > { %1496 = vmatprep.subr.bf16.mxu1 %v2295_v17  ;;  %v1433_v52 = vsel %vm611_vm5, %v1369_v0, 0 }
 0x663   : > { %1454 = vmatpush1.bf16.msra.mxu0 %v1372_v27 }
 0x664   : > { %v1347_v51 = vpop.permute.xlu0 %1346  ;;  %1455 = vmatprep.subr.bf16.mxu0 %v2656_v41  ;;  %v1353_v58 = vpop.permute.xlu1 %1352 }
 0x665   : > { %1497 = vmatpush1.bf16.msra.mxu1 %v2669_v46 }
 0x666   : > { %1502 = vmatprep.subr.bf16.mxu1 %v2295_v17 }
 0x667   : > { %1456 = vmatpush1.bf16.msra.mxu0 %v2647_v39 }
 0x668   : > { %2134 = vmatprep.subr.msk.bf16.mxu0 %vm611_vm5, %v1370_v50  ;;  %v1351_v49 = vpop.permute.xlu1 %1350  ;;  %v1355_v36 = vpop.permute.xlu0 %1354 }
 0x669   : > { %1503 = vmatpush2.bf16.msra.mxu1 %v1439_v53  ;;  %v1359_v35 = vsel %vm589_vm6, %v1353_v58, %v1355_v36  ;;  %v1358_v4 = vsel %vm589_vm6, %v1351_v49, %v1353_v58 }
 0x66a   : > { %1504 = vmatprep.subr.bf16.mxu1 %v2295_v17 }
 0x66b   : > { %1462 = vmatpush2.bf16.msra.mxu0 %v1433_v52 }
 0x66c   : > { %1463 = vmatprep.subr.bf16.mxu0 %v2818_v31  ;;  %v1341_v40 = vpop.permute.xlu1 %1340  ;;  %v1337_v48 = vpop.permute.xlu0 %1336 }
 0x66d   : > { %1505 = vmatpush2.bf16.msra.mxu1 %v2811_v29  ;;  %v1343_v56 = vsel %vm580_vm3, %v1339_v24, %v1341_v40  ;;  %v1342_v0 = vsel %vm580_vm3, %v1337_v48, %v1339_v24 }
 0x66e   : > { %1506 = vmatprep.subr.bf16.mxu1 %v2295_v17 }
 0x66f   : > { %1464 = vmatpush2.bf16.msra.mxu0 %v2824_v33 }
 0x670   : > { %1465 = vmatprep.subr.bf16.mxu0 %v1359_v35  ;;  %v1349_v47 = vpop.permute.xlu1 %1348  ;;  %v1326_v50 = vpop.permute.xlu0 %1325 }
 0x671   : > { %v1357_v61 = vsel %vm589_vm6, %v1347_v51, %v1349_v47  ;;  %1507 = vmatpush2.bf16.msra.mxu1 %v1355_v36  ;;  %v1415_v26 = vsel %vm611_vm5, %v1341_v40, %v1349_v47 }
 0x672   : > { %v1411_v7 = vsel %vm611_vm5, %v1343_v56, %v1357_v61  ;;  %1508 = vmatprep.subr.bf16.mxu1 %v2295_v17 }
 0x673   : > { %1466 = vmatpush2.bf16.msra.mxu0 %v1358_v4 }
 0x674   : > { %1467 = vmatprep.subr.bf16.mxu0 %v1411_v7  ;;  %v1345_v27 = vpop.permute.xlu1 %1344  ;;  %v1324_v49 = vpop.permute.xlu0 %1323 }
 0x675   : > { %v1356_v53 = vsel %vm589_vm6, %v1345_v27, %v1347_v51  ;;  %1509 = vmatpush2.bf16.msra.mxu1 %v1415_v26  ;;  %v2132_v51 = vcombine.low %v2935_v45, %v2935_v45  ;;  %v1331_v36 = vsel %vm571_vm2, %v1324_v49, %v1326_v50 }
 0x676   : > { %v1407_v52 = vsel %vm611_vm5, %v1342_v0, %v1356_v53  ;;  %1510 = vmatprep.subr.bf16.mxu1 %v2295_v17 }
 0x677   : > { %1468 = vmatpush2.bf16.msra.mxu0 %v1407_v52 }
 0x678   : > { %1469 = vmatprep.subr.bf16.mxu0 %v2735_v63  ;;  %v1328_v58 = vpop.permute.xlu1 %1327 }
 0x679   : > { %1511 = vmatpush2.bf16.msra.mxu1 %v2730_v62  ;;  %v1332_v24 = vsel %vm571_vm2, %v1326_v50, %v1328_v58 }
 0x67a   : > { %1512 = vmatprep.subr.bf16.mxu1 %v2295_v17 }
 0x67b   : > { %1470 = vmatpush2.bf16.msra.mxu0 %v2739_v2 }
 0x67c   : > { %1471 = vmatprep.subr.bf16.mxu0 %v1332_v24 }
 0x67d   : > { %1513 = vmatpush2.bf16.msra.mxu1 %v1328_v58 }
 0x67f   : > { %1472 = vmatpush2.bf16.msra.mxu0 %v1331_v36 }
 0x680   : > { %1515 = vmatmul.mubr.bf16.vlgmr.msra.gmra.mxu1 %v2132_v51 }
 0x681   : > { %1746 = vmatprep.mubr.bf16.mxu1 %v2295_v17 }
 0x682   : > { %1474 = vmatmul.mubr.bf16.vlgmr.msra.gmra.mxu0 %v2132_v51 }
 0x685   : > { %v1420_v40 = vpop.permute.xlu1 %1419 }
 0x740   : > { %v1516_v48 = vpop.f32.mrf.mxu1 }
 0x741   : > { %v1517_v35 = vadd.f32 %v1516_v48, %v1420_v40 }
 0x742   : > { %v1475_v47 = vpop.f32.mrf.mxu0  ;;  %v1518_v56 = vpop.f32.mrf.mxu1 }
 0x743   : > { %v1524_v61 = vmax.f32 %v1517_v35, 0.0  ;;  %v1476_v4 = vadd.f32 %v1475_v47, %v1420_v40 }
 0x744   : > { %v1477_v7 = vpop.f32.mrf.mxu0  ;;  %v1519_v26 = vpop.f32.mrf.mxu1 }
 0x745   : > { %v1527_v45 = vsel %vm2531_vm1, %v1524_v61, 0.0  ;;  %v1478_v27 = vadd.f32 %v1477_v7, %v1420_v40  ;;  %v1522_v52 = vmax.f32 %v1476_v4, 0.0 }
 0x746   : > { %v1530_v0 = vpack.c.bf16 %v1527_v45, %v1527_v45  ;;  %v1479_v50 = vpop.f32.mrf.mxu0  ;;  %v1520_v53 = vpop.f32.mrf.mxu1 }
 0x747   : > { %v1523_v58 = vmax.f32 %v1478_v27, 0.0  ;;  %v1525_v36 = vsel %vm2517_vm12, %v1522_v52, 0.0 }
 0x748   : > { %v1480_v49 = vpop.f32.mrf.mxu0  ;;  %1538 = vrot.lane.b32.xlu1 %v1530_v0, %s2300_s28  ;;  %v1528_v48 = vpack.c.bf16 %v1525_v36, %v1525_v36 }
 0x749   : > { %v1526_v24 = vsel %vm2521_vm8, %v1523_v58, 0.0 }
 0x74a   : > { %v1529_v51 = vpack.c.bf16 %v1526_v24, %v1526_v24 }
 0x74c   : > { %1536 = vrot.lane.b32.xlu0 %v1529_v51, %s2300_s28 }
 0x750   : > { %1534 = vrot.lane.b32.xlu0 %v1528_v48, %s2300_s28 }
 0x7ba   : > { %v1539_v40 = vpop.permute.xlu1 %1538 }
 0x7be   : > { %v1537_v35 = vpop.permute.xlu0 %1536 }
 0x7bf   : > { %v1541_v47 = vsel %vm772_vm7, %v1537_v35, %v1539_v40 }
 0x7c0   : > { %v1545_v56 = vsel %vm779_vm11, %v1541_v47, 0 }
 0x7c1   : > { %v1550_v61 = vrot.slane %v1545_v56, 4 }
 0x7c2   : > { %v1535_v4 = vpop.permute.xlu0 %1534 }
 0x7c3   : > { %v3038_v7 = vsel %vm611_vm5, %v2863_v34, %v1550_v61  ;;  %v1540_v26 = vsel %vm772_vm7, %v1535_v4, %v1537_v35  ;;  %v1543_v45 = vsel %vm772_vm7, 0, %v1535_v4 }
 0x7c4   : > { %v1549_v27 = vrot.slane %v1540_v26, 4  ;;  %1592 = vrot.lane.b32.xlu0 %v3038_v7, %s2297_s21  ;;  %v1548_v0 = vrot.slane %v1543_v45, 4 }
 0x7c6   : > { %v3046_v50 = vsel %vm611_vm5, %v2852_v30, %v1549_v27  ;;  %v3054_v34 = vsel %vm611_vm5, %v2855_v32, %v1548_v0  ;;  %v3101_v30 = vld [vmem:[%s3286_s9] sm:$0xff] }
 0x7c7   : > { %1590 = vrot.lane.b32.xlu1 %v3046_v50, %s2297_s21  ;;  %v1562_v32 = vld [vmem:[%s3287_s10] sm:$0xff]  ;;  %v2138_v53 = vcombine.high %v3101_v30, %v3101_v30 }
 0x7c8   : > { %1579 = vrot.lane.b32.xlu0 %v3046_v50, %s2296_s20 }
 0x7c9   : > { %1705 = vmatprep.mubr.bf16.mxu0 %v2138_v53 }
 0x7cb   : > { %1588 = vrot.lane.b32.xlu1 %v3054_v34, %s2297_s21 }
 0x7cc   : > { %1577 = vrot.lane.b32.xlu0 %v3054_v34, %s2296_s20 }
 0x7cf   : > { %1581 = vrot.lane.b32.xlu1 %v3038_v7, %s2296_s20 }
 0x7d0   : > { %1570 = vrot.lane.b32.xlu0 %v3038_v7, %s2294_s19 }
 0x7d3   : > { %1568 = vrot.lane.b32.xlu1 %v3046_v50, %s2294_s19 }
 0x7d4   : > { %1645 = vrot.lane.b32.xlu0 %v3046_v50, %s2290_s15 }
 0x7d7   : > { %1566 = vrot.lane.b32.xlu1 %v3054_v34, %s2294_s19 }
 0x7d8   : > { %1643 = vrot.lane.b32.xlu0 %v3054_v34, %s2290_s15 }
 0x7db   : > { %1647 = vrot.lane.b32.xlu1 %v3038_v7, %s2290_s15 }
 0x7dc   : > { %1634 = vrot.lane.b32.xlu0 %v3046_v50, %s2293_s18 }
 0x7df   : > { %1636 = vrot.lane.b32.xlu1 %v3038_v7, %s2293_s18 }
 0x7e0   : > { %1625 = vrot.lane.b32.xlu0 %v3038_v7, %s2292_s17 }
 0x7e3   : > { %1632 = vrot.lane.b32.xlu1 %v3054_v34, %s2293_s18 }
 0x7e4   : > { %1621 = vrot.lane.b32.xlu0 %v3054_v34, %s2292_s17 }
 0x7e7   : > { %1623 = vrot.lane.b32.xlu1 %v3046_v50, %s2292_s17  ;;  %s440_s17 = scalar_lea.vmem %s3290_s13, %s2240_s24 }
 0x7e8   : > { %1612 = vrot.lane.b32.xlu0 %v3046_v50, %s2291_s16 }
 0x7eb   : > { %1614 = vrot.lane.b32.xlu1 %v3038_v7, %s2291_s16 }
 0x7ec   : > { %1603 = vrot.lane.b32.xlu0 %v3038_v7, %s2289_s14 }
 0x7ef   : > { %1610 = vrot.lane.b32.xlu1 %v3054_v34, %s2291_s16 }
 0x7f0   : > { %1599 = vrot.lane.b32.xlu0 %v3054_v34, %s2289_s14 }
 0x7f3   : > { %1601 = vrot.lane.b32.xlu1 %v3046_v50, %s2289_s14 }
 0x7f7   : > { %1656 = vperm.xlu1 %2269, %v1562_v32  }
 0x836   : > { %v1593_v52 = vpop.permute.xlu0 %1592 }
 0x839   : > { %v1591_v58 = vpop.permute.xlu1 %1590 }
 0x83a   : > { %v1580_v49 = vpop.permute.xlu0 %1579  ;;  %v1595_v24 = vsel %vm553_vm10, %v1591_v58, %v1593_v52 }
 0x83b   : > { %1673 = vmatprep.subr.bf16.mxu0 %v1595_v24 }
 0x83d   : > { %v1589_v51 = vpop.permute.xlu1 %1588 }
 0x83e   : > { %v1594_v36 = vsel %vm553_vm10, %v1589_v51, %v1591_v58  ;;  %v1578_v48 = vpop.permute.xlu0 %1577  ;;  %vm3308_vm10 = vmmov %vm3307_vm4 }
 0x83f   : > { %1674 = vmatpush1.bf16.msra.mxu0 %v1594_v36  ;;  %v1583_v61 = vsel %vm543_vm9, %v1578_v48, %v1580_v49 }
 0x840   : > { %1675 = vmatprep.subr.bf16.mxu0 %v2777_v19 }
 0x841   : > { %v1582_v40 = vpop.permute.xlu1 %1581 }
 0x842   : > { %v1571_v35 = vpop.permute.xlu0 %1570  ;;  %v1584_v47 = vsel %vm543_vm9, %v1580_v49, %v1582_v40 }
 0x843   : > { %1676 = vmatpush1.bf16.msra.mxu0 %v2772_v18 }
 0x844   : > { %1677 = vmatprep.subr.bf16.mxu0 %v1584_v47 }
 0x845   : > { %v1569_v56 = vpop.permute.xlu1 %1568 }
 0x846   : > { %v1646_v4 = vpop.permute.xlu0 %1645  ;;  %v1573_v45 = vsel %vm3307_vm4, %v1569_v56, %v1571_v35 }
 0x847   : > { %1678 = vmatpush1.bf16.msra.mxu0 %v1583_v61 }
 0x848   : > { %1679 = vmatprep.subr.bf16.mxu0 %v2790_v23  ;;  %v3129_v23 = vld [vmem:[%s3286_s9 + $0x8] ss:$0 sps:$4 sm:$0xff]  }
 0x849   : > { %v1567_v26 = vpop.permute.xlu1 %1566 }
 0x84a   : > { %v1644_v19 = vpop.permute.xlu0 %1643  ;;  %v1572_v0 = vsel %vm3308_vm10, %v1567_v26, %v1569_v56  ;;  %vm3318_vm10 = vcmask 588800  }
 0x84b   : > { %1680 = vmatpush1.bf16.msra.mxu0 %v2785_v22  ;;  %v1649_v32 = vsel %vm598_vm0, %v1644_v19, %v1646_v4 }
 0x84c   : > { %1681 = vmatprep.subr.bf16.mxu0 %v1573_v45 }
 0x84d   : > { %v3117_v27 = vpop.permute.xlu1 %1647 }
 0x84e   : > { %v1650_v18 = vsel %vm598_vm0, %v1646_v4, %v3117_v27  ;;  %v1635_v58 = vpop.permute.xlu0 %1634  ;;  %vm1669_vm0 = vcmask 261120  }
 0x84f   : > { %1682 = vmatpush1.bf16.msra.mxu0 %v1572_v0  ;;  %1726 = vmatprep.subr.bf16.mxu1 %v1650_v18 }
 0x850   : > { %1683 = vmatprep.subr.bf16.mxu0 %v2800_v25  ;;  %1727 = vmatpush1.bf16.msra.mxu1 %v1649_v32 }
 0x851   : > { %1728 = vmatprep.subr.bf16.mxu1 %v2818_v31  ;;  %v1637_v22 = vpop.permute.xlu1 %1636 }
 0x852   : > { %v1639_v31 = vsel %vm589_vm6, %v1635_v58, %v1637_v22 }
 0x853   : > { %1684 = vmatpush1.bf16.msra.mxu0 %v2805_v28  ;;  %v1626_v28 = vpop.permute.xlu0 %1625 }
 0x854   : > { %1685 = vmatprep.subr.bf16.mxu0 %v3046_v50  ;;  %1729 = vmatpush1.bf16.msra.mxu1 %v2824_v33 }
 0x855   : > { %2162 = vmatprep.subr.bf16.mxu1 %v1637_v22  ;;  %v1633_v25 = vpop.permute.xlu1 %1632 }
 0x856   : > { %v1638_v33 = vsel %vm589_vm6, %v1633_v25, %v1635_v58  ;;  %vm3311_vm6 = vmmov 0  }
 0x857   : > { %1686 = vmatpush1.bf16.msra.mxu0 %v3054_v34  ;;  %2140 = vmatmul.mubr.msk.bf16.vlgmr.msra.gmra.mxu1 %vm1669_vm0, %v3129_v23  ;;  %v1622_v34 = vpop.permute.xlu0 %1621 }
 0x858   : > { %1687 = vmatprep.subr.bf16.mxu0 %v2656_v41  ;;  %2163 = vmatpush3.bf16.msra.mxu1 %v1593_v52 }
 0x859   : > { %2164 = vmatprep.subr.bf16.mxu1 %v2717_v57  ;;  %1787 = vmatprep.mubr.bf16.mxu1 %v2138_v53  ;;  %v1624_v50 = vpop.permute.xlu1 %1623 }
 0x85a   : > { %v1627_v57 = vsel %vm580_vm3, %v1622_v34, %v1624_v50 }
 0x85b   : > { %1688 = vmatpush1.bf16.msra.mxu0 %v2647_v39  ;;  %v1628_v39 = vsel %vm580_vm3, %v1624_v50, %v1626_v28  ;;  %vm3309_vm3 = vcmask 891904  }
 0x85c   : > { %1689 = vmatprep.subr.bf16.mxu0 %v1639_v31  ;;  %2165 = vmatpush3.bf16.msra.mxu1 %v2769_v15  ;;  %v1613_v15 = vpop.permute.xlu0 %1612 }
 0x85d   : > { %2166 = vmatprep.subr.bf16.mxu1 %v1626_v28  ;;  %v1615_v41 = vpop.permute.xlu1 %1614 }
 0x85f   : > { %1690 = vmatpush2.bf16.msra.mxu0 %v1638_v33 }
 0x860   : > { %1691 = vmatprep.subr.bf16.mxu0 %v2722_v59  ;;  %2167 = vmatpush3.bf16.msra.mxu1 %v1582_v40 }
 0x861   : > { %2168 = vmatprep.subr.bf16.mxu1 %v2730_v62  ;;  %v1611_v59 = vpop.permute.xlu1 %1610  ;;  %v3152_v62 = vpop.permute.xlu0 %1603 }
 0x863   : > { %1692 = vmatpush2.bf16.msra.mxu0 %v2726_v60  ;;  %v1617_v60 = vsel %vm571_vm2, %v1613_v15, %v1615_v41 }
 0x864   : > { %1693 = vmatprep.subr.bf16.mxu0 %v1628_v39  ;;  %2169 = vmatpush3.bf16.msra.mxu1 %v2782_v21  ;;  %v1616_v21 = vsel %vm571_vm2, %v1611_v59, %v1613_v15  ;;  %vm3310_vm2 = vmmov %vm3309_vm3 }
 0x865   : > { %2170 = vmatprep.subr.bf16.mxu1 %v1615_v41  ;;  %v1602_v53 = vpop.permute.xlu1 %1601  ;;  %vm3312_vm9 = vmmov %vm3310_vm2 }
 0x866   : > { %vm3313_vm15 = vmmov %vm3310_vm2 }
 0x867   : > { %1694 = vmatpush2.bf16.msra.mxu0 %v1627_v57  ;;  %vm3315_vm13 = vmmov %vm3310_vm2 }
 0x868   : > { %1695 = vmatprep.subr.bf16.mxu0 %v2735_v63  ;;  %2171 = vmatpush3.bf16.msra.mxu1 %v1571_v35  ;;  %v3163_v63 = vsel %vm3309_vm3, %v1602_v53, %v3152_v62  ;;  %vm3316_vm14 = vmmov %vm3310_vm2 }
 0x869   : > { %2172 = vmatprep.subr.bf16.mxu1 %v2743_v3  ;;  %v1600_v3 = vpop.permute.xlu0 %1599  ;;  %vm3317_vm4 = vmmov %vm3310_vm2 }
 0x86b   : > { %1696 = vmatpush2.bf16.msra.mxu0 %v2739_v2  ;;  %v2137_v2 = vcombine.low %v3101_v30, %v3101_v30 }
 0x86c   : > { %1697 = vmatprep.subr.bf16.mxu0 %v1617_v60  ;;  %2173 = vmatpush3.bf16.msra.mxu1 %v2795_v9  ;;  %v1862_v60 = vsel %vm611_vm5, %v2553_v5, %v2831_v54  ;;  %v1868_v5 = vld [vmem:[%s3289_s12 + $0x8] sm:$0xff] }
 0x86d   : > { %2174 = vmatprep.subr.bf16.mxu1 %v3152_v62 }
 0x86f   : > { %1698 = vmatpush2.bf16.msra.mxu0 %v1616_v21  ;;  %v1864_v21 = vsel %vm611_vm5, %v2560_v8, %v2842_v16 }
 0x870   : > { %1699 = vmatprep.subr.bf16.mxu0 %v2748_v6  ;;  %2175 = vmatpush3.bf16.msra.mxu1 %v3038_v7  ;;  %v3171_v6 = vsel %vm3310_vm2, %v1600_v3, %v1602_v53 }
 0x871   : > { %2176 = vmatprep.subr.bf16.mxu1 %v2756_v12 }
 0x873   : > { %1700 = vmatpush2.bf16.msra.mxu0 %v2752_v10 }
 0x874   : > { %1701 = vmatprep.subr.bf16.mxu0 %v3163_v63  ;;  %2177 = vmatpush3.bf16.msra.mxu1 %v2669_v46 }
 0x875   : > { %2217 = vmatprep.subr.bf16.mxu1 %v2298_v11 }
 0x877   : > { %1702 = vmatpush2.bf16.msra.mxu0 %v3171_v6  ;;  %1788 = vmatmul.mubr.bf16.vlgmr.msra.gmra.mxu1 %v2137_v2 }
 0x878   : > { %1703 = vmatprep.subr.bf16.mxu0 %v2761_v13  ;;  %2218 = vmatpush3.bf16.msra.mxu1 %v3117_v27 }
 0x879   : > { %2219 = vmatprep.subr.bf16.mxu1 %v2298_v11  ;;  %2221 = vmatprep.mubr.msk.bf16.mxu1 %vm3311_vm6, %v2298_v11 }
 0x87b   : > { %1704 = vmatpush2.bf16.msra.mxu0 %v2764_v14 }
 0x87c   : > { %2220 = vmatpush3.bf16.msra.mxu1 %v2811_v29  ;;  %2225 = vmatprep.subr.bf16.mxu0 %v2298_v11  ;;  %v1657_v29 = vpop.permute.xlu1 %1656 }
 0x87e   : > { %1706 = vmatmul.mubr.bf16.vlgmr.msra.gmra.mxu0 %v2137_v2 }
 0x87f   : > { %2222 = vmatmul.mubr.msk.bf16.vlgmr.msra.gmra.mxu1 %vm1669_vm0, %v3129_v23  ;;  %2235 = vmatprep.mubr.msk.bf16.mxu0 %vm3311_vm6, %v2298_v11  ;;  %vm3319_vm0 = vmmov %vm3318_vm10 }
 0x880   : > { %1963 = vmatprep.mubr.bf16.mxu1 %v2295_v17 }
 0x917   : > { %v1748_v46 = vpop.f32.mrf.mxu1 }
 0x919   : > { %v1750_v10 = vpop.f32.mrf.mxu1 }
 0x91b   : > { %v1752_v9 = vpop.f32.mrf.mxu1 }
 0x91d   : > { %v1753_v7 = vpop.f32.mrf.mxu1 }
 0x937   : > { %v2178_v30 = vpop.f32.mrf.mxu1 }
 0x939   : > { %v2179_v52 = vpop.f32.mrf.mxu1 }
 0x93a   : > { %v2180_v49 = vadd.f32 %v2179_v52, %v2178_v30 }
 0x93b   : > { %v2181_v24 = vpop.f32.mrf.mxu1 }
 0x93c   : > { %v1790_v48 = vadd.f32 %v2180_v49, %v1657_v29 }
 0x93d   : > { %v2182_v51 = vpop.f32.mrf.mxu1 }
 0x93e   : > { %v1707_v36 = vpop.f32.mrf.mxu0 }
 0x93f   : > { %v1708_v40 = vadd.f32 %v1707_v36, %v1657_v29  ;;  %v1829_v35 = vpop.f32.mrf.mxu1 }
 0x940   : > { %v1830_v47 = vadd.f32 %v1829_v35, %v1790_v48  ;;  %v1709_v56 = vpop.f32.mrf.mxu0 }
 0x941   : > { %v1749_v61 = vadd.f32 %v1748_v46, %v1708_v40  ;;  %v1710_v4 = vadd.f32 %v1709_v56, %v1657_v29  ;;  %v2223_v26 = vpop.f32.mrf.mxu1 }
 0x942   : > { %v1837_v17 = vmax.f32 %v1830_v47, 0.0  ;;  %v1711_v45 = vpop.f32.mrf.mxu0 }
 0x943   : > { %v1751_v19 = vadd.f32 %v1750_v10, %v1710_v4  ;;  %v1832_v27 = vpop.f32.mrf.mxu1  ;;  %v1835_v32 = vmax.f32 %v1749_v61, 0.0 }
 0x944   : > { %v1840_v0 = vsel %vm2531_vm1, %v1837_v17, 0.0  ;;  %v1712_v18 = vpop.f32.mrf.mxu0 }
 0x945   : > { %v1843_v22 = vpack.c.bf16 %v1840_v0, %v1840_v0  ;;  %v1836_v23 = vmax.f32 %v1751_v19, 0.0  ;;  %v2224_v58 = vpop.f32.mrf.mxu1  ;;  %v1838_v31 = vsel %vm2517_vm12, %v1835_v32, 0.0 }
 0x946   : > { %v1841_v33 = vpack.c.bf16 %v1838_v31, %v1838_v31 }
 0x947   : > { %v1839_v25 = vsel %vm2521_vm8, %v1836_v23, 0.0  ;;  %1851 = vrot.lane.b32.xlu1 %v1843_v22, %s2300_s28 }
 0x948   : > { %v1842_v28 = vpack.c.bf16 %v1839_v25, %v1839_v25 }
 0x94a   : > { %1849 = vrot.lane.b32.xlu0 %v1842_v28, %s2300_s28 }
 0x94e   : > { %1847 = vrot.lane.b32.xlu0 %v1841_v33, %s2300_s28 }
 0x9b9   : > { %v1852_v39 = vpop.permute.xlu1 %1851 }
 0x9bc   : > { %v1850_v50 = vpop.permute.xlu0 %1849 }
 0x9bd   : > { %v1854_v15 = vsel %vm772_vm7, %v1850_v50, %v1852_v39 }
 0x9be   : > { %v1858_v59 = vsel %vm779_vm11, %v1854_v15, 0 }
 0x9c0   : > { %v1848_v34 = vpop.permute.xlu0 %1847 }
 0x9c1   : > { %v1853_v41 = vsel %vm772_vm7, %v1848_v34, %v1850_v50  ;;  %v1856_v57 = vsel %vm772_vm7, 0, %v1848_v34 }
 0x9c2   : > { %1901 = vrot.lane.b32.xlu1 %v1856_v57, %s2289_s14  ;;  %1903 = vrot.lane.b32.xlu0 %v1853_v41, %s2289_s14 }
 0x9c6   : > { %1905 = vrot.lane.b32.xlu1 %v1858_v59, %s2289_s14  ;;  %1897 = vrot.lane.b32.xlu0 %v2894_v43, %s2289_s14  ;;  %v1867_v43 = vld [vmem:[%s3289_s12] sm:$0xff] }
 0x9ca   : > { %1899 = vrot.lane.b32.xlu1 %v2881_v37, %s2289_s14  ;;  %1895 = vrot.lane.b32.xlu0 %v2885_v38, %s2289_s14  ;;  %v1860_v37 = vsel %vm611_vm5, %v2539_v1, %v2847_v20 }
 0x9ce   : > { %1891 = vrot.lane.b32.xlu1 %v1862_v60, %s2289_s14  ;;  %1893 = vrot.lane.b32.xlu0 %v1864_v21, %s2289_s14 }
 0x9d2   : > { %1889 = vrot.lane.b32.xlu1 %v1860_v37, %s2289_s14  ;;  %1871 = vperm.xlu0 %2268, %v1867_v43  }
 0x9d6   : > { %1876 = vperm.xlu1 %2269, %v1868_v5  }
 0xa34   : > { %v1902_v8 = vpop.permute.xlu1 %1901  ;;  %v1904_v54 = vpop.permute.xlu0 %1903 }
 0xa35   : > { %v1911_v16 = vsel %vm3312_vm9, %v1902_v8, %v1904_v54 }
 0xa36   : > { %v1923_v1 = vsel %vm611_vm5, %v1911_v16, 0 }
 0xa38   : > { %v1906_v38 = vpop.permute.xlu1 %1905  ;;  %v1898_v53 = vpop.permute.xlu0 %1897 }
 0xa39   : > { %v1912_v2 = vsel %vm3313_vm15, %v1904_v54, %v1906_v38  ;;  %v1929_v3 = vsel %vm611_vm5, %v1906_v38, 0 }
 0xa3a   : > { %2143 = vmatprep.subr.msk.bf16.mxu1 %vm611_vm5, %v1912_v2  ;;  %2226 = vmatpush3.bf16.msra.mxu0 %v1929_v3  ;;  %vm3314_vm5 = vmmov %vm3310_vm2 }
 0xa3b   : > { %1938 = vmatpush1.bf16.msra.mxu1 %v1923_v1  ;;  %2227 = vmatprep.subr.bf16.mxu0 %v2298_v11 }
 0xa3c   : > { %v1900_v20 = vpop.permute.xlu1 %1899  ;;  %1939 = vmatprep.subr.bf16.mxu1 %v3163_v63  ;;  %v1896_v46 = vpop.permute.xlu0 %1895 }
 0xa3d   : > { %v1910_v9 = vsel %vm3314_vm5, %v1898_v53, %v1900_v20  ;;  %v1909_v63 = vsel %vm3315_vm13, %v1896_v46, %v1898_v53 }
 0xa3e   : > { %2228 = vmatpush3.bf16.msra.mxu0 %v3152_v62 }
 0xa3f   : > { %1940 = vmatpush1.bf16.msra.mxu1 %v3171_v6  ;;  %2229 = vmatprep.subr.bf16.mxu0 %v2298_v11 }
 0xa40   : > { %1941 = vmatprep.subr.bf16.mxu1 %v2761_v13  ;;  %v1892_v10 = vpop.permute.xlu1 %1891  ;;  %v1894_v7 = vpop.permute.xlu0 %1893 }
 0xa41   : > { %v1908_v6 = vsel %vm3316_vm14, %v1892_v10, %v1894_v7 }
 0xa42   : > { %2230 = vmatpush3.bf16.msra.mxu0 %v2756_v12  ;;  %v2279_v12 = vld [vmem:[%s3288_s11] sm:$0xff]  }
 0xa43   : > { %1942 = vmatpush1.bf16.msra.mxu1 %v2764_v14  ;;  %2231 = vmatprep.subr.bf16.mxu0 %v2298_v11 }
 0xa44   : > { %1943 = vmatprep.subr.bf16.mxu1 %v1910_v9  ;;  %v1890_v62 = vpop.permute.xlu1 %1889 }
 0xa45   : > { %v1907_v13 = vsel %vm3317_vm4, %v1890_v62, %v1892_v10 }
 0xa46   : > { %2232 = vmatpush3.bf16.msra.mxu0 %v1900_v20 }
 0xa47   : > { %1944 = vmatpush1.bf16.msra.mxu1 %v1909_v63  ;;  %2233 = vmatprep.subr.bf16.mxu0 %v2298_v11 }
 0xa48   : > { %1945 = vmatprep.subr.bf16.mxu1 %v1908_v6 }
 0xa4a   : > { %2234 = vmatpush3.bf16.msra.mxu0 %v1894_v7 }
 0xa4b   : > { %1946 = vmatpush1.bf16.msra.mxu1 %v1907_v13 }
 0xa4d   : > { %2236 = vmatmul.mubr.msk.bf16.vlgmr.msra.gmra.mxu0 %vm3318_vm10, %v2279_v12  ;;  %v1872_v52 = vpop.permute.xlu0 %1871 }
 0xa4e   : > { %2144 = vmatmul.mubr.msk.bf16.vlgmr.msra.gmra.mxu1 %vm3319_vm0, %v2279_v12 }
 0xa51   : > { %v1877_v11 = vpop.permute.xlu1 %1876 }
 0xb0d   : > { %v2008_v14 = vpop.f32.mrf.mxu0 }
 0xb0e   : > { %v1965_v30 = vpop.f32.mrf.mxu1  ;;  %v2009_v24 = vadd.f32 %v2008_v14, %v1872_v52 }
 0xb0f   : > { %v2237_v49 = vpop.f32.mrf.mxu0  ;;  %v1966_v45 = vadd.f32 %v1965_v30, %v1872_v52 }
 0xb10   : > { %v1967_v29 = vpop.f32.mrf.mxu1  ;;  %v2017_v47 = vsel %vm2531_vm1, %v2009_v24, 0.0 }
 0xb11   : > { %v2011_v51 = vpop.f32.mrf.mxu0  ;;  %v1968_v40 = vadd.f32 %v1967_v29, %v1872_v52  ;;  %v2015_v55 = vsel %vm2517_vm12, %v1966_v45, 0.0 }
 0xb12   : > { %v2012_v36 = vadd.f32 %v2011_v51, %v1877_v11  ;;  %v1969_v48 = vpop.f32.mrf.mxu1 }
 0xb13   : > { %v2238_v35 = vpop.f32.mrf.mxu0  ;;  %v1970_v26 = vadd.f32 %v1969_v48, %v1877_v11  ;;  %v2016_v19 = vsel %vm2521_vm8, %v1968_v40, 0.0 }
 0xb14   : > { %v2020_v56 = vsel %vm2531_vm1, %v2012_v36, 0.0  ;;  %v1971_v61 = vpop.f32.mrf.mxu1 }
 0xb15   : > { %v2023_v4 = vpack.c.bf16 %v2020_v56, %v2017_v47  ;;  %v1972_v17 = vadd.f32 %v1971_v61, %v1877_v11  ;;  %v2018_v18 = vsel %vm2517_vm12, %v1970_v26, 0.0 }
 0xb16   : > { %v2021_v32 = vpack.c.bf16 %v2018_v18, %v2015_v55 }
 0xb17   : > { %v2019_v27 = vsel %vm2521_vm8, %v1972_v17, 0.0  ;;  %2031 = vrot.lane.b32.xlu1 %v2023_v4, %s2300_s28  ;;  %vm2056_vm8 = vcmask 551936  }
 0xb18   : > { %v2022_v0 = vpack.c.bf16 %v2019_v27, %v2016_v19 }
 0xb1a   : > { %2029 = vrot.lane.b32.xlu0 %v2022_v0, %s2300_s28 }
 0xb1e   : > { %2027 = vrot.lane.b32.xlu0 %v2021_v32, %s2300_s28 }
 0xb89   : > { %v2032_v22 = vpop.permute.xlu1 %2031 }
 0xb8c   : > { %v2030_v23 = vpop.permute.xlu0 %2029 }
 0xb8d   : > { %v2034_v44 = vsel %vm772_vm7, %v2030_v23, %v2032_v22 }
 0xb8e   : > { %v2038_v58 = vsel %vm779_vm11, %v2034_v44, 0 }
 0xb8f   : > { %v2147_v25 = vcombine.low %v2038_v58, %v2038_v58  ;;  %v2149_v28 = vcombine.high %v2038_v58, %v2038_v58 }
 0xb90   : > { %v2028_v31 = vpop.permute.xlu0 %2027 }
 0xb91   : > { %2057 = vst.msk [vmem:[%s440_s17 + $0x8] sm:$0xf] %vm2056_vm8, %v2147_v25  ;;  %2059 = vst.msk [vmem:[%s440_s17 + $0x14] sm:$0xf] %vm2056_vm8, %v2149_v28  ;;  %v2033_v42 = vsel %vm772_vm7, %v2028_v31, %v2030_v23  ;;  %v2036_v33 = vsel %vm772_vm7, 0, %v2028_v31 }
 0xb92   : > { %v2146_v50 = vcombine.low %v2036_v33, %v2033_v42  ;;  %v2148_v34 = vcombine.high %v2036_v33, %v2033_v42 }
 0xb94   : > { %2055 = vst [vmem:[%s440_s17] sm:$0xff] %v2146_v50  ;;  %2058 = vst [vmem:[%s440_s17 + $0xc] sm:$0xff] %v2148_v34 }
 0xb95 PF: > { %s23_s25 = sadd.s32 1, %s2286_s25  }
 0xb96   : > { %p20_p4 = scmp.ge.s32.totalorder %s23_s25, 4  }
 0xb98   :  { %22 = sbr.rel (!%p20_p4) target bundleno = 1 (0x1), region = 102 }

// kernel: srdensenet_forward.5
= control target key start
LH: loop header
LB: loop body
LE: loop exit
PB: predicated region body
PF: predicated region fallthrough
CT: control target
= control target key end

     0   :  { %s1180_s12 = smov 0   ;;  %s1663_s0 = inlined_call_operand.vmem [shape: bf16[2,16,1156], index: 0, kind: input, shape index: {}]   ;;  %s1664_s1 = inlined_call_operand.vmem [shape: bf16[4,144], index: 1, kind: input, shape index: {}]   ;;  %s1665_s2 = inlined_call_operand.vmem [shape: f32[4,1], index: 2, kind: input, shape index: {}]   ;;  %s1666_s3 = inlined_call_operand.vmem [shape: f32[2,4,1156], index: 3, kind: output, shape index: {}]  }
   0x1 LB: > { %s1060_s13 = sadd.s32 4294967295, %s1147_s12   ;;  %p1064_p0 = scmp.ge.s32.totalorder %s1147_s12, 1  ;;  %s1147_s12 = sphi %s1180_s12, %s13_s12  }
   0x2   : > { %p137_p1 = scmp.lt.s32.totalorder %s1147_s12, 3 }
   0x4   : > { %p138_p2 = pnand %p1064_p0, %p137_p1 }
   0x5   : > { %p161_p3 = scmp.lt.s32.totalorder (!%p138_p2), %s1060_s13, 1  ;;  %s1149_s18 = smov (!%p138_p2), 59  }
   0x6   : > { %141 = sbr.rel (%p138_p2) target bundleno = 606 (0x25e), region = 32  ;;  %s1150_s19 = smov (!%p138_p2), 60  }
   0x7   : > { %s1151_s20 = smov (!%p138_p2), 92   ;;  %s1152_s21 = smov (!%p138_p2), 93  }
   0x8   : > { %s1153_s22 = smov (!%p138_p2), 94   ;;  %s1154_s23 = smov (!%p138_p2), 126  }
   0x9   : > { %s1155_s24 = smov (!%p138_p2), 127   ;;  %s1156_s27 = smov (!%p138_p2), 58  }
   0xa   : > { %s1158_s30 = smov (!%p138_p2), 35  }
   0xb   : > { %s1674_s13 = smov (!%p161_p3, %s1060_s13), 1  ;;  %v1248_v3 = vld.sshfl [vmem:[%s1664_s1] sm:$0x33 pattern:$0x76325410]  ;;  %vm708_vm0 = vcmask 130048  }
   0xc   : > { %s1085_s14 = smul.u32 80, %s1674_s13  ;;  %v1252_v4 = vcombine.high %v1248_v3, %v1248_v3  ;;  %v1157_v9 = vmov 0   ;;  %vm635_vm1 = vcmask 482304   ;;  %vm596_vm2 = vcmask 490496   ;;  %v346_v40 = vld [vmem:[%s1665_s2] sm:$0xf] }
   0xd   : > { %1124 = vset.pattern.permute.xlu1 %v1157_v9  ;;  %1125 = vset.pattern.permute.xlu0 %v1157_v9  ;;  %vm555_vm3 = vcmask 752640   ;;  %vm519_vm4 = vcmask 760832   ;;  %vm483_vm5 = vcmask 769024   ;;  %vm447_vm6 = vcmask 1031168   ;;  %s1086_s4 = smul.u32 40, %s1674_s13 }
   0xe   : > { %s1194_s17 = scalar_lea.vmem %s1663_s0, %s1085_s14  ;;  %1078 = vmatprep.mubr.msk.bf16.mxu0 %vm708_vm0, %v1252_v4  ;;  %1079 = vmatprep.mubr.msk.bf16.mxu1 %vm708_vm0, %v1252_v4  ;;  %vm411_vm7 = vcmask 1039360   ;;  %vm674_vm8 = vcmask 474112  }
   0xf   : > { %v1197_v0 = vld [vmem:[%s1194_s17 + $0x4] ss:$40 sps:$4 sm:$0xff]   ;;  %v1200_v1 = vld [vmem:[%s1194_s17] ss:$40 sps:$4 sm:$0xff]   ;;  %v1270_v6 = vld [vmem:[%s1194_s17 + $0x10] ss:$40 sps:$4 sm:$0xff]   ;;  %s1645_s7 = scalar_lea.vmem %s1666_s3, %s1086_s4 }
  0x10   : > { %617 = vrot.lane.b32.xlu0 %v1197_v0, %s1149_s18  ;;  %v1205_v2 = vld [vmem:[%s1194_s17 + $0x8] ss:$40 sps:$4 sm:$0xff]   ;;  %615 = vrot.lane.b32.xlu1 %v1200_v1, %s1149_s18  ;;  %v1265_v5 = vld [vmem:[%s1194_s17 + $0xc] ss:$40 sps:$4 sm:$0xff]  }
  0x11   : > { %v1275_v7 = vld [vmem:[%s1194_s17 + $0x14] ss:$40 sps:$4 sm:$0xff]   ;;  %v1280_v8 = vld [vmem:[%s1194_s17 + $0x18] ss:$40 sps:$4 sm:$0xff]   ;;  %v1353_v12 = vld [vmem:[%s1194_s17 + $0x24] ss:$40 sps:$4 sm:$0xff]  }
  0x12   : > { %v1343_v10 = vld [vmem:[%s1194_s17 + $0x1c] ss:$40 sps:$4 sm:$0xff]   ;;  %v1348_v11 = vld [vmem:[%s1194_s17 + $0x20] ss:$40 sps:$4 sm:$0xff]  }
  0x14   : > { %619 = vrot.lane.b32.xlu0 %v1205_v2, %s1149_s18  ;;  %578 = vrot.lane.b32.xlu1 %v1197_v0, %s1150_s19 }
  0x18   : > { %580 = vrot.lane.b32.xlu0 %v1205_v2, %s1150_s19  ;;  %576 = vrot.lane.b32.xlu1 %v1200_v1, %s1150_s19 }
  0x1c   : > { %539 = vrot.lane.b32.xlu0 %v1197_v0, %s1151_s20  ;;  %541 = vrot.lane.b32.xlu1 %v1205_v2, %s1151_s20 }
  0x20   : > { %537 = vrot.lane.b32.xlu0 %v1200_v1, %s1151_s20  ;;  %503 = vrot.lane.b32.xlu1 %v1197_v0, %s1152_s21 }
  0x24   : > { %505 = vrot.lane.b32.xlu0 %v1205_v2, %s1152_s21  ;;  %501 = vrot.lane.b32.xlu1 %v1200_v1, %s1152_s21 }
  0x28   : > { %467 = vrot.lane.b32.xlu0 %v1197_v0, %s1153_s22  ;;  %469 = vrot.lane.b32.xlu1 %v1205_v2, %s1153_s22 }
  0x2c   : > { %465 = vrot.lane.b32.xlu0 %v1200_v1, %s1153_s22  ;;  %431 = vrot.lane.b32.xlu1 %v1197_v0, %s1154_s23 }
  0x30   : > { %433 = vrot.lane.b32.xlu0 %v1205_v2, %s1154_s23  ;;  %429 = vrot.lane.b32.xlu1 %v1200_v1, %s1154_s23 }
  0x34   : > { %395 = vrot.lane.b32.xlu0 %v1197_v0, %s1155_s24  ;;  %397 = vrot.lane.b32.xlu1 %v1205_v2, %s1155_s24 }
  0x38   : > { %393 = vrot.lane.b32.xlu0 %v1200_v1, %s1155_s24  ;;  %656 = vrot.lane.b32.xlu1 %v1197_v0, %s1156_s27 }
  0x3c   : > { %658 = vrot.lane.b32.xlu0 %v1205_v2, %s1156_s27  ;;  %654 = vrot.lane.b32.xlu1 %v1200_v1, %s1156_s27 }
  0x40   : > { %621 = vrot.lane.b32.xlu0 %v1265_v5, %s1149_s18  ;;  %623 = vrot.lane.b32.xlu1 %v1270_v6, %s1149_s18 }
  0x44   : > { %625 = vrot.lane.b32.xlu0 %v1275_v7, %s1149_s18  ;;  %627 = vrot.lane.b32.xlu1 %v1280_v8, %s1149_s18 }
  0x48   : > { %582 = vrot.lane.b32.xlu0 %v1265_v5, %s1150_s19  ;;  %584 = vrot.lane.b32.xlu1 %v1270_v6, %s1150_s19 }
  0x4c   : > { %586 = vrot.lane.b32.xlu0 %v1275_v7, %s1150_s19  ;;  %588 = vrot.lane.b32.xlu1 %v1280_v8, %s1150_s19 }
  0x50   : > { %543 = vrot.lane.b32.xlu0 %v1265_v5, %s1151_s20  ;;  %545 = vrot.lane.b32.xlu1 %v1270_v6, %s1151_s20 }
  0x54   : > { %547 = vrot.lane.b32.xlu0 %v1275_v7, %s1151_s20  ;;  %549 = vrot.lane.b32.xlu1 %v1280_v8, %s1151_s20 }
  0x58   : > { %507 = vrot.lane.b32.xlu0 %v1265_v5, %s1152_s21  ;;  %509 = vrot.lane.b32.xlu1 %v1270_v6, %s1152_s21 }
  0x5c   : > { %511 = vrot.lane.b32.xlu0 %v1275_v7, %s1152_s21  ;;  %513 = vrot.lane.b32.xlu1 %v1280_v8, %s1152_s21 }
  0x60   : > { %471 = vrot.lane.b32.xlu0 %v1265_v5, %s1153_s22  ;;  %473 = vrot.lane.b32.xlu1 %v1270_v6, %s1153_s22 }
  0x64   : > { %475 = vrot.lane.b32.xlu0 %v1275_v7, %s1153_s22  ;;  %477 = vrot.lane.b32.xlu1 %v1280_v8, %s1153_s22 }
  0x68   : > { %435 = vrot.lane.b32.xlu0 %v1265_v5, %s1154_s23  ;;  %437 = vrot.lane.b32.xlu1 %v1270_v6, %s1154_s23 }
  0x6c   : > { %439 = vrot.lane.b32.xlu0 %v1275_v7, %s1154_s23  ;;  %441 = vrot.lane.b32.xlu1 %v1280_v8, %s1154_s23 }
  0x70   : > { %399 = vrot.lane.b32.xlu0 %v1265_v5, %s1155_s24  ;;  %401 = vrot.lane.b32.xlu1 %v1270_v6, %s1155_s24 }
  0x74   : > { %403 = vrot.lane.b32.xlu0 %v1275_v7, %s1155_s24  ;;  %405 = vrot.lane.b32.xlu1 %v1280_v8, %s1155_s24 }
  0x78   : > { %660 = vrot.lane.b32.xlu0 %v1265_v5, %s1156_s27  ;;  %662 = vrot.lane.b32.xlu1 %v1270_v6, %s1156_s27 }
  0x7c   : > { %664 = vrot.lane.b32.xlu0 %v1275_v7, %s1156_s27  ;;  %666 = vrot.lane.b32.xlu1 %v1280_v8, %s1156_s27 }
  0x80   : > { %629 = vrot.lane.b32.xlu0 %v1343_v10, %s1149_s18  ;;  %631 = vrot.lane.b32.xlu1 %v1348_v11, %s1149_s18 }
  0x82   : > { %v618_v13 = vpop.permute.xlu0 %617  ;;  %v616_v14 = vpop.permute.xlu1 %615 }
  0x83   : > { %v636_v18 = vsel %vm635_vm1, %v616_v14, %v618_v13 }
  0x84   : > { %633 = vrot.lane.b32.xlu0 %v1353_v12, %s1149_s18  ;;  %590 = vrot.lane.b32.xlu1 %v1343_v10, %s1150_s19 }
  0x86   : > { %v1361_v15 = vpop.permute.xlu0 %619  ;;  %v579_v16 = vpop.permute.xlu1 %578 }
  0x87   : > { %v637_v17 = vsel %vm635_vm1, %v618_v13, %v1361_v15 }
  0x88   : > { %712 = vmatprep.subr.bf16.mxu0 %v637_v17  ;;  %592 = vrot.lane.b32.xlu0 %v1348_v11, %s1150_s19 }
  0x89   : > { %594 = vrot.lane.b32.xlu1 %v1353_v12, %s1150_s19  ;;  %713 = vmatpush1.bf16.msra.mxu0 %v636_v18 }
  0x8a   : > { %v1370_v19 = vpop.permute.xlu0 %580  ;;  %v577_v20 = vpop.permute.xlu1 %576 }
  0x8b   : > { %v598_v21 = vsel %vm596_vm2, %v579_v16, %v1370_v19  ;;  %v597_v22 = vsel %vm596_vm2, %v577_v20, %v579_v16 }
  0x8c   : > { %551 = vrot.lane.b32.xlu0 %v1343_v10, %s1151_s20  ;;  %714 = vmatprep.subr.bf16.mxu0 %v598_v21 }
  0x8d   : > { %553 = vrot.lane.b32.xlu1 %v1348_v11, %s1151_s20  ;;  %715 = vmatpush1.bf16.msra.mxu0 %v597_v22 }
  0x8e   : > { %v540_v23 = vpop.permute.xlu0 %539  ;;  %v1379_v24 = vpop.permute.xlu1 %541 }
  0x8f   : > { %v557_v25 = vsel %vm555_vm3, %v540_v23, %v1379_v24 }
  0x90   : > { %515 = vrot.lane.b32.xlu0 %v1343_v10, %s1152_s21  ;;  %716 = vmatprep.subr.bf16.mxu0 %v557_v25 }
  0x91   : > { %517 = vrot.lane.b32.xlu1 %v1348_v11, %s1152_s21 }
  0x92   : > { %v538_v26 = vpop.permute.xlu0 %537  ;;  %v504_v27 = vpop.permute.xlu1 %503 }
  0x93   : > { %v556_v28 = vsel %vm555_vm3, %v538_v26, %v540_v23 }
  0x94   : > { %479 = vrot.lane.b32.xlu0 %v1343_v10, %s1153_s22  ;;  %717 = vmatpush1.bf16.msra.mxu0 %v556_v28 }
  0x95   : > { %481 = vrot.lane.b32.xlu1 %v1348_v11, %s1153_s22 }
  0x96   : > { %v1392_v29 = vpop.permute.xlu0 %505  ;;  %v502_v30 = vpop.permute.xlu1 %501 }
  0x97   : > { %v521_v31 = vsel %vm519_vm4, %v504_v27, %v1392_v29  ;;  %v520_v32 = vsel %vm519_vm4, %v502_v30, %v504_v27 }
  0x98   : > { %443 = vrot.lane.b32.xlu0 %v1343_v10, %s1154_s23  ;;  %718 = vmatprep.subr.bf16.mxu0 %v521_v31 }
  0x99   : > { %445 = vrot.lane.b32.xlu1 %v1348_v11, %s1154_s23  ;;  %719 = vmatpush1.bf16.msra.mxu0 %v520_v32 }
  0x9a   : > { %v468_v33 = vpop.permute.xlu0 %467  ;;  %v1401_v34 = vpop.permute.xlu1 %469 }
  0x9b   : > { %v485_v35 = vsel %vm483_vm5, %v468_v33, %v1401_v34 }
  0x9c   : > { %407 = vrot.lane.b32.xlu0 %v1343_v10, %s1155_s24  ;;  %720 = vmatprep.subr.bf16.mxu0 %v485_v35 }
  0x9d   : > { %409 = vrot.lane.b32.xlu1 %v1348_v11, %s1155_s24 }
  0x9e   : > { %v466_v36 = vpop.permute.xlu0 %465  ;;  %v432_v37 = vpop.permute.xlu1 %431 }
  0x9f   : > { %v484_v38 = vsel %vm483_vm5, %v466_v36, %v468_v33 }
  0xa0   : > { %668 = vrot.lane.b32.xlu0 %v1343_v10, %s1156_s27  ;;  %721 = vmatpush1.bf16.msra.mxu0 %v484_v38 }
  0xa1   : > { %670 = vrot.lane.b32.xlu1 %v1348_v11, %s1156_s27 }
  0xa2   : > { %v1414_v39 = vpop.permute.xlu0 %433  ;;  %v430_v41 = vpop.permute.xlu1 %429 }
  0xa3   : > { %v449_v42 = vsel %vm447_vm6, %v432_v37, %v1414_v39  ;;  %v448_v43 = vsel %vm447_vm6, %v430_v41, %v432_v37 }
  0xa4   : > { %672 = vrot.lane.b32.xlu0 %v1353_v12, %s1156_s27  ;;  %722 = vmatprep.subr.bf16.mxu0 %v449_v42 }
  0xa5   : > { %723 = vmatpush1.bf16.msra.mxu0 %v448_v43  ;;  %695 = vperm.xlu1 %1124, %v346_v40  }
  0xa6   : > { %v396_v44 = vpop.permute.xlu0 %395  ;;  %v1424_v45 = vpop.permute.xlu1 %397 }
  0xa7   : > { %v413_v46 = vsel %vm411_vm7, %v396_v44, %v1424_v45 }
  0xa8   : > { %724 = vmatprep.subr.bf16.mxu0 %v413_v46 }
  0xaa   : > { %v394_v47 = vpop.permute.xlu0 %393  ;;  %v657_v48 = vpop.permute.xlu1 %656 }
  0xab   : > { %v412_v49 = vsel %vm411_vm7, %v394_v47, %v396_v44 }
  0xac   : > { %725 = vmatpush1.bf16.msra.mxu0 %v412_v49 }
  0xad   : > { %726 = vmatprep.subr.bf16.mxu0 %v1197_v0 }
  0xae   : > { %v1430_v50 = vpop.permute.xlu0 %658  ;;  %v655_v51 = vpop.permute.xlu1 %654 }
  0xaf   : > { %v676_v52 = vsel %vm674_vm8, %v657_v48, %v1430_v50  ;;  %v675_v55 = vsel %vm674_vm8, %v655_v51, %v657_v48 }
  0xb0   : > { %727 = vmatpush1.bf16.msra.mxu0 %v1200_v1 }
  0xb1   : > { %742 = vmatprep.subr.bf16.mxu0 %v676_v52 }
  0xb2   : > { %v622_v53 = vpop.permute.xlu0 %621  ;;  %v624_v54 = vpop.permute.xlu1 %623 }
  0xb3   : > { %v638_v56 = vsel %vm635_vm1, %v1361_v15, %v622_v53  ;;  %v639_v57 = vsel %vm635_vm1, %v622_v53, %v624_v54 }
  0xb4   : > { %743 = vmatpush2.bf16.msra.mxu0 %v675_v55  ;;  %753 = vmatprep.subr.bf16.mxu1 %v639_v57 }
  0xb5   : > { %754 = vmatpush1.bf16.msra.mxu1 %v638_v56 }
  0xb6   : > { %v626_v58 = vpop.permute.xlu0 %625  ;;  %v1440_v60 = vpop.permute.xlu1 %627 }
  0xb7   : > { %v640_v59 = vsel %vm635_vm1, %v624_v54, %v626_v58  ;;  %745 = vmatmul.mubr.bf16.vlgmr.msra.gmra.mxu0 %v1248_v3  ;;  %v641_v61 = vsel %vm635_vm1, %v626_v58, %v1440_v60 }
  0xb8   : > { %1080 = vmatprep.mubr.msk.bf16.mxu0 %vm708_vm0, %v1252_v4  ;;  %794 = vmatprep.subr.bf16.mxu0 %v641_v61 }
  0xb9   : > { %795 = vmatpush1.bf16.msra.mxu0 %v640_v59 }
  0xba   : > { %v583_v62 = vpop.permute.xlu0 %582  ;;  %v585_v63 = vpop.permute.xlu1 %584 }
  0xbb   : > { %v599_v0 = vsel %vm596_vm2, %v1370_v19, %v583_v62  ;;  %v600_v1 = vsel %vm596_vm2, %v583_v62, %v585_v63 }
  0xbc   : > { %755 = vmatprep.subr.bf16.mxu1 %v600_v1 }
  0xbd   : > { %756 = vmatpush1.bf16.msra.mxu1 %v599_v0 }
  0xbe   : > { %v587_v12 = vpop.permute.xlu0 %586  ;;  %v1451_v14 = vpop.permute.xlu1 %588 }
  0xbf   : > { %v601_v13 = vsel %vm596_vm2, %v585_v63, %v587_v12  ;;  %v602_v15 = vsel %vm596_vm2, %v587_v12, %v1451_v14 }
  0xc0   : > { %796 = vmatprep.subr.bf16.mxu0 %v602_v15 }
  0xc1   : > { %797 = vmatpush1.bf16.msra.mxu0 %v601_v13 }
  0xc2   : > { %v544_v16 = vpop.permute.xlu0 %543  ;;  %v546_v17 = vpop.permute.xlu1 %545 }
  0xc3   : > { %v558_v18 = vsel %vm555_vm3, %v1379_v24, %v544_v16  ;;  %v559_v19 = vsel %vm555_vm3, %v544_v16, %v546_v17 }
  0xc4   : > { %757 = vmatprep.subr.bf16.mxu1 %v559_v19 }
  0xc5   : > { %758 = vmatpush1.bf16.msra.mxu1 %v558_v18 }
  0xc6   : > { %v548_v20 = vpop.permute.xlu0 %547  ;;  %v1459_v22 = vpop.permute.xlu1 %549 }
  0xc7   : > { %v560_v21 = vsel %vm555_vm3, %v546_v17, %v548_v20  ;;  %v561_v23 = vsel %vm555_vm3, %v548_v20, %v1459_v22 }
  0xc8   : > { %798 = vmatprep.subr.bf16.mxu0 %v561_v23 }
  0xc9   : > { %799 = vmatpush1.bf16.msra.mxu0 %v560_v21 }
  0xca   : > { %v508_v25 = vpop.permute.xlu0 %507  ;;  %v510_v26 = vpop.permute.xlu1 %509 }
  0xcb   : > { %v522_v27 = vsel %vm519_vm4, %v1392_v29, %v508_v25  ;;  %v523_v24 = vsel %vm519_vm4, %v508_v25, %v510_v26 }
  0xcc   : > { %759 = vmatprep.subr.bf16.mxu1 %v523_v24 }
  0xcd   : > { %760 = vmatpush1.bf16.msra.mxu1 %v522_v27 }
  0xce   : > { %v512_v28 = vpop.permute.xlu0 %511  ;;  %v1467_v31 = vpop.permute.xlu1 %513 }
  0xcf   : > { %v524_v30 = vsel %vm519_vm4, %v510_v26, %v512_v28  ;;  %v525_v32 = vsel %vm519_vm4, %v512_v28, %v1467_v31 }
  0xd0   : > { %800 = vmatprep.subr.bf16.mxu0 %v525_v32 }
  0xd1   : > { %801 = vmatpush1.bf16.msra.mxu0 %v524_v30 }
  0xd2   : > { %v472_v33 = vpop.permute.xlu0 %471  ;;  %v474_v35 = vpop.permute.xlu1 %473 }
  0xd3   : > { %v486_v36 = vsel %vm483_vm5, %v1401_v34, %v472_v33  ;;  %v487_v29 = vsel %vm483_vm5, %v472_v33, %v474_v35 }
  0xd4   : > { %761 = vmatprep.subr.bf16.mxu1 %v487_v29 }
  0xd5   : > { %762 = vmatpush1.bf16.msra.mxu1 %v486_v36 }
  0xd6   : > { %v476_v37 = vpop.permute.xlu0 %475  ;;  %v1475_v40 = vpop.permute.xlu1 %477 }
  0xd7   : > { %v488_v38 = vsel %vm483_vm5, %v474_v35, %v476_v37  ;;  %v489_v41 = vsel %vm483_vm5, %v476_v37, %v1475_v40 }
  0xd8   : > { %802 = vmatprep.subr.bf16.mxu0 %v489_v41 }
  0xd9   : > { %803 = vmatpush1.bf16.msra.mxu0 %v488_v38 }
  0xda   : > { %v436_v42 = vpop.permute.xlu0 %435  ;;  %v438_v43 = vpop.permute.xlu1 %437 }
  0xdb   : > { %v450_v44 = vsel %vm447_vm6, %v1414_v39, %v436_v42  ;;  %v451_v34 = vsel %vm447_vm6, %v436_v42, %v438_v43 }
  0xdc   : > { %763 = vmatprep.subr.bf16.mxu1 %v451_v34 }
  0xdd   : > { %764 = vmatpush1.bf16.msra.mxu1 %v450_v44 }
  0xde   : > { %v440_v46 = vpop.permute.xlu0 %439  ;;  %v1483_v48 = vpop.permute.xlu1 %441 }
  0xdf   : > { %v452_v47 = vsel %vm447_vm6, %v438_v43, %v440_v46  ;;  %v453_v49 = vsel %vm447_vm6, %v440_v46, %v1483_v48 }
  0xe0   : > { %804 = vmatprep.subr.bf16.mxu0 %v453_v49 }
  0xe1   : > { %805 = vmatpush1.bf16.msra.mxu0 %v452_v47 }
  0xe2   : > { %v400_v51 = vpop.permute.xlu0 %399  ;;  %v402_v52 = vpop.permute.xlu1 %401 }
  0xe3   : > { %v414_v53 = vsel %vm411_vm7, %v1424_v45, %v400_v51  ;;  %v415_v39 = vsel %vm411_vm7, %v400_v51, %v402_v52 }
  0xe4   : > { %765 = vmatprep.subr.bf16.mxu1 %v415_v39 }
  0xe5   : > { %766 = vmatpush1.bf16.msra.mxu1 %v414_v53 }
  0xe6   : > { %v404_v54 = vpop.permute.xlu0 %403  ;;  %v1491_v56 = vpop.permute.xlu1 %405  ;;  %767 = vmatprep.subr.bf16.mxu1 %v1265_v5 }
  0xe7   : > { %v416_v55 = vsel %vm411_vm7, %v402_v52, %v404_v54  ;;  %v417_v57 = vsel %vm411_vm7, %v404_v54, %v1491_v56 }
  0xe8   : > { %806 = vmatprep.subr.bf16.mxu0 %v417_v57 }
  0xe9   : > { %768 = vmatpush1.bf16.msra.mxu1 %v1205_v2  ;;  %807 = vmatpush1.bf16.msra.mxu0 %v416_v55 }
  0xea   : > { %v661_v58 = vpop.permute.xlu0 %660  ;;  %v663_v45 = vpop.permute.xlu1 %662  ;;  %808 = vmatprep.subr.bf16.mxu0 %v1275_v7 }
  0xeb   : > { %v677_v59 = vsel %vm674_vm8, %v1430_v50, %v661_v58  ;;  %v678_v61 = vsel %vm674_vm8, %v661_v58, %v663_v45 }
  0xec   : > { %783 = vmatprep.subr.bf16.mxu1 %v678_v61 }
  0xed   : > { %784 = vmatpush2.bf16.msra.mxu1 %v677_v59  ;;  %809 = vmatpush1.bf16.msra.mxu0 %v1270_v6 }
  0xee   : > { %v665_v5 = vpop.permute.xlu0 %664  ;;  %v1503_v63 = vpop.permute.xlu1 %666 }
  0xef   : > { %v679_v62 = vsel %vm674_vm8, %v663_v45, %v665_v5  ;;  %v680_v2 = vsel %vm674_vm8, %v665_v5, %v1503_v63 }
  0xf0   : > { %786 = vmatmul.mubr.bf16.vlgmr.msra.gmra.mxu1 %v1248_v3  ;;  %824 = vmatprep.subr.bf16.mxu0 %v680_v2 }
  0xf1   : > { %825 = vmatpush2.bf16.msra.mxu0 %v679_v62  ;;  %1081 = vmatprep.mubr.msk.bf16.mxu1 %vm708_vm0, %v1252_v4 }
  0xf2   : > { %v630_v7 = vpop.permute.xlu0 %629  ;;  %v632_v6 = vpop.permute.xlu1 %631  ;;  %876 = vmatprep.subr.bf16.mxu0 %v1157_v9 }
  0xf3   : > { %v642_v50 = vsel %vm635_vm1, %v1440_v60, %v630_v7  ;;  %v643_v0 = vsel %vm635_vm1, %v630_v7, %v632_v6 }
  0xf4   : > { %835 = vmatprep.subr.bf16.mxu1 %v643_v0  ;;  %827 = vmatmul.mubr.bf16.vlgmr.msra.gmra.mxu0 %v1248_v3 }
  0xf5   : > { %836 = vmatpush1.bf16.msra.mxu1 %v642_v50  ;;  %1082 = vmatprep.mubr.msk.bf16.mxu0 %vm708_vm0, %v1252_v4 }
  0xf6   : > { %v634_v1 = vpop.permute.xlu0 %633  ;;  %v591_v13 = vpop.permute.xlu1 %590 }
  0xf7   : > { %v644_v12 = vsel %vm635_vm1, %v632_v6, %v634_v1  ;;  %v603_v17 = vsel %vm596_vm2, %v1451_v14, %v591_v13 }
  0xf8   : > { %877 = vmatpush1.bf16.msra.mxu0 %v644_v12 }
  0xf9   : > { %878 = vmatprep.subr.bf16.mxu0 %v1157_v9 }
  0xfa   : > { %v593_v60 = vpop.permute.xlu0 %592 }
  0xfb   : > { %v595_v15 = vpop.permute.xlu1 %594  ;;  %v604_v16 = vsel %vm596_vm2, %v591_v13, %v593_v60 }
  0xfc   : > { %v605_v18 = vsel %vm596_vm2, %v593_v60, %v595_v15  ;;  %837 = vmatprep.subr.bf16.mxu1 %v604_v16 }
  0xfd   : > { %879 = vmatpush1.bf16.msra.mxu0 %v605_v18  ;;  %838 = vmatpush1.bf16.msra.mxu1 %v603_v17 }
  0xfe   : > { %v552_v19 = vpop.permute.xlu0 %551  ;;  %880 = vmatprep.subr.bf16.mxu0 %v1157_v9 }
  0xff   : > { %v562_v4 = vsel %vm555_vm3, %v1459_v22, %v552_v19  ;;  %v554_v20 = vpop.permute.xlu1 %553 }
 0x100   : > { %v563_v21 = vsel %vm555_vm3, %v552_v19, %v554_v20 }
 0x101   : > { %839 = vmatprep.subr.bf16.mxu1 %v563_v21  ;;  %881 = vmatpush1.bf16.msra.mxu0 %v554_v20 }
 0x102   : > { %840 = vmatpush1.bf16.msra.mxu1 %v562_v4  ;;  %v516_v23 = vpop.permute.xlu0 %515  ;;  %882 = vmatprep.subr.bf16.mxu0 %v1157_v9 }
 0x103   : > { %v526_v14 = vsel %vm519_vm4, %v1467_v31, %v516_v23  ;;  %v518_v25 = vpop.permute.xlu1 %517 }
 0x104   : > { %v527_v26 = vsel %vm519_vm4, %v516_v23, %v518_v25 }
 0x105   : > { %841 = vmatprep.subr.bf16.mxu1 %v527_v26  ;;  %883 = vmatpush1.bf16.msra.mxu0 %v518_v25 }
 0x106   : > { %842 = vmatpush1.bf16.msra.mxu1 %v526_v14  ;;  %v480_v27 = vpop.permute.xlu0 %479  ;;  %884 = vmatprep.subr.bf16.mxu0 %v1157_v9 }
 0x107   : > { %v490_v22 = vsel %vm483_vm5, %v1475_v40, %v480_v27  ;;  %v482_v24 = vpop.permute.xlu1 %481 }
 0x108   : > { %v491_v28 = vsel %vm483_vm5, %v480_v27, %v482_v24 }
 0x109   : > { %843 = vmatprep.subr.bf16.mxu1 %v491_v28  ;;  %885 = vmatpush1.bf16.msra.mxu0 %v482_v24 }
 0x10a   : > { %844 = vmatpush1.bf16.msra.mxu1 %v490_v22  ;;  %v444_v30 = vpop.permute.xlu0 %443  ;;  %886 = vmatprep.subr.bf16.mxu0 %v1157_v9 }
 0x10b   : > { %v454_v31 = vsel %vm447_vm6, %v1483_v48, %v444_v30  ;;  %v446_v32 = vpop.permute.xlu1 %445 }
 0x10c   : > { %v455_v33 = vsel %vm447_vm6, %v444_v30, %v446_v32 }
 0x10d   : > { %845 = vmatprep.subr.bf16.mxu1 %v455_v33  ;;  %887 = vmatpush1.bf16.msra.mxu0 %v446_v32 }
 0x10e   : > { %846 = vmatpush1.bf16.msra.mxu1 %v454_v31  ;;  %v408_v35 = vpop.permute.xlu0 %407  ;;  %888 = vmatprep.subr.bf16.mxu0 %v1157_v9 }
 0x10f   : > { %v418_v36 = vsel %vm411_vm7, %v1491_v56, %v408_v35  ;;  %v410_v29 = vpop.permute.xlu1 %409 }
 0x110   : > { %v419_v37 = vsel %vm411_vm7, %v408_v35, %v410_v29 }
 0x111   : > { %847 = vmatprep.subr.bf16.mxu1 %v419_v37  ;;  %889 = vmatpush1.bf16.msra.mxu0 %v410_v29 }
 0x112   : > { %848 = vmatpush1.bf16.msra.mxu1 %v418_v36  ;;  %v669_v38 = vpop.permute.xlu0 %668  ;;  %890 = vmatprep.subr.bf16.mxu0 %v1157_v9 }
 0x113   : > { %849 = vmatprep.subr.bf16.mxu1 %v1343_v10  ;;  %v671_v40 = vpop.permute.xlu1 %670  ;;  %v681_v44 = vsel %vm674_vm8, %v1503_v63, %v669_v38  ;;  %v172_v10 = vlaneseq }
 0x114   : > { %v682_v41 = vsel %vm674_vm8, %v669_v38, %v671_v40 }
 0x115   : > { %891 = vmatpush1.bf16.msra.mxu0 %v1348_v11  ;;  %v1554_v34 = vand.u32 127, %v172_v10 }
 0x116   : > { %850 = vmatpush1.bf16.msra.mxu1 %v1280_v8  ;;  %v673_v42 = vpop.permute.xlu0 %672  ;;  %906 = vmatprep.subr.bf16.mxu0 %v1157_v9 }
 0x117   : > { %v683_v43 = vsel %vm674_vm8, %v671_v40, %v673_v42  ;;  %865 = vmatprep.subr.bf16.mxu1 %v682_v41  ;;  %v174_v8 = vadd.s32 128, %v1554_v34  ;;  %v1558_v11 = vmul.u32.u64.low 4042322161, %v1554_v34  ;;  %v1559_v9 = vmul.u32.u64.high 4042322161, %v1554_v34, %v1558_v11 }
 0x118   : > { %v175_v7 = vadd.s32 256, %v1554_v34  ;;  %v176_v50 = vadd.s32 384, %v1554_v34  ;;  %v177_v1 = vadd.s32 512, %v1554_v34  ;;  %v181_v10 = vadd.s32 1024, %v1554_v34 }
 0x119   : > { %907 = vmatpush2.bf16.msra.mxu0 %v683_v43  ;;  %v1561_v46 = vmul.u32.u64.low 4042322161, %v174_v8  ;;  %v1562_v47 = vmul.u32.u64.high 4042322161, %v174_v8, %v1561_v46  ;;  %v188_v48 = vshrl.u32 %v1559_v9, 5 }
 0x11a   : > { %866 = vmatpush2.bf16.msra.mxu1 %v681_v44  ;;  %v1575_v6 = vmul.u32.u64.low 4042322161, %v175_v7  ;;  %v1576_v0 = vmul.u32.u64.high 4042322161, %v175_v7, %v1575_v6  ;;  %v1579_v12 = vmul.u32.u64.low 4042322161, %v176_v50  ;;  %v1580_v13 = vmul.u32.u64.high 4042322161, %v176_v50, %v1579_v12 }
 0x11b   : > { %v199_v49 = vshrl.u32 %v1562_v47, 5  ;;  %v189_v51 = vmul.u32 34, %v188_v48  ;;  %v1582_v60 = vmul.u32.u64.low 4042322161, %v177_v1  ;;  %v1583_v15 = vmul.u32.u64.high 4042322161, %v177_v1, %v1582_v60 }
 0x11c   : > { %909 = vmatmul.mubr.bf16.vlgmr.msra.gmra.mxu0 %v1248_v3  ;;  %v210_v16 = vshrl.u32 %v1576_v0, 5  ;;  %v221_v17 = vshrl.u32 %v1580_v13, 5  ;;  %v1596_v11 = vmul.u32.u64.low 4042322161, %v181_v10  ;;  %v1597_v9 = vmul.u32.u64.high 4042322161, %v181_v10, %v1596_v11 }
 0x11d   : > { %868 = vmatmul.mubr.bf16.vlgmr.msra.gmra.mxu1 %v1248_v3  ;;  %v200_v52 = vmul.u32 34, %v199_v49  ;;  %v190_v3 = vsub.s32 %v1554_v34, %v189_v51  ;;  %v232_v19 = vshrl.u32 %v1583_v15, 5  ;;  %v178_v46 = vadd.s32 640, %v1554_v34 }
 0x11e   : > { %v211_v18 = vmul.u32 34, %v210_v16  ;;  %v222_v4 = vmul.u32 34, %v221_v17  ;;  %v179_v49 = vadd.s32 768, %v1554_v34 }
 0x11f   : > { %v201_v53 = vsub.s32 %v174_v8, %v200_v52  ;;  %vm281_vm9 = vcmp.ne.s32.totalorder %v190_v3, 0  ;;  %vm290_vm10 = vcmp.lt.s32.totalorder %v190_v3, 0  ;;  %v308_v39 = vadd.s32 34, %v190_v3 }
 0x120   : > { %vm299_vm13 = vmand %vm290_vm10, %vm281_vm9  ;;  %v1567_v56 = vpop.permute.xlu1 %695  ;;  %v212_v20 = vsub.s32 %v175_v7, %v211_v18  ;;  %v233_v21 = vmul.u32 34, %v232_v19  ;;  %v223_v23 = vsub.s32 %v176_v50, %v222_v4  ;;  %v180_v8 = vadd.s32 896, %v1554_v34 }
 0x121   : > { %vm282_vm11 = vcmp.ne.s32.totalorder %v201_v53, 0  ;;  %vm291_vm12 = vcmp.lt.s32.totalorder %v201_v53, 0  ;;  %v309_v54 = vadd.s32 34, %v201_v53  ;;  %v317_v55 = vsel %vm299_vm13, %v308_v39, %v190_v3 }
 0x122   : > { %vm300_vm14 = vmand %vm291_vm12, %vm282_vm11  ;;  %vm326_vm15 = vcmp.lt.s32.totalorder %v317_v55, 32  ;;  %vm283_vm1 = vcmp.ne.s32.totalorder %v212_v20, 0  ;;  %vm292_vm2 = vcmp.lt.s32.totalorder %v212_v20, 0  ;;  %v234_v14 = vsub.s32 %v177_v1, %v233_v21 }
 0x123   : > { %v318_v57 = vsel %vm300_vm14, %v309_v54, %v201_v53  ;;  %v310_v25 = vadd.s32 34, %v212_v20  ;;  %vm284_vm3 = vcmp.ne.s32.totalorder %v223_v23, 0  ;;  %vm293_vm4 = vcmp.lt.s32.totalorder %v223_v23, 0  ;;  %vm301_vm5 = vmand %vm292_vm2, %vm283_vm1 }
 0x124   : > { %vm327_vm0 = vcmp.lt.s32.totalorder %v318_v57, 32  ;;  %v311_v26 = vadd.s32 34, %v223_v23  ;;  %vm285_vm6 = vcmp.ne.s32.totalorder %v234_v14, 0  ;;  %vm294_vm7 = vcmp.lt.s32.totalorder %v234_v14, 0  ;;  %vm302_vm8 = vmand %vm293_vm4, %vm284_vm3 }
 0x125   : > { %v319_v27 = vsel %vm301_vm5, %v310_v25, %v212_v20  ;;  %v312_v22 = vadd.s32 34, %v234_v14  ;;  %vm303_vm9 = vmand %vm294_vm7, %vm285_vm6  ;;  %v1600_v47 = vmul.u32.u64.low 4042322161, %v180_v8  ;;  %v1601_v48 = vmul.u32.u64.high 4042322161, %v180_v8, %v1600_v47 }
 0x126   : > { %v320_v24 = vsel %vm302_vm8, %v311_v26, %v223_v23  ;;  %vm328_vm10 = vcmp.lt.s32.totalorder %v319_v27, 32  ;;  %v1604_v51 = vmul.u32.u64.low 4042322161, %v178_v46  ;;  %v1605_v52 = vmul.u32.u64.high 4042322161, %v178_v46, %v1604_v51 }
 0x127   : > { %v321_v31 = vsel %vm303_vm9, %v312_v22, %v234_v14  ;;  %vm329_vm11 = vcmp.lt.s32.totalorder %v320_v24, 32  ;;  %v1607_v3 = vmul.u32.u64.low 4042322161, %v179_v49  ;;  %v1608_v53 = vmul.u32.u64.high 4042322161, %v179_v49, %v1607_v3 }
 0x128   : > { %vm330_vm12 = vcmp.lt.s32.totalorder %v321_v31, 32  ;;  %v276_v39 = vshrl.u32 %v1597_v9, 5  ;;  %v265_v54 = vshrl.u32 %v1601_v48, 5  ;;  %v243_v57 = vshrl.u32 %v1605_v52, 5 }
 0x129   : > { %v1159_v47 = vmov 0.0  }
 0x12a   : > { %v277_v55 = vmul.u32 34, %v276_v39 }
 0x177   : > { %v746_v58 = vpop.f32.mrf.mxu0 }
 0x178   : > { %v747_v45 = vadd.f32 %v746_v58, %v1567_v56  ;;  %v266_v58 = vmul.u32 34, %v265_v54 }
 0x179   : > { %v748_v59 = vpop.f32.mrf.mxu0 }
 0x17a   : > { %v749_v61 = vadd.f32 %v748_v59, %v1567_v56  ;;  %v934_v5 = vsel %vm326_vm15, %v747_v45, 0.0  ;;  %v254_v45 = vshrl.u32 %v1608_v53, 5  ;;  %v278_v59 = vsub.s32 %v181_v10, %v277_v55 }
 0x17b   : > { %v750_v62 = vpop.f32.mrf.mxu0  ;;  %952 = vrot.lane.b32.xlu0 %v934_v5, %s1158_s30  ;;  %v267_v5 = vsub.s32 %v180_v8, %v266_v58 }
 0x17c   : > { %v935_v63 = vsel %vm327_vm0, %v749_v61, 0.0  ;;  %v244_v61 = vmul.u32 34, %v243_v57  ;;  %v255_v34 = vmul.u32 34, %v254_v45  ;;  %vm289_vm13 = vcmp.ne.s32.totalorder %v278_v59, 0 }
 0x17d   : > { %v751_v2 = vpop.f32.mrf.mxu0  ;;  %954 = vrot.lane.b32.xlu1 %v935_v63, %s1158_s30  ;;  %vm298_vm14 = vcmp.lt.s32.totalorder %v278_v59, 0  ;;  %v316_v63 = vadd.s32 34, %v278_v59  ;;  %vm288_vm0 = vcmp.ne.s32.totalorder %v267_v5, 0  ;;  %vm297_vm1 = vcmp.lt.s32.totalorder %v267_v5, 0 }
 0x17e   : > { %v245_v62 = vsub.s32 %v178_v46, %v244_v61  ;;  %vm307_vm15 = vmand %vm298_vm14, %vm289_vm13  ;;  %v256_v2 = vsub.s32 %v179_v49, %v255_v34  ;;  %v315_v7 = vadd.s32 34, %v267_v5  ;;  %vm970_vm13 = vcmask 285696  }
 0x17f   : > { %v325_v50 = vsel %vm307_vm15, %v316_v63, %v278_v59  ;;  %vm1614_vm4 = vmand %vm297_vm1, %vm288_vm0  ;;  %vm982_vm14 = vcmask 793600   ;;  %vm1001_vm15 = vcmask 1043456   ;;  %vm1002_vm0 = vcmask 31748  }
 0x180   : > { %vm286_vm2 = vcmp.ne.s32.totalorder %v245_v62, 0  ;;  %vm295_vm3 = vcmp.lt.s32.totalorder %v245_v62, 0  ;;  %v313_v0 = vadd.s32 34, %v245_v62  ;;  %vm287_vm6 = vcmp.ne.s32.totalorder %v256_v2, 0  ;;  %vm1003_vm1 = vmor %vm1002_vm0, %vm1001_vm15 }
 0x181   : > { %vm1618_vm5 = vmand %vm295_vm3, %vm286_vm2  ;;  %vm296_vm7 = vcmp.lt.s32.totalorder %v256_v2, 0  ;;  %vm334_vm8 = vcmp.lt.s32.totalorder %v325_v50, 32  ;;  %v324_v13 = vsel %vm1614_vm4, %v315_v7, %v267_v5  ;;  %v314_v60 = vadd.s32 34, %v256_v2 }
 0x182   : > { %v322_v17 = vsel %vm1618_vm5, %v313_v0, %v245_v62  ;;  %vm1627_vm9 = vmand %vm296_vm7, %vm287_vm6 }
 0x183   : > { %v323_v25 = vsel %vm1627_vm9, %v314_v60, %v256_v2 }
 0x1b0   : > { %v787_v28 = vpop.f32.mrf.mxu1 }
 0x1b1   : > { %v788_v30 = vadd.f32 %v787_v28, %v1567_v56 }
 0x1b2   : > { %v789_v32 = vpop.f32.mrf.mxu1 }
 0x1b3   : > { %v790_v33 = vadd.f32 %v789_v32, %v1567_v56  ;;  %v936_v35 = vsel %vm328_vm10, %v788_v30, 0.0  ;;  %vm333_vm10 = vcmp.lt.s32.totalorder %v324_v13, 32 }
 0x1b4   : > { %956 = vrot.lane.b32.xlu0 %v936_v35, %s1158_s30  ;;  %v828_v36 = vpop.f32.mrf.mxu0  ;;  %v791_v29 = vpop.f32.mrf.mxu1 }
 0x1b5   : > { %v829_v37 = vadd.f32 %v828_v36, %v1567_v56  ;;  %v937_v38 = vsel %vm329_vm11, %v790_v33, 0.0  ;;  %vm331_vm11 = vcmp.lt.s32.totalorder %v322_v17, 32 }
 0x1b6   : > { %958 = vrot.lane.b32.xlu1 %v937_v38, %s1158_s30  ;;  %v830_v40 = vpop.f32.mrf.mxu0  ;;  %v792_v41 = vpop.f32.mrf.mxu1 }
 0x1b7   : > { %v938_v42 = vsel %vm330_vm12, %v829_v37, 0.0  ;;  %v831_v4 = vadd.f32 %v830_v40, %v1567_v56  ;;  %vm332_vm12 = vcmp.lt.s32.totalorder %v323_v25, 32 }
 0x1b8   : > { %v832_v43 = vpop.f32.mrf.mxu0  ;;  %960 = vrot.lane.b32.xlu0 %v938_v42, %s1158_s30 }
 0x1b9   : > { %v939_v30 = vsel %vm331_vm11, %v831_v4, 0.0 }
 0x1ba   : > { %v833_v44 = vpop.f32.mrf.mxu0 }
 0x1dc   : > { %v910_v12 = vpop.f32.mrf.mxu0 }
 0x1dd   : > { %v911_v15 = vadd.f32 %v910_v12, %v1567_v56  ;;  %v869_v16 = vpop.f32.mrf.mxu1 }
 0x1de   : > { %v912_v19 = vpop.f32.mrf.mxu0  ;;  %v870_v27 = vadd.f32 %v869_v16, %v1567_v56 }
 0x1df   : > { %v871_v20 = vpop.f32.mrf.mxu1  ;;  %v942_v21 = vsel %vm334_vm8, %v911_v15, 0.0 }
 0x1e0   : > { %v872_v23 = vadd.f32 %v871_v20, %v1567_v56  ;;  %v913_v14 = vpop.f32.mrf.mxu0  ;;  %968 = vrot.lane.b32.xlu1 %v942_v21, %s1158_s30  ;;  %v940_v31 = vsel %vm332_vm12, %v870_v27, 0.0 }
 0x1e1   : > { %v873_v26 = vpop.f32.mrf.mxu1 }
 0x1e2   : > { %v914_v22 = vpop.f32.mrf.mxu0  ;;  %v941_v24 = vsel %vm333_vm10, %v872_v23, 0.0 }
 0x1e3   : > { %v874_v28 = vpop.f32.mrf.mxu1  ;;  %966 = vrot.lane.b32.xlu0 %v941_v24, %s1158_s30 }
 0x1e4   : > { %962 = vrot.lane.b32.xlu1 %v939_v30, %s1158_s30 }
 0x1e7   : > { %964 = vrot.lane.b32.xlu0 %v940_v31, %s1158_s30 }
 0x1ed   : > { %v953_v32 = vpop.permute.xlu0 %952 }
 0x1ee   : > { %v981_v33 = vsel %vm970_vm13, 0.0, %v953_v32 }
 0x1ef   : > { %v955_v35 = vpop.permute.xlu1 %954 }
 0x1f0   : > { %v971_v56 = vsel %vm970_vm13, %v953_v32, %v955_v35 }
 0x1f1   : > { %v987_v36 = vcombine.low %v981_v33, %v971_v56 }
 0x1f3   : > { %997 = vst [vmem:[%s1645_s7] sm:$0xff] %v987_v36 }
 0x226   : > { %v957_v29 = vpop.permute.xlu0 %956 }
 0x227   : > { %v972_v38 = vsel %vm970_vm13, %v955_v35, %v957_v29 }
 0x228   : > { %v959_v37 = vpop.permute.xlu1 %958 }
 0x229   : > { %v973_v40 = vsel %vm970_vm13, %v957_v29, %v959_v37 }
 0x22a   : > { %v988_v41 = vcombine.low %v972_v38, %v973_v40  ;;  %v961_v42 = vpop.permute.xlu0 %960 }
 0x22b   : > { %v974_v11 = vsel %vm970_vm13, %v959_v37, %v961_v42 }
 0x22c   : > { %998 = vst [vmem:[%s1645_s7 + $0x8] sm:$0xff] %v988_v41 }
 0x252   : > { %v969_v43 = vpop.permute.xlu1 %968 }
 0x255   : > { %v967_v44 = vpop.permute.xlu0 %966 }
 0x256   : > { %v978_v10 = vsel %vm970_vm13, %v967_v44, %v969_v43  ;;  %v963_v8 = vpop.permute.xlu1 %962 }
 0x257   : > { %v983_v9 = vsel %vm982_vm14, %v978_v10, 0.0  ;;  %v975_v46 = vsel %vm970_vm13, %v961_v42, %v963_v8 }
 0x258   : > { %v991_v48 = vcombine.low %v983_v9, %v1159_v47  ;;  %v989_v49 = vcombine.low %v974_v11, %v975_v46 }
 0x259   : > { %v965_v51 = vpop.permute.xlu0 %964 }
 0x25a   : > { %1004 = vst.msk [vmem:[%s1645_s7 + $0x20] sm:$0xff] %vm1003_vm1, %v991_v48  ;;  %999 = vst [vmem:[%s1645_s7 + $0x10] sm:$0xff] %v989_v49  ;;  %v976_v52 = vsel %vm970_vm13, %v963_v8, %v965_v51  ;;  %v977_v3 = vsel %vm970_vm13, %v965_v51, %v967_v44 }
 0x25b   : > { %v990_v53 = vcombine.low %v976_v52, %v977_v3 }
 0x25d   : > { %1000 = vst [vmem:[%s1645_s7 + $0x18] sm:$0xff] %v990_v53 }
 0x25e PF: > { %s13_s12 = sadd.s32 1, %s1147_s12  }
 0x25f   : > { %p10_p4 = scmp.ge.s32.totalorder %s13_s12, 4  }
 0x261   :  { %12 = sbr.rel (!%p10_p4) target bundleno = 1 (0x1), region = 62 }

</bundles_post_ra>
